<compile_context>
chip_gen: v7x
topology: tpu7x:2x2x1
jax: 0.10.0
libtpu: 0.0.40
codegen_flags: <defaults>
</compile_context>

<pallas_src>
import jax
import jax.numpy as jnp
import numpy as np
from jax import lax
from jax.experimental import pallas as pl
from jax.experimental.pallas import tpu as pltpu

_EPS = 1e-5


def _convnet4_kernel(x_ref,
                     w1_ref, b1_ref,
                     w2_ref, b2_ref,
                     w3_ref, b3_ref,
                     w4_ref, b4_ref,
                     o_ref,
                     pad1, cv1, pad2, cv2, pad3, cv3, pad4, cv4):
    """Fully fused ConvNet4 forward for a single batch element (NHWC in VMEM).

    x_ref:   (1, H, W, C0)           input tile
    wK_ref:  (9, CinK, CoutK)        3x3 taps (BN scale pre-folded), tap = 3*dy + dx
    bK_ref:  (1, CoutK)              folded bias (conv bias + BN mean/beta)
    o_ref:   (1, H/16, W/16, C4)     output after 4 pools
    padK:    VMEM (Hk+2, Wk+2, CinK) zero-padded layer input
    cvK:     VMEM (Hk*Wk, CoutK)     conv+BN+ReLU output (pool staging)
    """

    def conv_block(act, pad_ref, conv_ref, w_ref, b_ref):
        H, W, cin = act.shape
        cout = w_ref.shape[2]
        ho, wo = H // 2, W // 2

        # In-kernel zero padding (conv padding=1): zero the buffer, write interior.
        # The whole-buffer zero is tiny relative to the 9 matmuls and keeps stores
        # simple/aligned; the border stays zero after the interior overwrite.
        pad_ref[...] = jnp.zeros_like(pad_ref)
        pad_ref[pl.ds(1, H), pl.ds(1, W), :] = act

        # 3x3 conv as 9 whole-image (H*W, Cin) @ (Cin, Cout) MXU matmuls.
        acc = None
        for dy in range(3):
            for dx in range(3):
                slab = pad_ref[pl.ds(dy, H), pl.ds(dx, W), :]          # (H, W, Cin)
                t = jnp.dot(slab.reshape(H * W, cin),
                            w_ref[3 * dy + dx],
                            preferred_element_type=jnp.float32)
                acc = t if acc is None else acc + t                   # (H*W, Cout)

        # Folded bias + ReLU (BN scale already baked into the weights on host).
        y = jnp.maximum(acc + b_ref[...], 0.0)                        # (H*W, Cout)

        # 2x2 / stride-2 max pool:
        #   W-pairs via one strided VMEM read of the whole conv output,
        #   H-pairs in registers (lane-dim-preserving reshape + leading-axis max).
        conv_ref[...] = y
        c0 = conv_ref[pl.ds(0, H * wo, stride=2), :]                  # even w columns
        c1 = conv_ref[pl.ds(1, H * wo, stride=2), :]                  # odd  w columns
        m = jnp.maximum(c0, c1)                                       # (H*wo, Cout)
        return jnp.max(m.reshape(ho, 2, wo, cout), axis=1)            # (ho, wo, Cout)

    a = conv_block(x_ref[0], pad1, cv1, w1_ref, b1_ref)
    a = conv_block(a,        pad2, cv2, w2_ref, b2_ref)
    a = conv_block(a,        pad3, cv3, w3_ref, b3_ref)
    a = conv_block(a,        pad4, cv4, w4_ref, b4_ref)
    o_ref[0] = a


def convnet4_pallas(x_nhwc, params):
    """Fused 4-block forward. x_nhwc: (N, H, W, C0) -> (N, H//16, W//16, C_last)."""
    N, H, W, C0 = x_nhwc.shape
    assert len(params) == 4 and H % 16 == 0 and W % 16 == 0
    chans = [C0] + [int(p["w_taps"].shape[2]) for p in params]

    in_specs = [pl.BlockSpec((1, H, W, C0), lambda n: (n, 0, 0, 0))]
    inputs = [x_nhwc]
    for k, p in enumerate(params):
        cin, cout = chans[k], chans[k + 1]
        in_specs += [
            pl.BlockSpec((9, cin, cout), lambda n: (0, 0, 0)),
            pl.BlockSpec((1, cout), lambda n: (0, 0)),
        ]
        inputs += [p["w_taps"], p["bias"]]

    scratch = []
    for k in range(4):
        hk, wk = H >> k, W >> k
        scratch.append(pltpu.VMEM((hk + 2, wk + 2, chans[k]), jnp.float32))   # padded input
        scratch.append(pltpu.VMEM((hk * wk, chans[k + 1]), jnp.float32))      # conv output

    hf, wf, cf = H >> 4, W >> 4, chans[4]
    return pl.pallas_call(
        _convnet4_kernel,
        out_shape=jax.ShapeDtypeStruct((N, hf, wf, cf), jnp.float32),
        grid_spec=pltpu.PrefetchScalarGridSpec(
            num_scalar_prefetch=0,
            grid=(N,),
            in_specs=in_specs,
            out_specs=pl.BlockSpec((1, hf, wf, cf), lambda n: (n, 0, 0, 0)),
            scratch_shapes=scratch,
        ),
        compiler_params=pltpu.CompilerParams(dimension_semantics=("parallel",)),
    )(*inputs)


def init_params(key, x_dim=3, hid_dim=16, z_dim=16):
    """Deterministic synthetic parameters for the 4 conv blocks."""
    dims = [x_dim, hid_dim, hid_dim, hid_dim, z_dim]
    params = []
    for i in range(4):
        cin, cout = dims[i], dims[i + 1]
        key, kw, kb, kg, kbb, km, kv = jax.random.split(key, 7)
        w_oihw = 0.1 * jax.random.normal(kw, (cout, cin, 3, 3), jnp.float32)
        b_conv = 0.1 * jax.random.normal(kb, (cout,), jnp.float32)
        gamma = 1.0 + 0.1 * jax.random.normal(kg, (cout,), jnp.float32)
        beta = 0.1 * jax.random.normal(kbb, (cout,), jnp.float32)
        rmean = 0.1 * jax.random.normal(km, (cout,), jnp.float32)
        rvar = 0.5 + jnp.abs(jax.random.normal(kv, (cout,), jnp.float32))

        # Fold conv bias + eval-mode BN into the weights (scale) and a per-channel bias.
        scale = gamma / jnp.sqrt(rvar + _EPS)                               # (Cout,)
        bias = beta + scale * (b_conv - rmean)                              # (Cout,)
        # OIHW -> (kh*kw, Cin, Cout) for the 9-tap whole-image matmul formulation,
        # with the BN scale pre-multiplied into the Cout axis (conv is linear).
        w_taps = jnp.transpose(w_oihw, (2, 3, 1, 0)).reshape(9, cin, cout) * scale[None, None, :]

        params.append(dict(w_taps=w_taps, bias=bias[None, :],
                           w_oihw=w_oihw, b_conv=b_conv, gamma=gamma, beta=beta,
                           rmean=rmean, rvar=rvar))
    return params


@jax.jit
def convnet4_forward(x_nchw, params):
    x = jnp.transpose(x_nchw, (0, 2, 3, 1))                    # NCHW -> NHWC
    y = convnet4_pallas(x, params)                             # single fused kernel
    y = jnp.transpose(y, (0, 3, 1, 2))                         # back to NCHW
    return y.reshape(y.shape[0], -1)                           # torch x.view(N, -1)


def reference_forward(x_nchw, params):
    """Pure-JAX reference matching the PyTorch module (eval-mode BN)."""
    x = x_nchw
    for p in params:
        y = lax.conv_general_dilated(
            x, p["w_oihw"], window_strides=(1, 1), padding=((1, 1), (1, 1)),
            dimension_numbers=("NCHW", "OIHW", "NCHW"))
        y = y + p["b_conv"][None, :, None, None]
        y = (y - p["rmean"][None, :, None, None]) / jnp.sqrt(
            p["rvar"][None, :, None, None] + _EPS)
        y = y * p["gamma"][None, :, None, None] + p["beta"][None, :, None, None]
        y = jnp.maximum(y, 0.0)
        x = lax.reduce_window(y, -jnp.inf, lax.max, (1, 1, 2, 2), (1, 1, 2, 2), "VALID")
    return x.reshape(x.shape[0], -1)


if __name__ == "__main__":
    key = jax.random.PRNGKey(0)
    kx, kp = jax.random.split(key)
    # Small shapes: batch=2, x_dim=3, hid_dim=z_dim=16, spatial=16 (16->8->4->2->1).
    x = jax.random.normal(kx, (2, 3, 16, 16), jnp.float32)
    params = init_params(kp, x_dim=3, hid_dim=16, z_dim=16)

    out = convnet4_forward(x, params)
    out = jax.block_until_ready(out)

    ref = reference_forward(x, params)
    assert out.shape == (2, 16), out.shape
    np.testing.assert_allclose(np.asarray(out), np.asarray(ref), rtol=1e-3, atol=1e-3)
    print("KERNEL_OK")
</pallas_src>

<mosaic_0001>
module attributes {stable_mosaic.version = 11 : i64} {
  func.func @_convnet4_kernel(%arg0: i32, %arg1: memref<1x16x16x3xf32, #tpu.memory_space<vmem>>, %arg2: memref<9x3x16xf32, #tpu.memory_space<vmem>>, %arg3: memref<1x16xf32, #tpu.memory_space<vmem>>, %arg4: memref<9x16x16xf32, #tpu.memory_space<vmem>>, %arg5: memref<1x16xf32, #tpu.memory_space<vmem>>, %arg6: memref<9x16x16xf32, #tpu.memory_space<vmem>>, %arg7: memref<1x16xf32, #tpu.memory_space<vmem>>, %arg8: memref<9x16x16xf32, #tpu.memory_space<vmem>>, %arg9: memref<1x16xf32, #tpu.memory_space<vmem>>, %arg10: memref<1x1x1x16xf32, #tpu.memory_space<vmem>>, %arg11: memref<18x18x3xf32, #tpu.memory_space<vmem>>, %arg12: memref<256x16xf32, #tpu.memory_space<vmem>>, %arg13: memref<10x10x16xf32, #tpu.memory_space<vmem>>, %arg14: memref<64x16xf32, #tpu.memory_space<vmem>>, %arg15: memref<6x6x16xf32, #tpu.memory_space<vmem>>, %arg16: memref<16x16xf32, #tpu.memory_space<vmem>>, %arg17: memref<4x4x16xf32, #tpu.memory_space<vmem>>, %arg18: memref<4x16xf32, #tpu.memory_space<vmem>>) attributes {dimension_semantics = [#tpu.dimension_semantics<parallel>], iteration_bounds = array<i64: 2>, scalar_prefetch = 0 : i64, scratch_operands = 8 : i64, tpu.core_type = #tpu.core_type<tc>, window_params = [{transform_indices = @transform_0, window_bounds = array<i64: 1, 16, 16, 3>}, {pipeline_mode = #tpu.pipeline_mode<synchronous>, transform_indices = @transform_1, window_bounds = array<i64: 9, 3, 16>}, {pipeline_mode = #tpu.pipeline_mode<synchronous>, transform_indices = @transform_2, window_bounds = array<i64: 1, 16>}, {pipeline_mode = #tpu.pipeline_mode<synchronous>, transform_indices = @transform_3, window_bounds = array<i64: 9, 16, 16>}, {pipeline_mode = #tpu.pipeline_mode<synchronous>, transform_indices = @transform_4, window_bounds = array<i64: 1, 16>}, {pipeline_mode = #tpu.pipeline_mode<synchronous>, transform_indices = @transform_5, window_bounds = array<i64: 9, 16, 16>}, {pipeline_mode = #tpu.pipeline_mode<synchronous>, transform_indices = @transform_6, window_bounds = array<i64: 1, 16>}, {pipeline_mode = #tpu.pipeline_mode<synchronous>, transform_indices = @transform_7, window_bounds = array<i64: 9, 16, 16>}, {pipeline_mode = #tpu.pipeline_mode<synchronous>, transform_indices = @transform_8, window_bounds = array<i64: 1, 16>}, {transform_indices = @transform_9, window_bounds = array<i64: 1, 1, 1, 16>}]} {
    %c0 = arith.constant 0 : index
    %c0_0 = arith.constant 0 : index
    %c0_1 = arith.constant 0 : index
    %c0_2 = arith.constant 0 : index
    %0 = vector.load %arg1[%c0, %c0_0, %c0_1, %c0_2] : memref<1x16x16x3xf32, #tpu.memory_space<vmem>>, vector<1x16x16x3xf32>
    %1 = vector.shape_cast %0 : vector<1x16x16x3xf32> to vector<16x16x3xf32>
    %cst = arith.constant 0.000000e+00 : f32
    %2 = vector.broadcast %cst : f32 to vector<18x18x3xf32>
    %c0_3 = arith.constant 0 : index
    %c0_4 = arith.constant 0 : index
    %c0_5 = arith.constant 0 : index
    %3 = vector.load %arg11[%c0_3, %c0_4, %c0_5] : memref<18x18x3xf32, #tpu.memory_space<vmem>>, vector<18x18x3xf32>
    tpu.vector_store %arg11[%c0_3, %c0_4, %c0_5], %2 {strides = array<i32>} : memref<18x18x3xf32, #tpu.memory_space<vmem>>, vector<18x18x3xf32>,
    %c1 = arith.constant 1 : index
    %c1_6 = arith.constant 1 : index
    %c0_7 = arith.constant 0 : index
    %4 = vector.load %arg11[%c1, %c1_6, %c0_7] : memref<18x18x3xf32, #tpu.memory_space<vmem>>, vector<16x16x3xf32>
    tpu.vector_store %arg11[%c1, %c1_6, %c0_7], %1 {strides = array<i32>} : memref<18x18x3xf32, #tpu.memory_space<vmem>>, vector<16x16x3xf32>,
    %c0_8 = arith.constant 0 : index
    %c0_9 = arith.constant 0 : index
    %c0_10 = arith.constant 0 : index
    %5 = vector.load %arg11[%c0_8, %c0_9, %c0_10] : memref<18x18x3xf32, #tpu.memory_space<vmem>>, vector<16x16x3xf32>
    %6 = vector.shape_cast %5 : vector<16x16x3xf32> to vector<256x3xf32>
    %c0_11 = arith.constant 0 : index
    %c0_12 = arith.constant 0 : index
    %c0_13 = arith.constant 0 : index
    %7 = vector.load %arg2[%c0_11, %c0_12, %c0_13] : memref<9x3x16xf32, #tpu.memory_space<vmem>>, vector<1x3x16xf32>
    %8 = vector.shape_cast %7 : vector<1x3x16xf32> to vector<3x16xf32>
    %cst_14 = arith.constant dense<0.000000e+00> : vector<256x16xf32>
    %9 = tpu.matmul %6, %8, %cst_14 {dimension_numbers = #tpu.dot_dimension_numbers<[1], [0], [0], [1], [0, 0, 1, 1], [], []>} : vector<256x3xf32>, vector<3x16xf32>, vector<256x16xf32> -> vector<256x16xf32>
    %c0_15 = arith.constant 0 : index
    %c1_16 = arith.constant 1 : index
    %c0_17 = arith.constant 0 : index
    %10 = vector.load %arg11[%c0_15, %c1_16, %c0_17] : memref<18x18x3xf32, #tpu.memory_space<vmem>>, vector<16x16x3xf32>
    %11 = vector.shape_cast %10 : vector<16x16x3xf32> to vector<256x3xf32>
    %c1_18 = arith.constant 1 : index
    %c0_19 = arith.constant 0 : index
    %c0_20 = arith.constant 0 : index
    %12 = vector.load %arg2[%c1_18, %c0_19, %c0_20] : memref<9x3x16xf32, #tpu.memory_space<vmem>>, vector<1x3x16xf32>
    %13 = vector.shape_cast %12 : vector<1x3x16xf32> to vector<3x16xf32>
    %cst_21 = arith.constant dense<0.000000e+00> : vector<256x16xf32>
    %14 = tpu.matmul %11, %13, %cst_21 {dimension_numbers = #tpu.dot_dimension_numbers<[1], [0], [0], [1], [0, 0, 1, 1], [], []>} : vector<256x3xf32>, vector<3x16xf32>, vector<256x16xf32> -> vector<256x16xf32>
    %15 = arith.addf %9, %14 : vector<256x16xf32>
    %c0_22 = arith.constant 0 : index
    %c2 = arith.constant 2 : index
    %c0_23 = arith.constant 0 : index
    %16 = vector.load %arg11[%c0_22, %c2, %c0_23] : memref<18x18x3xf32, #tpu.memory_space<vmem>>, vector<16x16x3xf32>
    %17 = vector.shape_cast %16 : vector<16x16x3xf32> to vector<256x3xf32>
    %c2_24 = arith.constant 2 : index
    %c0_25 = arith.constant 0 : index
    %c0_26 = arith.constant 0 : index
    %18 = vector.load %arg2[%c2_24, %c0_25, %c0_26] : memref<9x3x16xf32, #tpu.memory_space<vmem>>, vector<1x3x16xf32>
    %19 = vector.shape_cast %18 : vector<1x3x16xf32> to vector<3x16xf32>
    %cst_27 = arith.constant dense<0.000000e+00> : vector<256x16xf32>
    %20 = tpu.matmul %17, %19, %cst_27 {dimension_numbers = #tpu.dot_dimension_numbers<[1], [0], [0], [1], [0, 0, 1, 1], [], []>} : vector<256x3xf32>, vector<3x16xf32>, vector<256x16xf32> -> vector<256x16xf32>
    %21 = arith.addf %15, %20 : vector<256x16xf32>
    %c1_28 = arith.constant 1 : index
    %c0_29 = arith.constant 0 : index
    %c0_30 = arith.constant 0 : index
    %22 = vector.load %arg11[%c1_28, %c0_29, %c0_30] : memref<18x18x3xf32, #tpu.memory_space<vmem>>, vector<16x16x3xf32>
    %23 = vector.shape_cast %22 : vector<16x16x3xf32> to vector<256x3xf32>
    %c3 = arith.constant 3 : index
    %c0_31 = arith.constant 0 : index
    %c0_32 = arith.constant 0 : index
    %24 = vector.load %arg2[%c3, %c0_31, %c0_32] : memref<9x3x16xf32, #tpu.memory_space<vmem>>, vector<1x3x16xf32>
    %25 = vector.shape_cast %24 : vector<1x3x16xf32> to vector<3x16xf32>
    %cst_33 = arith.constant dense<0.000000e+00> : vector<256x16xf32>
    %26 = tpu.matmul %23, %25, %cst_33 {dimension_numbers = #tpu.dot_dimension_numbers<[1], [0], [0], [1], [0, 0, 1, 1], [], []>} : vector<256x3xf32>, vector<3x16xf32>, vector<256x16xf32> -> vector<256x16xf32>
    %27 = arith.addf %21, %26 : vector<256x16xf32>
    %c1_34 = arith.constant 1 : index
    %c1_35 = arith.constant 1 : index
    %c0_36 = arith.constant 0 : index
    %28 = vector.load %arg11[%c1_34, %c1_35, %c0_36] : memref<18x18x3xf32, #tpu.memory_space<vmem>>, vector<16x16x3xf32>
    %29 = vector.shape_cast %28 : vector<16x16x3xf32> to vector<256x3xf32>
    %c4 = arith.constant 4 : index
    %c0_37 = arith.constant 0 : index
    %c0_38 = arith.constant 0 : index
    %30 = vector.load %arg2[%c4, %c0_37, %c0_38] : memref<9x3x16xf32, #tpu.memory_space<vmem>>, vector<1x3x16xf32>
    %31 = vector.shape_cast %30 : vector<1x3x16xf32> to vector<3x16xf32>
    %cst_39 = arith.constant dense<0.000000e+00> : vector<256x16xf32>
    %32 = tpu.matmul %29, %31, %cst_39 {dimension_numbers = #tpu.dot_dimension_numbers<[1], [0], [0], [1], [0, 0, 1, 1], [], []>} : vector<256x3xf32>, vector<3x16xf32>, vector<256x16xf32> -> vector<256x16xf32>
    %33 = arith.addf %27, %32 : vector<256x16xf32>
    %c1_40 = arith.constant 1 : index
    %c2_41 = arith.constant 2 : index
    %c0_42 = arith.constant 0 : index
    %34 = vector.load %arg11[%c1_40, %c2_41, %c0_42] : memref<18x18x3xf32, #tpu.memory_space<vmem>>, vector<16x16x3xf32>
    %35 = vector.shape_cast %34 : vector<16x16x3xf32> to vector<256x3xf32>
    %c5 = arith.constant 5 : index
    %c0_43 = arith.constant 0 : index
    %c0_44 = arith.constant 0 : index
    %36 = vector.load %arg2[%c5, %c0_43, %c0_44] : memref<9x3x16xf32, #tpu.memory_space<vmem>>, vector<1x3x16xf32>
    %37 = vector.shape_cast %36 : vector<1x3x16xf32> to vector<3x16xf32>
    %cst_45 = arith.constant dense<0.000000e+00> : vector<256x16xf32>
    %38 = tpu.matmul %35, %37, %cst_45 {dimension_numbers = #tpu.dot_dimension_numbers<[1], [0], [0], [1], [0, 0, 1, 1], [], []>} : vector<256x3xf32>, vector<3x16xf32>, vector<256x16xf32> -> vector<256x16xf32>
    %39 = arith.addf %33, %38 : vector<256x16xf32>
    %c2_46 = arith.constant 2 : index
    %c0_47 = arith.constant 0 : index
    %c0_48 = arith.constant 0 : index
    %40 = vector.load %arg11[%c2_46, %c0_47, %c0_48] : memref<18x18x3xf32, #tpu.memory_space<vmem>>, vector<16x16x3xf32>
    %41 = vector.shape_cast %40 : vector<16x16x3xf32> to vector<256x3xf32>
    %c6 = arith.constant 6 : index
    %c0_49 = arith.constant 0 : index
    %c0_50 = arith.constant 0 : index
    %42 = vector.load %arg2[%c6, %c0_49, %c0_50] : memref<9x3x16xf32, #tpu.memory_space<vmem>>, vector<1x3x16xf32>
    %43 = vector.shape_cast %42 : vector<1x3x16xf32> to vector<3x16xf32>
    %cst_51 = arith.constant dense<0.000000e+00> : vector<256x16xf32>
    %44 = tpu.matmul %41, %43, %cst_51 {dimension_numbers = #tpu.dot_dimension_numbers<[1], [0], [0], [1], [0, 0, 1, 1], [], []>} : vector<256x3xf32>, vector<3x16xf32>, vector<256x16xf32> -> vector<256x16xf32>
    %45 = arith.addf %39, %44 : vector<256x16xf32>
    %c2_52 = arith.constant 2 : index
    %c1_53 = arith.constant 1 : index
    %c0_54 = arith.constant 0 : index
    %46 = vector.load %arg11[%c2_52, %c1_53, %c0_54] : memref<18x18x3xf32, #tpu.memory_space<vmem>>, vector<16x16x3xf32>
    %47 = vector.shape_cast %46 : vector<16x16x3xf32> to vector<256x3xf32>
    %c7 = arith.constant 7 : index
    %c0_55 = arith.constant 0 : index
    %c0_56 = arith.constant 0 : index
    %48 = vector.load %arg2[%c7, %c0_55, %c0_56] : memref<9x3x16xf32, #tpu.memory_space<vmem>>, vector<1x3x16xf32>
    %49 = vector.shape_cast %48 : vector<1x3x16xf32> to vector<3x16xf32>
    %cst_57 = arith.constant dense<0.000000e+00> : vector<256x16xf32>
    %50 = tpu.matmul %47, %49, %cst_57 {dimension_numbers = #tpu.dot_dimension_numbers<[1], [0], [0], [1], [0, 0, 1, 1], [], []>} : vector<256x3xf32>, vector<3x16xf32>, vector<256x16xf32> -> vector<256x16xf32>
    %51 = arith.addf %45, %50 : vector<256x16xf32>
    %c2_58 = arith.constant 2 : index
    %c2_59 = arith.constant 2 : index
    %c0_60 = arith.constant 0 : index
    %52 = vector.load %arg11[%c2_58, %c2_59, %c0_60] : memref<18x18x3xf32, #tpu.memory_space<vmem>>, vector<16x16x3xf32>
    %53 = vector.shape_cast %52 : vector<16x16x3xf32> to vector<256x3xf32>
    %c8 = arith.constant 8 : index
    %c0_61 = arith.constant 0 : index
    %c0_62 = arith.constant 0 : index
    %54 = vector.load %arg2[%c8, %c0_61, %c0_62] : memref<9x3x16xf32, #tpu.memory_space<vmem>>, vector<1x3x16xf32>
    %55 = vector.shape_cast %54 : vector<1x3x16xf32> to vector<3x16xf32>
    %cst_63 = arith.constant dense<0.000000e+00> : vector<256x16xf32>
    %56 = tpu.matmul %53, %55, %cst_63 {dimension_numbers = #tpu.dot_dimension_numbers<[1], [0], [0], [1], [0, 0, 1, 1], [], []>} : vector<256x3xf32>, vector<3x16xf32>, vector<256x16xf32> -> vector<256x16xf32>
    %57 = arith.addf %51, %56 : vector<256x16xf32>
    %c0_64 = arith.constant 0 : index
    %c0_65 = arith.constant 0 : index
    %58 = vector.load %arg3[%c0_64, %c0_65] : memref<1x16xf32, #tpu.memory_space<vmem>>, vector<1x16xf32>
    %59 = vector.broadcast %58 : vector<1x16xf32> to vector<256x16xf32>
    %60 = arith.addf %57, %59 : vector<256x16xf32>
    %cst_66 = arith.constant 0.000000e+00 : f32
    %61 = vector.broadcast %cst_66 : f32 to vector<256x16xf32>
    %62 = arith.maximumf %60, %61 : vector<256x16xf32>
    %c0_67 = arith.constant 0 : index
    %c0_68 = arith.constant 0 : index
    %63 = vector.load %arg12[%c0_67, %c0_68] : memref<256x16xf32, #tpu.memory_space<vmem>>, vector<256x16xf32>
    tpu.vector_store %arg12[%c0_67, %c0_68], %62 {strides = array<i32>} : memref<256x16xf32, #tpu.memory_space<vmem>>, vector<256x16xf32>,
    %c0_69 = arith.constant 0 : index
    %c0_70 = arith.constant 0 : index
    %64 = tpu.strided_load %arg12[%c0_69, %c0_70] {strides = array<i32: 2, 1>} : memref<256x16xf32, #tpu.memory_space<vmem>>, vector<128x16xf32>
    %c1_71 = arith.constant 1 : index
    %c0_72 = arith.constant 0 : index
    %65 = tpu.strided_load %arg12[%c1_71, %c0_72] {strides = array<i32: 2, 1>} : memref<256x16xf32, #tpu.memory_space<vmem>>, vector<128x16xf32>
    %66 = arith.maximumf %64, %65 : vector<128x16xf32>
    %67 = vector.shape_cast %66 : vector<128x16xf32> to vector<8x2x8x16xf32>
    %cst_73 = arith.constant dense<0xFF800000> : vector<8x8x16xf32>
    %68 = vector.multi_reduction <maximumf>, %67, %cst_73 [1] : vector<8x2x8x16xf32> to vector<8x8x16xf32>
    %cst_74 = arith.constant 0.000000e+00 : f32
    %69 = vector.broadcast %cst_74 : f32 to vector<10x10x16xf32>
    %c0_75 = arith.constant 0 : index
    %c0_76 = arith.constant 0 : index
    %c0_77 = arith.constant 0 : index
    %70 = vector.load %arg13[%c0_75, %c0_76, %c0_77] : memref<10x10x16xf32, #tpu.memory_space<vmem>>, vector<10x10x16xf32>
    tpu.vector_store %arg13[%c0_75, %c0_76, %c0_77], %69 {strides = array<i32>} : memref<10x10x16xf32, #tpu.memory_space<vmem>>, vector<10x10x16xf32>,
    %c1_78 = arith.constant 1 : index
    %c1_79 = arith.constant 1 : index
    %c0_80 = arith.constant 0 : index
    %71 = vector.load %arg13[%c1_78, %c1_79, %c0_80] : memref<10x10x16xf32, #tpu.memory_space<vmem>>, vector<8x8x16xf32>
    tpu.vector_store %arg13[%c1_78, %c1_79, %c0_80], %68 {strides = array<i32>} : memref<10x10x16xf32, #tpu.memory_space<vmem>>, vector<8x8x16xf32>,
    %c0_81 = arith.constant 0 : index
    %c0_82 = arith.constant 0 : index
    %c0_83 = arith.constant 0 : index
    %72 = vector.load %arg13[%c0_81, %c0_82, %c0_83] : memref<10x10x16xf32, #tpu.memory_space<vmem>>, vector<8x8x16xf32>
    %73 = vector.shape_cast %72 : vector<8x8x16xf32> to vector<64x16xf32>
    %c0_84 = arith.constant 0 : index
    %c0_85 = arith.constant 0 : index
    %c0_86 = arith.constant 0 : index
    %74 = vector.load %arg4[%c0_84, %c0_85, %c0_86] : memref<9x16x16xf32, #tpu.memory_space<vmem>>, vector<1x16x16xf32>
    %75 = vector.shape_cast %74 : vector<1x16x16xf32> to vector<16x16xf32>
    %cst_87 = arith.constant dense<0.000000e+00> : vector<64x16xf32>
    %76 = tpu.matmul %73, %75, %cst_87 {dimension_numbers = #tpu.dot_dimension_numbers<[1], [0], [0], [1], [0, 0, 1, 1], [], []>} : vector<64x16xf32>, vector<16x16xf32>, vector<64x16xf32> -> vector<64x16xf32>
    %c0_88 = arith.constant 0 : index
    %c1_89 = arith.constant 1 : index
    %c0_90 = arith.constant 0 : index
    %77 = vector.load %arg13[%c0_88, %c1_89, %c0_90] : memref<10x10x16xf32, #tpu.memory_space<vmem>>, vector<8x8x16xf32>
    %78 = vector.shape_cast %77 : vector<8x8x16xf32> to vector<64x16xf32>
    %c1_91 = arith.constant 1 : index
    %c0_92 = arith.constant 0 : index
    %c0_93 = arith.constant 0 : index
    %79 = vector.load %arg4[%c1_91, %c0_92, %c0_93] : memref<9x16x16xf32, #tpu.memory_space<vmem>>, vector<1x16x16xf32>
    %80 = vector.shape_cast %79 : vector<1x16x16xf32> to vector<16x16xf32>
    %cst_94 = arith.constant dense<0.000000e+00> : vector<64x16xf32>
    %81 = tpu.matmul %78, %80, %cst_94 {dimension_numbers = #tpu.dot_dimension_numbers<[1], [0], [0], [1], [0, 0, 1, 1], [], []>} : vector<64x16xf32>, vector<16x16xf32>, vector<64x16xf32> -> vector<64x16xf32>
    %82 = arith.addf %76, %81 : vector<64x16xf32>
    %c0_95 = arith.constant 0 : index
    %c2_96 = arith.constant 2 : index
    %c0_97 = arith.constant 0 : index
    %83 = vector.load %arg13[%c0_95, %c2_96, %c0_97] : memref<10x10x16xf32, #tpu.memory_space<vmem>>, vector<8x8x16xf32>
    %84 = vector.shape_cast %83 : vector<8x8x16xf32> to vector<64x16xf32>
    %c2_98 = arith.constant 2 : index
    %c0_99 = arith.constant 0 : index
    %c0_100 = arith.constant 0 : index
    %85 = vector.load %arg4[%c2_98, %c0_99, %c0_100] : memref<9x16x16xf32, #tpu.memory_space<vmem>>, vector<1x16x16xf32>
    %86 = vector.shape_cast %85 : vector<1x16x16xf32> to vector<16x16xf32>
    %cst_101 = arith.constant dense<0.000000e+00> : vector<64x16xf32>
    %87 = tpu.matmul %84, %86, %cst_101 {dimension_numbers = #tpu.dot_dimension_numbers<[1], [0], [0], [1], [0, 0, 1, 1], [], []>} : vector<64x16xf32>, vector<16x16xf32>, vector<64x16xf32> -> vector<64x16xf32>
    %88 = arith.addf %82, %87 : vector<64x16xf32>
    %c1_102 = arith.constant 1 : index
    %c0_103 = arith.constant 0 : index
    %c0_104 = arith.constant 0 : index
    %89 = vector.load %arg13[%c1_102, %c0_103, %c0_104] : memref<10x10x16xf32, #tpu.memory_space<vmem>>, vector<8x8x16xf32>
    %90 = vector.shape_cast %89 : vector<8x8x16xf32> to vector<64x16xf32>
    %c3_105 = arith.constant 3 : index
    %c0_106 = arith.constant 0 : index
    %c0_107 = arith.constant 0 : index
    %91 = vector.load %arg4[%c3_105, %c0_106, %c0_107] : memref<9x16x16xf32, #tpu.memory_space<vmem>>, vector<1x16x16xf32>
    %92 = vector.shape_cast %91 : vector<1x16x16xf32> to vector<16x16xf32>
    %cst_108 = arith.constant dense<0.000000e+00> : vector<64x16xf32>
    %93 = tpu.matmul %90, %92, %cst_108 {dimension_numbers = #tpu.dot_dimension_numbers<[1], [0], [0], [1], [0, 0, 1, 1], [], []>} : vector<64x16xf32>, vector<16x16xf32>, vector<64x16xf32> -> vector<64x16xf32>
    %94 = arith.addf %88, %93 : vector<64x16xf32>
    %c1_109 = arith.constant 1 : index
    %c1_110 = arith.constant 1 : index
    %c0_111 = arith.constant 0 : index
    %95 = vector.load %arg13[%c1_109, %c1_110, %c0_111] : memref<10x10x16xf32, #tpu.memory_space<vmem>>, vector<8x8x16xf32>
    %96 = vector.shape_cast %95 : vector<8x8x16xf32> to vector<64x16xf32>
    %c4_112 = arith.constant 4 : index
    %c0_113 = arith.constant 0 : index
    %c0_114 = arith.constant 0 : index
    %97 = vector.load %arg4[%c4_112, %c0_113, %c0_114] : memref<9x16x16xf32, #tpu.memory_space<vmem>>, vector<1x16x16xf32>
    %98 = vector.shape_cast %97 : vector<1x16x16xf32> to vector<16x16xf32>
    %cst_115 = arith.constant dense<0.000000e+00> : vector<64x16xf32>
    %99 = tpu.matmul %96, %98, %cst_115 {dimension_numbers = #tpu.dot_dimension_numbers<[1], [0], [0], [1], [0, 0, 1, 1], [], []>} : vector<64x16xf32>, vector<16x16xf32>, vector<64x16xf32> -> vector<64x16xf32>
    %100 = arith.addf %94, %99 : vector<64x16xf32>
    %c1_116 = arith.constant 1 : index
    %c2_117 = arith.constant 2 : index
    %c0_118 = arith.constant 0 : index
    %101 = vector.load %arg13[%c1_116, %c2_117, %c0_118] : memref<10x10x16xf32, #tpu.memory_space<vmem>>, vector<8x8x16xf32>
    %102 = vector.shape_cast %101 : vector<8x8x16xf32> to vector<64x16xf32>
    %c5_119 = arith.constant 5 : index
    %c0_120 = arith.constant 0 : index
    %c0_121 = arith.constant 0 : index
    %103 = vector.load %arg4[%c5_119, %c0_120, %c0_121] : memref<9x16x16xf32, #tpu.memory_space<vmem>>, vector<1x16x16xf32>
    %104 = vector.shape_cast %103 : vector<1x16x16xf32> to vector<16x16xf32>
    %cst_122 = arith.constant dense<0.000000e+00> : vector<64x16xf32>
    %105 = tpu.matmul %102, %104, %cst_122 {dimension_numbers = #tpu.dot_dimension_numbers<[1], [0], [0], [1], [0, 0, 1, 1], [], []>} : vector<64x16xf32>, vector<16x16xf32>, vector<64x16xf32> -> vector<64x16xf32>
    %106 = arith.addf %100, %105 : vector<64x16xf32>
    %c2_123 = arith.constant 2 : index
    %c0_124 = arith.constant 0 : index
    %c0_125 = arith.constant 0 : index
    %107 = vector.load %arg13[%c2_123, %c0_124, %c0_125] : memref<10x10x16xf32, #tpu.memory_space<vmem>>, vector<8x8x16xf32>
    %108 = vector.shape_cast %107 : vector<8x8x16xf32> to vector<64x16xf32>
    %c6_126 = arith.constant 6 : index
    %c0_127 = arith.constant 0 : index
    %c0_128 = arith.constant 0 : index
    %109 = vector.load %arg4[%c6_126, %c0_127, %c0_128] : memref<9x16x16xf32, #tpu.memory_space<vmem>>, vector<1x16x16xf32>
    %110 = vector.shape_cast %109 : vector<1x16x16xf32> to vector<16x16xf32>
    %cst_129 = arith.constant dense<0.000000e+00> : vector<64x16xf32>
    %111 = tpu.matmul %108, %110, %cst_129 {dimension_numbers = #tpu.dot_dimension_numbers<[1], [0], [0], [1], [0, 0, 1, 1], [], []>} : vector<64x16xf32>, vector<16x16xf32>, vector<64x16xf32> -> vector<64x16xf32>
    %112 = arith.addf %106, %111 : vector<64x16xf32>
    %c2_130 = arith.constant 2 : index
    %c1_131 = arith.constant 1 : index
    %c0_132 = arith.constant 0 : index
    %113 = vector.load %arg13[%c2_130, %c1_131, %c0_132] : memref<10x10x16xf32, #tpu.memory_space<vmem>>, vector<8x8x16xf32>
    %114 = vector.shape_cast %113 : vector<8x8x16xf32> to vector<64x16xf32>
    %c7_133 = arith.constant 7 : index
    %c0_134 = arith.constant 0 : index
    %c0_135 = arith.constant 0 : index
    %115 = vector.load %arg4[%c7_133, %c0_134, %c0_135] : memref<9x16x16xf32, #tpu.memory_space<vmem>>, vector<1x16x16xf32>
    %116 = vector.shape_cast %115 : vector<1x16x16xf32> to vector<16x16xf32>
    %cst_136 = arith.constant dense<0.000000e+00> : vector<64x16xf32>
    %117 = tpu.matmul %114, %116, %cst_136 {dimension_numbers = #tpu.dot_dimension_numbers<[1], [0], [0], [1], [0, 0, 1, 1], [], []>} : vector<64x16xf32>, vector<16x16xf32>, vector<64x16xf32> -> vector<64x16xf32>
    %118 = arith.addf %112, %117 : vector<64x16xf32>
    %c2_137 = arith.constant 2 : index
    %c2_138 = arith.constant 2 : index
    %c0_139 = arith.constant 0 : index
    %119 = vector.load %arg13[%c2_137, %c2_138, %c0_139] : memref<10x10x16xf32, #tpu.memory_space<vmem>>, vector<8x8x16xf32>
    %120 = vector.shape_cast %119 : vector<8x8x16xf32> to vector<64x16xf32>
    %c8_140 = arith.constant 8 : index
    %c0_141 = arith.constant 0 : index
    %c0_142 = arith.constant 0 : index
    %121 = vector.load %arg4[%c8_140, %c0_141, %c0_142] : memref<9x16x16xf32, #tpu.memory_space<vmem>>, vector<1x16x16xf32>
    %122 = vector.shape_cast %121 : vector<1x16x16xf32> to vector<16x16xf32>
    %cst_143 = arith.constant dense<0.000000e+00> : vector<64x16xf32>
    %123 = tpu.matmul %120, %122, %cst_143 {dimension_numbers = #tpu.dot_dimension_numbers<[1], [0], [0], [1], [0, 0, 1, 1], [], []>} : vector<64x16xf32>, vector<16x16xf32>, vector<64x16xf32> -> vector<64x16xf32>
    %124 = arith.addf %118, %123 : vector<64x16xf32>
    %c0_144 = arith.constant 0 : index
    %c0_145 = arith.constant 0 : index
    %125 = vector.load %arg5[%c0_144, %c0_145] : memref<1x16xf32, #tpu.memory_space<vmem>>, vector<1x16xf32>
    %126 = vector.broadcast %125 : vector<1x16xf32> to vector<64x16xf32>
    %127 = arith.addf %124, %126 : vector<64x16xf32>
    %cst_146 = arith.constant 0.000000e+00 : f32
    %128 = vector.broadcast %cst_146 : f32 to vector<64x16xf32>
    %129 = arith.maximumf %127, %128 : vector<64x16xf32>
    %c0_147 = arith.constant 0 : index
    %c0_148 = arith.constant 0 : index
    %130 = vector.load %arg14[%c0_147, %c0_148] : memref<64x16xf32, #tpu.memory_space<vmem>>, vector<64x16xf32>
    tpu.vector_store %arg14[%c0_147, %c0_148], %129 {strides = array<i32>} : memref<64x16xf32, #tpu.memory_space<vmem>>, vector<64x16xf32>,
    %c0_149 = arith.constant 0 : index
    %c0_150 = arith.constant 0 : index
    %131 = tpu.strided_load %arg14[%c0_149, %c0_150] {strides = array<i32: 2, 1>} : memref<64x16xf32, #tpu.memory_space<vmem>>, vector<32x16xf32>
    %c1_151 = arith.constant 1 : index
    %c0_152 = arith.constant 0 : index
    %132 = tpu.strided_load %arg14[%c1_151, %c0_152] {strides = array<i32: 2, 1>} : memref<64x16xf32, #tpu.memory_space<vmem>>, vector<32x16xf32>
    %133 = arith.maximumf %131, %132 : vector<32x16xf32>
    %134 = vector.shape_cast %133 : vector<32x16xf32> to vector<4x2x4x16xf32>
    %cst_153 = arith.constant dense<0xFF800000> : vector<4x4x16xf32>
    %135 = vector.multi_reduction <maximumf>, %134, %cst_153 [1] : vector<4x2x4x16xf32> to vector<4x4x16xf32>
    %cst_154 = arith.constant 0.000000e+00 : f32
    %136 = vector.broadcast %cst_154 : f32 to vector<6x6x16xf32>
    %c0_155 = arith.constant 0 : index
    %c0_156 = arith.constant 0 : index
    %c0_157 = arith.constant 0 : index
    %137 = vector.load %arg15[%c0_155, %c0_156, %c0_157] : memref<6x6x16xf32, #tpu.memory_space<vmem>>, vector<6x6x16xf32>
    tpu.vector_store %arg15[%c0_155, %c0_156, %c0_157], %136 {strides = array<i32>} : memref<6x6x16xf32, #tpu.memory_space<vmem>>, vector<6x6x16xf32>,
    %c1_158 = arith.constant 1 : index
    %c1_159 = arith.constant 1 : index
    %c0_160 = arith.constant 0 : index
    %138 = vector.load %arg15[%c1_158, %c1_159, %c0_160] : memref<6x6x16xf32, #tpu.memory_space<vmem>>, vector<4x4x16xf32>
    tpu.vector_store %arg15[%c1_158, %c1_159, %c0_160], %135 {strides = array<i32>} : memref<6x6x16xf32, #tpu.memory_space<vmem>>, vector<4x4x16xf32>,
    %c0_161 = arith.constant 0 : index
    %c0_162 = arith.constant 0 : index
    %c0_163 = arith.constant 0 : index
    %139 = vector.load %arg15[%c0_161, %c0_162, %c0_163] : memref<6x6x16xf32, #tpu.memory_space<vmem>>, vector<4x4x16xf32>
    %140 = vector.shape_cast %139 : vector<4x4x16xf32> to vector<16x16xf32>
    %c0_164 = arith.constant 0 : index
    %c0_165 = arith.constant 0 : index
    %c0_166 = arith.constant 0 : index
    %141 = vector.load %arg6[%c0_164, %c0_165, %c0_166] : memref<9x16x16xf32, #tpu.memory_space<vmem>>, vector<1x16x16xf32>
    %142 = vector.shape_cast %141 : vector<1x16x16xf32> to vector<16x16xf32>
    %cst_167 = arith.constant dense<0.000000e+00> : vector<16x16xf32>
    %143 = tpu.matmul %140, %142, %cst_167 {dimension_numbers = #tpu.dot_dimension_numbers<[1], [0], [0], [1], [0, 0, 1, 1], [], []>} : vector<16x16xf32>, vector<16x16xf32>, vector<16x16xf32> -> vector<16x16xf32>
    %c0_168 = arith.constant 0 : index
    %c1_169 = arith.constant 1 : index
    %c0_170 = arith.constant 0 : index
    %144 = vector.load %arg15[%c0_168, %c1_169, %c0_170] : memref<6x6x16xf32, #tpu.memory_space<vmem>>, vector<4x4x16xf32>
    %145 = vector.shape_cast %144 : vector<4x4x16xf32> to vector<16x16xf32>
    %c1_171 = arith.constant 1 : index
    %c0_172 = arith.constant 0 : index
    %c0_173 = arith.constant 0 : index
    %146 = vector.load %arg6[%c1_171, %c0_172, %c0_173] : memref<9x16x16xf32, #tpu.memory_space<vmem>>, vector<1x16x16xf32>
    %147 = vector.shape_cast %146 : vector<1x16x16xf32> to vector<16x16xf32>
    %cst_174 = arith.constant dense<0.000000e+00> : vector<16x16xf32>
    %148 = tpu.matmul %145, %147, %cst_174 {dimension_numbers = #tpu.dot_dimension_numbers<[1], [0], [0], [1], [0, 0, 1, 1], [], []>} : vector<16x16xf32>, vector<16x16xf32>, vector<16x16xf32> -> vector<16x16xf32>
    %149 = arith.addf %143, %148 : vector<16x16xf32>
    %c0_175 = arith.constant 0 : index
    %c2_176 = arith.constant 2 : index
    %c0_177 = arith.constant 0 : index
    %150 = vector.load %arg15[%c0_175, %c2_176, %c0_177] : memref<6x6x16xf32, #tpu.memory_space<vmem>>, vector<4x4x16xf32>
    %151 = vector.shape_cast %150 : vector<4x4x16xf32> to vector<16x16xf32>
    %c2_178 = arith.constant 2 : index
    %c0_179 = arith.constant 0 : index
    %c0_180 = arith.constant 0 : index
    %152 = vector.load %arg6[%c2_178, %c0_179, %c0_180] : memref<9x16x16xf32, #tpu.memory_space<vmem>>, vector<1x16x16xf32>
    %153 = vector.shape_cast %152 : vector<1x16x16xf32> to vector<16x16xf32>
    %cst_181 = arith.constant dense<0.000000e+00> : vector<16x16xf32>
    %154 = tpu.matmul %151, %153, %cst_181 {dimension_numbers = #tpu.dot_dimension_numbers<[1], [0], [0], [1], [0, 0, 1, 1], [], []>} : vector<16x16xf32>, vector<16x16xf32>, vector<16x16xf32> -> vector<16x16xf32>
    %155 = arith.addf %149, %154 : vector<16x16xf32>
    %c1_182 = arith.constant 1 : index
    %c0_183 = arith.constant 0 : index
    %c0_184 = arith.constant 0 : index
    %156 = vector.load %arg15[%c1_182, %c0_183, %c0_184] : memref<6x6x16xf32, #tpu.memory_space<vmem>>, vector<4x4x16xf32>
    %157 = vector.shape_cast %156 : vector<4x4x16xf32> to vector<16x16xf32>
    %c3_185 = arith.constant 3 : index
    %c0_186 = arith.constant 0 : index
    %c0_187 = arith.constant 0 : index
    %158 = vector.load %arg6[%c3_185, %c0_186, %c0_187] : memref<9x16x16xf32, #tpu.memory_space<vmem>>, vector<1x16x16xf32>
    %159 = vector.shape_cast %158 : vector<1x16x16xf32> to vector<16x16xf32>
    %cst_188 = arith.constant dense<0.000000e+00> : vector<16x16xf32>
    %160 = tpu.matmul %157, %159, %cst_188 {dimension_numbers = #tpu.dot_dimension_numbers<[1], [0], [0], [1], [0, 0, 1, 1], [], []>} : vector<16x16xf32>, vector<16x16xf32>, vector<16x16xf32> -> vector<16x16xf32>
    %161 = arith.addf %155, %160 : vector<16x16xf32>
    %c1_189 = arith.constant 1 : index
    %c1_190 = arith.constant 1 : index
    %c0_191 = arith.constant 0 : index
    %162 = vector.load %arg15[%c1_189, %c1_190, %c0_191] : memref<6x6x16xf32, #tpu.memory_space<vmem>>, vector<4x4x16xf32>
    %163 = vector.shape_cast %162 : vector<4x4x16xf32> to vector<16x16xf32>
    %c4_192 = arith.constant 4 : index
    %c0_193 = arith.constant 0 : index
    %c0_194 = arith.constant 0 : index
    %164 = vector.load %arg6[%c4_192, %c0_193, %c0_194] : memref<9x16x16xf32, #tpu.memory_space<vmem>>, vector<1x16x16xf32>
    %165 = vector.shape_cast %164 : vector<1x16x16xf32> to vector<16x16xf32>
    %cst_195 = arith.constant dense<0.000000e+00> : vector<16x16xf32>
    %166 = tpu.matmul %163, %165, %cst_195 {dimension_numbers = #tpu.dot_dimension_numbers<[1], [0], [0], [1], [0, 0, 1, 1], [], []>} : vector<16x16xf32>, vector<16x16xf32>, vector<16x16xf32> -> vector<16x16xf32>
    %167 = arith.addf %161, %166 : vector<16x16xf32>
    %c1_196 = arith.constant 1 : index
    %c2_197 = arith.constant 2 : index
    %c0_198 = arith.constant 0 : index
    %168 = vector.load %arg15[%c1_196, %c2_197, %c0_198] : memref<6x6x16xf32, #tpu.memory_space<vmem>>, vector<4x4x16xf32>
    %169 = vector.shape_cast %168 : vector<4x4x16xf32> to vector<16x16xf32>
    %c5_199 = arith.constant 5 : index
    %c0_200 = arith.constant 0 : index
    %c0_201 = arith.constant 0 : index
    %170 = vector.load %arg6[%c5_199, %c0_200, %c0_201] : memref<9x16x16xf32, #tpu.memory_space<vmem>>, vector<1x16x16xf32>
    %171 = vector.shape_cast %170 : vector<1x16x16xf32> to vector<16x16xf32>
    %cst_202 = arith.constant dense<0.000000e+00> : vector<16x16xf32>
    %172 = tpu.matmul %169, %171, %cst_202 {dimension_numbers = #tpu.dot_dimension_numbers<[1], [0], [0], [1], [0, 0, 1, 1], [], []>} : vector<16x16xf32>, vector<16x16xf32>, vector<16x16xf32> -> vector<16x16xf32>
    %173 = arith.addf %167, %172 : vector<16x16xf32>
    %c2_203 = arith.constant 2 : index
    %c0_204 = arith.constant 0 : index
    %c0_205 = arith.constant 0 : index
    %174 = vector.load %arg15[%c2_203, %c0_204, %c0_205] : memref<6x6x16xf32, #tpu.memory_space<vmem>>, vector<4x4x16xf32>
    %175 = vector.shape_cast %174 : vector<4x4x16xf32> to vector<16x16xf32>
    %c6_206 = arith.constant 6 : index
    %c0_207 = arith.constant 0 : index
    %c0_208 = arith.constant 0 : index
    %176 = vector.load %arg6[%c6_206, %c0_207, %c0_208] : memref<9x16x16xf32, #tpu.memory_space<vmem>>, vector<1x16x16xf32>
    %177 = vector.shape_cast %176 : vector<1x16x16xf32> to vector<16x16xf32>
    %cst_209 = arith.constant dense<0.000000e+00> : vector<16x16xf32>
    %178 = tpu.matmul %175, %177, %cst_209 {dimension_numbers = #tpu.dot_dimension_numbers<[1], [0], [0], [1], [0, 0, 1, 1], [], []>} : vector<16x16xf32>, vector<16x16xf32>, vector<16x16xf32> -> vector<16x16xf32>
    %179 = arith.addf %173, %178 : vector<16x16xf32>
    %c2_210 = arith.constant 2 : index
    %c1_211 = arith.constant 1 : index
    %c0_212 = arith.constant 0 : index
    %180 = vector.load %arg15[%c2_210, %c1_211, %c0_212] : memref<6x6x16xf32, #tpu.memory_space<vmem>>, vector<4x4x16xf32>
    %181 = vector.shape_cast %180 : vector<4x4x16xf32> to vector<16x16xf32>
    %c7_213 = arith.constant 7 : index
    %c0_214 = arith.constant 0 : index
    %c0_215 = arith.constant 0 : index
    %182 = vector.load %arg6[%c7_213, %c0_214, %c0_215] : memref<9x16x16xf32, #tpu.memory_space<vmem>>, vector<1x16x16xf32>
    %183 = vector.shape_cast %182 : vector<1x16x16xf32> to vector<16x16xf32>
    %cst_216 = arith.constant dense<0.000000e+00> : vector<16x16xf32>
    %184 = tpu.matmul %181, %183, %cst_216 {dimension_numbers = #tpu.dot_dimension_numbers<[1], [0], [0], [1], [0, 0, 1, 1], [], []>} : vector<16x16xf32>, vector<16x16xf32>, vector<16x16xf32> -> vector<16x16xf32>
    %185 = arith.addf %179, %184 : vector<16x16xf32>
    %c2_217 = arith.constant 2 : index
    %c2_218 = arith.constant 2 : index
    %c0_219 = arith.constant 0 : index
    %186 = vector.load %arg15[%c2_217, %c2_218, %c0_219] : memref<6x6x16xf32, #tpu.memory_space<vmem>>, vector<4x4x16xf32>
    %187 = vector.shape_cast %186 : vector<4x4x16xf32> to vector<16x16xf32>
    %c8_220 = arith.constant 8 : index
    %c0_221 = arith.constant 0 : index
    %c0_222 = arith.constant 0 : index
    %188 = vector.load %arg6[%c8_220, %c0_221, %c0_222] : memref<9x16x16xf32, #tpu.memory_space<vmem>>, vector<1x16x16xf32>
    %189 = vector.shape_cast %188 : vector<1x16x16xf32> to vector<16x16xf32>
    %cst_223 = arith.constant dense<0.000000e+00> : vector<16x16xf32>
    %190 = tpu.matmul %187, %189, %cst_223 {dimension_numbers = #tpu.dot_dimension_numbers<[1], [0], [0], [1], [0, 0, 1, 1], [], []>} : vector<16x16xf32>, vector<16x16xf32>, vector<16x16xf32> -> vector<16x16xf32>
    %191 = arith.addf %185, %190 : vector<16x16xf32>
    %c0_224 = arith.constant 0 : index
    %c0_225 = arith.constant 0 : index
    %192 = vector.load %arg7[%c0_224, %c0_225] : memref<1x16xf32, #tpu.memory_space<vmem>>, vector<1x16xf32>
    %193 = vector.broadcast %192 : vector<1x16xf32> to vector<16x16xf32>
    %194 = arith.addf %191, %193 : vector<16x16xf32>
    %cst_226 = arith.constant 0.000000e+00 : f32
    %195 = vector.broadcast %cst_226 : f32 to vector<16x16xf32>
    %196 = arith.maximumf %194, %195 : vector<16x16xf32>
    %c0_227 = arith.constant 0 : index
    %c0_228 = arith.constant 0 : index
    %197 = vector.load %arg16[%c0_227, %c0_228] : memref<16x16xf32, #tpu.memory_space<vmem>>, vector<16x16xf32>
    tpu.vector_store %arg16[%c0_227, %c0_228], %196 {strides = array<i32>} : memref<16x16xf32, #tpu.memory_space<vmem>>, vector<16x16xf32>,
    %c0_229 = arith.constant 0 : index
    %c0_230 = arith.constant 0 : index
    %198 = tpu.strided_load %arg16[%c0_229, %c0_230] {strides = array<i32: 2, 1>} : memref<16x16xf32, #tpu.memory_space<vmem>>, vector<8x16xf32>
    %c1_231 = arith.constant 1 : index
    %c0_232 = arith.constant 0 : index
    %199 = tpu.strided_load %arg16[%c1_231, %c0_232] {strides = array<i32: 2, 1>} : memref<16x16xf32, #tpu.memory_space<vmem>>, vector<8x16xf32>
    %200 = arith.maximumf %198, %199 : vector<8x16xf32>
    %201 = vector.shape_cast %200 : vector<8x16xf32> to vector<2x2x2x16xf32>
    %cst_233 = arith.constant dense<0xFF800000> : vector<2x2x16xf32>
    %202 = vector.multi_reduction <maximumf>, %201, %cst_233 [1] : vector<2x2x2x16xf32> to vector<2x2x16xf32>
    %cst_234 = arith.constant 0.000000e+00 : f32
    %203 = vector.broadcast %cst_234 : f32 to vector<4x4x16xf32>
    %c0_235 = arith.constant 0 : index
    %c0_236 = arith.constant 0 : index
    %c0_237 = arith.constant 0 : index
    %204 = vector.load %arg17[%c0_235, %c0_236, %c0_237] : memref<4x4x16xf32, #tpu.memory_space<vmem>>, vector<4x4x16xf32>
    tpu.vector_store %arg17[%c0_235, %c0_236, %c0_237], %203 {strides = array<i32>} : memref<4x4x16xf32, #tpu.memory_space<vmem>>, vector<4x4x16xf32>,
    %c1_238 = arith.constant 1 : index
    %c1_239 = arith.constant 1 : index
    %c0_240 = arith.constant 0 : index
    %205 = vector.load %arg17[%c1_238, %c1_239, %c0_240] : memref<4x4x16xf32, #tpu.memory_space<vmem>>, vector<2x2x16xf32>
    tpu.vector_store %arg17[%c1_238, %c1_239, %c0_240], %202 {strides = array<i32>} : memref<4x4x16xf32, #tpu.memory_space<vmem>>, vector<2x2x16xf32>,
    %c0_241 = arith.constant 0 : index
    %c0_242 = arith.constant 0 : index
    %c0_243 = arith.constant 0 : index
    %206 = vector.load %arg17[%c0_241, %c0_242, %c0_243] : memref<4x4x16xf32, #tpu.memory_space<vmem>>, vector<2x2x16xf32>
    %207 = vector.shape_cast %206 : vector<2x2x16xf32> to vector<4x16xf32>
    %c0_244 = arith.constant 0 : index
    %c0_245 = arith.constant 0 : index
    %c0_246 = arith.constant 0 : index
    %208 = vector.load %arg8[%c0_244, %c0_245, %c0_246] : memref<9x16x16xf32, #tpu.memory_space<vmem>>, vector<1x16x16xf32>
    %209 = vector.shape_cast %208 : vector<1x16x16xf32> to vector<16x16xf32>
    %cst_247 = arith.constant dense<0.000000e+00> : vector<4x16xf32>
    %210 = tpu.matmul %207, %209, %cst_247 {dimension_numbers = #tpu.dot_dimension_numbers<[1], [0], [0], [1], [0, 0, 1, 1], [], []>} : vector<4x16xf32>, vector<16x16xf32>, vector<4x16xf32> -> vector<4x16xf32>
    %c0_248 = arith.constant 0 : index
    %c1_249 = arith.constant 1 : index
    %c0_250 = arith.constant 0 : index
    %211 = vector.load %arg17[%c0_248, %c1_249, %c0_250] : memref<4x4x16xf32, #tpu.memory_space<vmem>>, vector<2x2x16xf32>
    %212 = vector.shape_cast %211 : vector<2x2x16xf32> to vector<4x16xf32>
    %c1_251 = arith.constant 1 : index
    %c0_252 = arith.constant 0 : index
    %c0_253 = arith.constant 0 : index
    %213 = vector.load %arg8[%c1_251, %c0_252, %c0_253] : memref<9x16x16xf32, #tpu.memory_space<vmem>>, vector<1x16x16xf32>
    %214 = vector.shape_cast %213 : vector<1x16x16xf32> to vector<16x16xf32>
    %cst_254 = arith.constant dense<0.000000e+00> : vector<4x16xf32>
    %215 = tpu.matmul %212, %214, %cst_254 {dimension_numbers = #tpu.dot_dimension_numbers<[1], [0], [0], [1], [0, 0, 1, 1], [], []>} : vector<4x16xf32>, vector<16x16xf32>, vector<4x16xf32> -> vector<4x16xf32>
    %216 = arith.addf %210, %215 : vector<4x16xf32>
    %c0_255 = arith.constant 0 : index
    %c2_256 = arith.constant 2 : index
    %c0_257 = arith.constant 0 : index
    %217 = vector.load %arg17[%c0_255, %c2_256, %c0_257] : memref<4x4x16xf32, #tpu.memory_space<vmem>>, vector<2x2x16xf32>
    %218 = vector.shape_cast %217 : vector<2x2x16xf32> to vector<4x16xf32>
    %c2_258 = arith.constant 2 : index
    %c0_259 = arith.constant 0 : index
    %c0_260 = arith.constant 0 : index
    %219 = vector.load %arg8[%c2_258, %c0_259, %c0_260] : memref<9x16x16xf32, #tpu.memory_space<vmem>>, vector<1x16x16xf32>
    %220 = vector.shape_cast %219 : vector<1x16x16xf32> to vector<16x16xf32>
    %cst_261 = arith.constant dense<0.000000e+00> : vector<4x16xf32>
    %221 = tpu.matmul %218, %220, %cst_261 {dimension_numbers = #tpu.dot_dimension_numbers<[1], [0], [0], [1], [0, 0, 1, 1], [], []>} : vector<4x16xf32>, vector<16x16xf32>, vector<4x16xf32> -> vector<4x16xf32>
    %222 = arith.addf %216, %221 : vector<4x16xf32>
    %c1_262 = arith.constant 1 : index
    %c0_263 = arith.constant 0 : index
    %c0_264 = arith.constant 0 : index
    %223 = vector.load %arg17[%c1_262, %c0_263, %c0_264] : memref<4x4x16xf32, #tpu.memory_space<vmem>>, vector<2x2x16xf32>
    %224 = vector.shape_cast %223 : vector<2x2x16xf32> to vector<4x16xf32>
    %c3_265 = arith.constant 3 : index
    %c0_266 = arith.constant 0 : index
    %c0_267 = arith.constant 0 : index
    %225 = vector.load %arg8[%c3_265, %c0_266, %c0_267] : memref<9x16x16xf32, #tpu.memory_space<vmem>>, vector<1x16x16xf32>
    %226 = vector.shape_cast %225 : vector<1x16x16xf32> to vector<16x16xf32>
    %cst_268 = arith.constant dense<0.000000e+00> : vector<4x16xf32>
    %227 = tpu.matmul %224, %226, %cst_268 {dimension_numbers = #tpu.dot_dimension_numbers<[1], [0], [0], [1], [0, 0, 1, 1], [], []>} : vector<4x16xf32>, vector<16x16xf32>, vector<4x16xf32> -> vector<4x16xf32>
    %228 = arith.addf %222, %227 : vector<4x16xf32>
    %c1_269 = arith.constant 1 : index
    %c1_270 = arith.constant 1 : index
    %c0_271 = arith.constant 0 : index
    %229 = vector.load %arg17[%c1_269, %c1_270, %c0_271] : memref<4x4x16xf32, #tpu.memory_space<vmem>>, vector<2x2x16xf32>
    %230 = vector.shape_cast %229 : vector<2x2x16xf32> to vector<4x16xf32>
    %c4_272 = arith.constant 4 : index
    %c0_273 = arith.constant 0 : index
    %c0_274 = arith.constant 0 : index
    %231 = vector.load %arg8[%c4_272, %c0_273, %c0_274] : memref<9x16x16xf32, #tpu.memory_space<vmem>>, vector<1x16x16xf32>
    %232 = vector.shape_cast %231 : vector<1x16x16xf32> to vector<16x16xf32>
    %cst_275 = arith.constant dense<0.000000e+00> : vector<4x16xf32>
    %233 = tpu.matmul %230, %232, %cst_275 {dimension_numbers = #tpu.dot_dimension_numbers<[1], [0], [0], [1], [0, 0, 1, 1], [], []>} : vector<4x16xf32>, vector<16x16xf32>, vector<4x16xf32> -> vector<4x16xf32>
    %234 = arith.addf %228, %233 : vector<4x16xf32>
    %c1_276 = arith.constant 1 : index
    %c2_277 = arith.constant 2 : index
    %c0_278 = arith.constant 0 : index
    %235 = vector.load %arg17[%c1_276, %c2_277, %c0_278] : memref<4x4x16xf32, #tpu.memory_space<vmem>>, vector<2x2x16xf32>
    %236 = vector.shape_cast %235 : vector<2x2x16xf32> to vector<4x16xf32>
    %c5_279 = arith.constant 5 : index
    %c0_280 = arith.constant 0 : index
    %c0_281 = arith.constant 0 : index
    %237 = vector.load %arg8[%c5_279, %c0_280, %c0_281] : memref<9x16x16xf32, #tpu.memory_space<vmem>>, vector<1x16x16xf32>
    %238 = vector.shape_cast %237 : vector<1x16x16xf32> to vector<16x16xf32>
    %cst_282 = arith.constant dense<0.000000e+00> : vector<4x16xf32>
    %239 = tpu.matmul %236, %238, %cst_282 {dimension_numbers = #tpu.dot_dimension_numbers<[1], [0], [0], [1], [0, 0, 1, 1], [], []>} : vector<4x16xf32>, vector<16x16xf32>, vector<4x16xf32> -> vector<4x16xf32>
    %240 = arith.addf %234, %239 : vector<4x16xf32>
    %c2_283 = arith.constant 2 : index
    %c0_284 = arith.constant 0 : index
    %c0_285 = arith.constant 0 : index
    %241 = vector.load %arg17[%c2_283, %c0_284, %c0_285] : memref<4x4x16xf32, #tpu.memory_space<vmem>>, vector<2x2x16xf32>
    %242 = vector.shape_cast %241 : vector<2x2x16xf32> to vector<4x16xf32>
    %c6_286 = arith.constant 6 : index
    %c0_287 = arith.constant 0 : index
    %c0_288 = arith.constant 0 : index
    %243 = vector.load %arg8[%c6_286, %c0_287, %c0_288] : memref<9x16x16xf32, #tpu.memory_space<vmem>>, vector<1x16x16xf32>
    %244 = vector.shape_cast %243 : vector<1x16x16xf32> to vector<16x16xf32>
    %cst_289 = arith.constant dense<0.000000e+00> : vector<4x16xf32>
    %245 = tpu.matmul %242, %244, %cst_289 {dimension_numbers = #tpu.dot_dimension_numbers<[1], [0], [0], [1], [0, 0, 1, 1], [], []>} : vector<4x16xf32>, vector<16x16xf32>, vector<4x16xf32> -> vector<4x16xf32>
    %246 = arith.addf %240, %245 : vector<4x16xf32>
    %c2_290 = arith.constant 2 : index
    %c1_291 = arith.constant 1 : index
    %c0_292 = arith.constant 0 : index
    %247 = vector.load %arg17[%c2_290, %c1_291, %c0_292] : memref<4x4x16xf32, #tpu.memory_space<vmem>>, vector<2x2x16xf32>
    %248 = vector.shape_cast %247 : vector<2x2x16xf32> to vector<4x16xf32>
    %c7_293 = arith.constant 7 : index
    %c0_294 = arith.constant 0 : index
    %c0_295 = arith.constant 0 : index
    %249 = vector.load %arg8[%c7_293, %c0_294, %c0_295] : memref<9x16x16xf32, #tpu.memory_space<vmem>>, vector<1x16x16xf32>
    %250 = vector.shape_cast %249 : vector<1x16x16xf32> to vector<16x16xf32>
    %cst_296 = arith.constant dense<0.000000e+00> : vector<4x16xf32>
    %251 = tpu.matmul %248, %250, %cst_296 {dimension_numbers = #tpu.dot_dimension_numbers<[1], [0], [0], [1], [0, 0, 1, 1], [], []>} : vector<4x16xf32>, vector<16x16xf32>, vector<4x16xf32> -> vector<4x16xf32>
    %252 = arith.addf %246, %251 : vector<4x16xf32>
    %c2_297 = arith.constant 2 : index
    %c2_298 = arith.constant 2 : index
    %c0_299 = arith.constant 0 : index
    %253 = vector.load %arg17[%c2_297, %c2_298, %c0_299] : memref<4x4x16xf32, #tpu.memory_space<vmem>>, vector<2x2x16xf32>
    %254 = vector.shape_cast %253 : vector<2x2x16xf32> to vector<4x16xf32>
    %c8_300 = arith.constant 8 : index
    %c0_301 = arith.constant 0 : index
    %c0_302 = arith.constant 0 : index
    %255 = vector.load %arg8[%c8_300, %c0_301, %c0_302] : memref<9x16x16xf32, #tpu.memory_space<vmem>>, vector<1x16x16xf32>
    %256 = vector.shape_cast %255 : vector<1x16x16xf32> to vector<16x16xf32>
    %cst_303 = arith.constant dense<0.000000e+00> : vector<4x16xf32>
    %257 = tpu.matmul %254, %256, %cst_303 {dimension_numbers = #tpu.dot_dimension_numbers<[1], [0], [0], [1], [0, 0, 1, 1], [], []>} : vector<4x16xf32>, vector<16x16xf32>, vector<4x16xf32> -> vector<4x16xf32>
    %258 = arith.addf %252, %257 : vector<4x16xf32>
    %c0_304 = arith.constant 0 : index
    %c0_305 = arith.constant 0 : index
    %259 = vector.load %arg9[%c0_304, %c0_305] : memref<1x16xf32, #tpu.memory_space<vmem>>, vector<1x16xf32>
    %260 = vector.broadcast %259 : vector<1x16xf32> to vector<4x16xf32>
    %261 = arith.addf %258, %260 : vector<4x16xf32>
    %cst_306 = arith.constant 0.000000e+00 : f32
    %262 = vector.broadcast %cst_306 : f32 to vector<4x16xf32>
    %263 = arith.maximumf %261, %262 : vector<4x16xf32>
    %c0_307 = arith.constant 0 : index
    %c0_308 = arith.constant 0 : index
    %264 = vector.load %arg18[%c0_307, %c0_308] : memref<4x16xf32, #tpu.memory_space<vmem>>, vector<4x16xf32>
    tpu.vector_store %arg18[%c0_307, %c0_308], %263 {strides = array<i32>} : memref<4x16xf32, #tpu.memory_space<vmem>>, vector<4x16xf32>,
    %c0_309 = arith.constant 0 : index
    %c0_310 = arith.constant 0 : index
    %265 = tpu.strided_load %arg18[%c0_309, %c0_310] {strides = array<i32: 2, 1>} : memref<4x16xf32, #tpu.memory_space<vmem>>, vector<2x16xf32>
    %c1_311 = arith.constant 1 : index
    %c0_312 = arith.constant 0 : index
    %266 = tpu.strided_load %arg18[%c1_311, %c0_312] {strides = array<i32: 2, 1>} : memref<4x16xf32, #tpu.memory_space<vmem>>, vector<2x16xf32>
    %267 = arith.maximumf %265, %266 : vector<2x16xf32>
    %268 = vector.shape_cast %267 : vector<2x16xf32> to vector<1x2x1x16xf32>
    %cst_313 = arith.constant dense<0xFF800000> : vector<1x1x16xf32>
    %269 = vector.multi_reduction <maximumf>, %268, %cst_313 [1] : vector<1x2x1x16xf32> to vector<1x1x16xf32>
    %c0_314 = arith.constant 0 : index
    %c0_315 = arith.constant 0 : index
    %c0_316 = arith.constant 0 : index
    %c0_317 = arith.constant 0 : index
    %270 = vector.load %arg10[%c0_314, %c0_315, %c0_316, %c0_317] : memref<1x1x1x16xf32, #tpu.memory_space<vmem>>, vector<1x1x1x16xf32>
    %271 = vector.shape_cast %270 : vector<1x1x1x16xf32> to vector<1x1x16xf32>
    %272 = vector.shape_cast %269 : vector<1x1x16xf32> to vector<1x1x1x16xf32>
    tpu.vector_store %arg10[%c0_314, %c0_315, %c0_316, %c0_317], %272 {strides = array<i32>} : memref<1x1x1x16xf32, #tpu.memory_space<vmem>>, vector<1x1x1x16xf32>,
    return
  }
  func.func @transform_0(%arg0: i32) -> (i32, i32, i32, i32) {
    %c0_i32 = arith.constant 0 : i32
    %c0_i32_0 = arith.constant 0 : i32
    %c0_i32_1 = arith.constant 0 : i32
    %c0_i32_2 = arith.constant 0 : i32
    return %arg0, %c0_i32, %c0_i32_0, %c0_i32_1 : i32, i32, i32, i32
  }
  func.func @transform_1(%arg0: i32) -> (i32, i32, i32) {
    %c0_i32 = arith.constant 0 : i32
    %c0_i32_0 = arith.constant 0 : i32
    %c0_i32_1 = arith.constant 0 : i32
    %c0_i32_2 = arith.constant 0 : i32
    return %c0_i32, %c0_i32_0, %c0_i32_1 : i32, i32, i32
  }
  func.func @transform_2(%arg0: i32) -> (i32, i32) {
    %c0_i32 = arith.constant 0 : i32
    %c0_i32_0 = arith.constant 0 : i32
    %c0_i32_1 = arith.constant 0 : i32
    return %c0_i32, %c0_i32_0 : i32, i32
  }
  func.func @transform_3(%arg0: i32) -> (i32, i32, i32) {
    %c0_i32 = arith.constant 0 : i32
    %c0_i32_0 = arith.constant 0 : i32
    %c0_i32_1 = arith.constant 0 : i32
    %c0_i32_2 = arith.constant 0 : i32
    return %c0_i32, %c0_i32_0, %c0_i32_1 : i32, i32, i32
  }
  func.func @transform_4(%arg0: i32) -> (i32, i32) {
    %c0_i32 = arith.constant 0 : i32
    %c0_i32_0 = arith.constant 0 : i32
    %c0_i32_1 = arith.constant 0 : i32
    return %c0_i32, %c0_i32_0 : i32, i32
  }
  func.func @transform_5(%arg0: i32) -> (i32, i32, i32) {
    %c0_i32 = arith.constant 0 : i32
    %c0_i32_0 = arith.constant 0 : i32
    %c0_i32_1 = arith.constant 0 : i32
    %c0_i32_2 = arith.constant 0 : i32
    return %c0_i32, %c0_i32_0, %c0_i32_1 : i32, i32, i32
  }
  func.func @transform_6(%arg0: i32) -> (i32, i32) {
    %c0_i32 = arith.constant 0 : i32
    %c0_i32_0 = arith.constant 0 : i32
    %c0_i32_1 = arith.constant 0 : i32
    return %c0_i32, %c0_i32_0 : i32, i32
  }
  func.func @transform_7(%arg0: i32) -> (i32, i32, i32) {
    %c0_i32 = arith.constant 0 : i32
    %c0_i32_0 = arith.constant 0 : i32
    %c0_i32_1 = arith.constant 0 : i32
    %c0_i32_2 = arith.constant 0 : i32
    return %c0_i32, %c0_i32_0, %c0_i32_1 : i32, i32, i32
  }
  func.func @transform_8(%arg0: i32) -> (i32, i32) {
    %c0_i32 = arith.constant 0 : i32
    %c0_i32_0 = arith.constant 0 : i32
    %c0_i32_1 = arith.constant 0 : i32
    return %c0_i32, %c0_i32_0 : i32, i32
  }
  func.func @transform_9(%arg0: i32) -> (i32, i32, i32, i32) {
    %c0_i32 = arith.constant 0 : i32
    %c0_i32_0 = arith.constant 0 : i32
    %c0_i32_1 = arith.constant 0 : i32
    %c0_i32_2 = arith.constant 0 : i32
    return %arg0, %c0_i32, %c0_i32_0, %c0_i32_1 : i32, i32, i32, i32
  }
}

</mosaic_0001>

<bundles_post_ra>
// kernel: convnet4_forward.1
= control target key start
LH: loop header
LB: loop body
LE: loop exit
PB: predicated region body
PF: predicated region fallthrough
CT: control target
= control target key end

     0   :  { %14 = vsyncpa [#allocation11], 0  ;;  %s11389_s0 = inlined_call_operand.vmem [shape: f32[2,16,16,3], index: 0, kind: input, shape index: {}]   ;;  %s11390_s1 = inlined_call_operand.vmem [shape: f32[9,3,16], index: 1, kind: input, shape index: {}]   ;;  %s11391_s2 = inlined_call_operand.vmem [shape: f32[1,16], index: 2, kind: input, shape index: {}]   ;;  %s11392_s3 = inlined_call_operand.vmem [shape: f32[9,16,16], index: 3, kind: input, shape index: {}]   ;;  %s11393_s4 = inlined_call_operand.vmem [shape: f32[1,16], index: 4, kind: input, shape index: {}]   ;;  %s11394_s5 = inlined_call_operand.vmem [shape: f32[9,16,16], index: 5, kind: input, shape index: {}]   ;;  %s11395_s6 = inlined_call_operand.vmem [shape: f32[1,16], index: 6, kind: input, shape index: {}]   ;;  %s11396_s7 = inlined_call_operand.vmem [shape: f32[9,16,16], index: 7, kind: input, shape index: {}]   ;;  %s11397_s8 = inlined_call_operand.vmem [shape: f32[1,16], index: 8, kind: input, shape index: {}]   ;;  %s11398_s9 = inlined_call_operand.hbm [shape: f32[2,1,1,16], index: 9, kind: output, shape index: {}]  }
   0x1   :  { %16 = vsyncpa [#allocation11 + $0x1], 0  ;;  %s9611_s30 = smov 0   ;;  %s9613_s10 = smov 0  }
   0x2   :  { %s9615_s11 = smov 0   ;;  %s9617_s12 = smov 0  }
   0x3 LB: > { %s9632_s13 = sadd.s32 4294967295, %s9553_s12   ;;  %s7338_s14 = sadd.s32 4294967294, %s9553_s12   ;;  %s9553_s12 = sphi %s9617_s12, %s11496_s12   ;;  %s9549_s11 = sphi %s9615_s11, %s11495_s11   ;;  %s9545_s10 = sphi %s9613_s10, %s11494_s10   ;;  %s9541_s30 = sphi %s9611_s30, %s11493_s30  }
   0x4   : > { %s9636_s15 = sadd.s32 1, %s9553_s12   ;;  %s223_s16 = sadd.s32 1, %s9549_s11 }
   0x5   : > { %s220_s17 = ssub.s32 %s9553_s12, %s9636_s15  ;;  %p233_p0 = scmp.ne.s32.totalorder %s9549_s11, %s9545_s10 }
   0x6   : > { %p221_p1 = scmp.eq.s32.totalorder %s220_s17, 0  ;;  %p234_p2 = scmp.eq.s32.totalorder %s9632_s13, 1 }
   0x7   : > { %p239_p3 = scmp.ne.s32.totalorder %s9545_s10, %s9541_s30  ;;  %p240_p4 = scmp.eq.s32.totalorder %s7338_s14, 1 }
   0x8   : > { %s9647_s18 = scalar_select %p221_p1, %s9549_s11, %s223_s16  }
   0x9   : > { %p9649_p5 = por %p234_p2, %p233_p0  ;;  %p9653_p6 = por %p240_p4, %p239_p3 }
   0xa   : > { %p7341_p7 = scmp.ge.s32.totalorder %s9553_s12, 1  ;;  %p290_p8 = scmp.lt.s32.totalorder %s9553_s12, 3 }
   0xc   : > { %p291_p9 = pnand %p7341_p7, %p290_p8 }
   0xe   : > { %294 = sbr.rel (%p291_p9) target bundleno = 1631 (0x65f), region = 56 }
  0x15   : > { %vm614_vm0 = vcmask 1042432   ;;  %v9662_v0 = vld [vmem:[%s11390_s1 + $0x8] sm:$0x7]  ;;  %vm362_vm1 = vcmask 23552   ;;  %vm365_vm2 = vcmask 17408   ;;  %v11399_v1 = vmov 0.0  }
  0x16   : > { %8354 = vmatprep.subr.msk.mxu0 %vm614_vm0, %v9662_v0  ;;  %363 = vst.msk [vmem:[#allocation2] sm:$0xff] %vm362_vm1, %v11399_v1  ;;  %364 = vst.msk [vmem:[#allocation2 + $0x8] sm:$0xff] %vm362_vm1, %v11399_v1  ;;  %v7445_v2 = vld [vmem:[%s11390_s1 + $0xc] sm:$0x7]  ;;  %p325_p10 = scmp.lt.s32.totalorder %s9632_s13, 1  ;;  %vm3969_vm3 = vcmask 130048  }
  0x17   : > { %367 = vst.msk [vmem:[#allocation2 + $0x18] sm:$0xff] %vm362_vm1, %v11399_v1  ;;  %368 = vst.msk [vmem:[#allocation2 + $0x20] sm:$0xff] %vm362_vm1, %v11399_v1  ;;  %8355 = vmatpush3.msk.msra.mxu0 %vm614_vm0, %v9662_v0  ;;  %v7344_v3 = vld [vmem:[%s11390_s1 + $0x4] sm:$0x7]  ;;  %v9798_v7 = vld [vmem:[%s11390_s1 + $0x10] sm:$0x7] }
  0x18   : > { %370 = vst.msk [vmem:[#allocation2 + $0x30] sm:$0xff] %vm362_vm1, %v11399_v1  ;;  %371 = vst.msk [vmem:[#allocation2 + $0x38] sm:$0xff] %vm362_vm1, %v11399_v1  ;;  %8404 = vmatprep.subr.msk.mxu0 %vm614_vm0, %v7445_v2  ;;  %s326_s27 = scalar_select %p325_p10, %s9632_s13, 1  ;;  %8254 = vmatprep.subr.msk.mxu1 %vm614_vm0, %v7344_v3  ;;  %v9874_v37 = vld [vmem:[%s11390_s1 + $0x14] sm:$0x7]  ;;  %vm4106_vm4 = vcmask 123904  }
  0x19   : > { %373 = vst.msk [vmem:[#allocation2 + $0x48] sm:$0xff] %vm362_vm1, %v11399_v1  ;;  %374 = vst.msk [vmem:[#allocation2 + $0x50] sm:$0xff] %vm362_vm1, %v11399_v1  ;;  %8255 = vmatpush3.msk.msra.mxu1 %vm614_vm0, %v7344_v3  ;;  %vm5513_vm5 = vcmask 125952   ;;  %vm5526_vm6 = vcmask 128000   ;;  %vm9557_vm7 = vmmov 0   ;;  %s7800_s29 = sshll.u32 %s9632_s13, 4 }
  0x1a   : > { %376 = vst.msk [vmem:[#allocation2 + $0x60] sm:$0xff] %vm362_vm1, %v11399_v1  ;;  %377 = vst.msk [vmem:[#allocation2 + $0x68] sm:$0xff] %vm362_vm1, %v11399_v1  ;;  %s7803_s28 = sshll.u32 %s326_s27, 8  ;;  %vm7268_vm9 = vcmask 122880   ;;  %s11347_s22 = scalar_lea.hbm %s11398_s9, %s7800_s29 }
  0x1b   : > { %379 = vst.msk [vmem:[#allocation2 + $0x78] sm:$0xff] %vm362_vm1, %v11399_v1  ;;  %380 = vst.msk [vmem:[#allocation2 + $0x80] sm:$0xff] %vm362_vm1, %v11399_v1  ;;  %s9790_s16 = scalar_lea.vmem %s11389_s0, %s7803_s28  ;;  %s323_s28 = sand.u32 1, %s9545_s10  }
  0x1c   : > { %382 = vst.msk [vmem:[#allocation2 + $0x90] sm:$0xff] %vm362_vm1, %v11399_v1  ;;  %383 = vst.msk [vmem:[#allocation2 + $0x98] sm:$0xff] %vm362_vm1, %v11399_v1  ;;  %v330_v4 = vld [vmem:[%s9790_s16] sm:$0xff]  ;;  %v331_v5 = vld [vmem:[%s9790_s16 + $0x8] sm:$0xff]  ;;  %s324_s14 = scalar_lea.vmem [#allocation10], %s323_s28  ;;  %s7271_s23 = scalar_lea.sflag [#allocation11], %s323_s28 }
  0x1d   : > { %385 = vst.msk [vmem:[#allocation2 + $0xa8] sm:$0xff] %vm362_vm1, %v11399_v1  ;;  %386 = vst.msk [vmem:[#allocation2 + $0xb0] sm:$0xff] %vm362_vm1, %v11399_v1  ;;  %v332_v6 = vld [vmem:[%s9790_s16 + $0x10] sm:$0xff]  ;;  %v1167_v8 = vld [vmem:[#allocation2 + $0x2] sm:$0xff]  ;;  %s9560_s13 = smov [#allocation10]  }
  0x1e   : > { %388 = vst.msk [vmem:[#allocation2 + $0xc0] sm:$0xff] %vm362_vm1, %v11399_v1  ;;  %389 = vst.msk [vmem:[#allocation2 + $0xc8] sm:$0xff] %vm362_vm1, %v11399_v1  ;;  %v333_v10 = vld [vmem:[%s9790_s16 + $0x18] sm:$0xff]  ;;  %8356 = vmatprep.mubr.msk.f32.mxu0 %vm362_vm1, %v1167_v8  ;;  %v334_v11 = vld [vmem:[%s9790_s16 + $0x20] sm:$0xff]  ;;  %s9495_s25 = sshll.u32 %s9560_s13, 4  ;;  %s9496_s25 = int_to_ptr.vmem [resolvable:$false] %s9495_s25 }
  0x1f   : > { %391 = vst.msk [vmem:[#allocation2 + $0xd8] sm:$0xff] %vm362_vm1, %v11399_v1  ;;  %392 = vst.msk [vmem:[#allocation2 + $0xe0] sm:$0xff] %vm362_vm1, %v11399_v1  ;;  %v335_v12 = vld [vmem:[%s9790_s16 + $0x28] sm:$0xff]  ;;  %v336_v13 = vld [vmem:[%s9790_s16 + $0x30] sm:$0xff]  ;;  %s9497_s26 = scalar_lea.vmem %s9496_s25, 32 }
  0x20   : > { %394 = vst.msk [vmem:[#allocation2 + $0xf0] sm:$0xff] %vm362_vm1, %v11399_v1  ;;  %395 = vst.msk [vmem:[#allocation2 + $0xf8] sm:$0xff] %vm362_vm1, %v11399_v1  ;;  %v337_v14 = vld [vmem:[%s9790_s16 + $0x38] sm:$0xff]  ;;  %v338_v15 = vld [vmem:[%s9790_s16 + $0x40] sm:$0xff] }
  0x21   : > { %397 = vst.msk [vmem:[#allocation2 + $0x108] sm:$0xff] %vm362_vm1, %v11399_v1  ;;  %398 = vst.msk [vmem:[#allocation2 + $0x110] sm:$0xff] %vm362_vm1, %v11399_v1  ;;  %v339_v16 = vld [vmem:[%s9790_s16 + $0x48] sm:$0xff]  ;;  %v340_v17 = vld [vmem:[%s9790_s16 + $0x50] sm:$0xff] }
  0x22   : > { %400 = vst.msk [vmem:[#allocation2 + $0x120] sm:$0xff] %vm362_vm1, %v11399_v1  ;;  %401 = vst.msk [vmem:[#allocation2 + $0x128] sm:$0xff] %vm362_vm1, %v11399_v1  ;;  %v341_v18 = vld [vmem:[%s9790_s16 + $0x58] sm:$0xff]  ;;  %v342_v19 = vld [vmem:[%s9790_s16 + $0x60] sm:$0xff] }
  0x23   : > { %403 = vst.msk [vmem:[#allocation2 + $0x138] sm:$0xff] %vm362_vm1, %v11399_v1  ;;  %404 = vst.msk [vmem:[#allocation2 + $0x140] sm:$0xff] %vm362_vm1, %v11399_v1  ;;  %v343_v20 = vld [vmem:[%s9790_s16 + $0x68] sm:$0xff]  ;;  %v344_v21 = vld [vmem:[%s9790_s16 + $0x70] sm:$0xff] }
  0x24   : > { %406 = vst.msk [vmem:[#allocation2 + $0x150] sm:$0xff] %vm362_vm1, %v11399_v1  ;;  %407 = vst.msk [vmem:[#allocation2 + $0x158] sm:$0xff] %vm362_vm1, %v11399_v1  ;;  %v345_v22 = vld [vmem:[%s9790_s16 + $0x78] sm:$0xff]  ;;  %v346_v23 = vld [vmem:[%s9790_s16 + $0x80] sm:$0xff] }
  0x25   : > { %409 = vst.msk [vmem:[#allocation2 + $0x168] sm:$0xff] %vm362_vm1, %v11399_v1  ;;  %410 = vst.msk [vmem:[#allocation2 + $0x170] sm:$0xff] %vm362_vm1, %v11399_v1  ;;  %v347_v24 = vld [vmem:[%s9790_s16 + $0x88] sm:$0xff]  ;;  %v348_v25 = vld [vmem:[%s9790_s16 + $0x90] sm:$0xff] }
  0x26   : > { %412 = vst.msk [vmem:[#allocation2 + $0x180] sm:$0xff] %vm362_vm1, %v11399_v1  ;;  %413 = vst.msk [vmem:[#allocation2 + $0x188] sm:$0xff] %vm362_vm1, %v11399_v1  ;;  %v349_v26 = vld [vmem:[%s9790_s16 + $0x98] sm:$0xff]  ;;  %v350_v27 = vld [vmem:[%s9790_s16 + $0xa0] sm:$0xff] }
  0x27   : > { %415 = vst.msk [vmem:[#allocation2 + $0x198] sm:$0xff] %vm362_vm1, %v11399_v1  ;;  %416 = vst.msk [vmem:[#allocation2 + $0x1a0] sm:$0xff] %vm362_vm1, %v11399_v1  ;;  %v351_v28 = vld [vmem:[%s9790_s16 + $0xa8] sm:$0xff]  ;;  %v352_v36 = vld [vmem:[%s9790_s16 + $0xb0] sm:$0xff] }
  0x28   : > { %366 = vst.msk [vmem:[#allocation2 + $0x10] sm:$0x3] %vm365_vm2, %v11399_v1  ;;  %369 = vst.msk [vmem:[#allocation2 + $0x28] sm:$0x3] %vm365_vm2, %v11399_v1  ;;  %v353_v39 = vld [vmem:[%s9790_s16 + $0xb8] sm:$0xff]  ;;  %v354_v40 = vld [vmem:[%s9790_s16 + $0xc0] sm:$0xff] }
  0x29   : > { %372 = vst.msk [vmem:[#allocation2 + $0x40] sm:$0x3] %vm365_vm2, %v11399_v1  ;;  %375 = vst.msk [vmem:[#allocation2 + $0x58] sm:$0x3] %vm365_vm2, %v11399_v1  ;;  %v355_v41 = vld [vmem:[%s9790_s16 + $0xc8] sm:$0xff]  ;;  %v356_v42 = vld [vmem:[%s9790_s16 + $0xd0] sm:$0xff] }
  0x2a   : > { %378 = vst.msk [vmem:[#allocation2 + $0x70] sm:$0x3] %vm365_vm2, %v11399_v1  ;;  %381 = vst.msk [vmem:[#allocation2 + $0x88] sm:$0x3] %vm365_vm2, %v11399_v1  ;;  %v357_v43 = vld [vmem:[%s9790_s16 + $0xd8] sm:$0xff]  ;;  %v358_v44 = vld [vmem:[%s9790_s16 + $0xe0] sm:$0xff] }
  0x2b   : > { %384 = vst.msk [vmem:[#allocation2 + $0xa0] sm:$0x3] %vm365_vm2, %v11399_v1  ;;  %387 = vst.msk [vmem:[#allocation2 + $0xb8] sm:$0x3] %vm365_vm2, %v11399_v1  ;;  %v359_v45 = vld [vmem:[%s9790_s16 + $0xe8] sm:$0xff]  ;;  %v360_v46 = vld [vmem:[%s9790_s16 + $0xf0] sm:$0xff] }
  0x2c   : > { %390 = vst.msk [vmem:[#allocation2 + $0xd0] sm:$0x3] %vm365_vm2, %v11399_v1  ;;  %393 = vst.msk [vmem:[#allocation2 + $0xe8] sm:$0x3] %vm365_vm2, %v11399_v1  ;;  %v361_v47 = vld [vmem:[%s9790_s16 + $0xf8] sm:$0xff]  ;;  %v484_v51 = vld [vmem:[#allocation2 + $0x1] sm:$0xff] }
  0x2d   : > { %396 = vst.msk [vmem:[#allocation2 + $0x100] sm:$0x3] %vm365_vm2, %v11399_v1  ;;  %399 = vst.msk [vmem:[#allocation2 + $0x118] sm:$0x3] %vm365_vm2, %v11399_v1  ;;  %8256 = vmatprep.mubr.msk.f32.mxu1 %vm362_vm1, %v484_v51  ;;  %s7283_s16 = sshll.u32 %s324_s14, 4  ;;  %s11349_s16 = int_to_ptr.vmem [resolvable:$true] %s7283_s16 }
  0x2e   : > { %402 = vst.msk [vmem:[#allocation2 + $0x130] sm:$0x3] %vm365_vm2, %v11399_v1  ;;  %405 = vst.msk [vmem:[#allocation2 + $0x148] sm:$0x3] %vm365_vm2, %v11399_v1  ;;  %s9491_s24 = scalar_lea.vmem %s11349_s16, 16  ;;  %p9498_p0 = scmp.lt.s32.totalorder %s11349_s16, %s9496_s25 }
  0x2f   : > { %408 = vst.msk [vmem:[#allocation2 + $0x160] sm:$0x3] %vm365_vm2, %v11399_v1  ;;  %411 = vst.msk [vmem:[#allocation2 + $0x178] sm:$0x3] %vm365_vm2, %v11399_v1  ;;  %v1168_v9 = vld [vmem:[#allocation2 + $0xa] sm:$0xff]  ;;  %p9492_p11 = scmp.ne.s32.totalorder %s11349_s16, %s9491_s24  ;;  %p9499_p1 = scmp.lt.s32.totalorder %s9497_s26, %s9491_s24 }
  0x30   : > { %414 = vst.msk [vmem:[#allocation2 + $0x190] sm:$0x3] %vm365_vm2, %v11399_v1  ;;  %417 = vst.msk [vmem:[#allocation2 + $0x1a8] sm:$0x3] %vm365_vm2, %v11399_v1  ;;  %8357 = vmatmul.mubr.msk.f32.vlgmr.msra.gmra.mrb[0].mxu0 %vm362_vm1, %v1168_v9  ;;  %v485_v52 = vld [vmem:[#allocation2 + $0x9] sm:$0xff] }
  0x31   : > { %419 = vst.msk [vmem:[#allocation2 + $0x19] sm:$0xff] %vm362_vm1, %v330_v4  ;;  %420 = vst.msk [vmem:[#allocation2 + $0x21] sm:$0xff] %vm362_vm1, %v331_v5  ;;  %8405 = vmatpush3.msk.msra.mxu0 %vm614_vm0, %v7445_v2  ;;  %8257 = vmatmul.mubr.msk.f32.vlgmr.msra.gmra.mrb[0].mxu1 %vm362_vm1, %v485_v52  ;;  %v483_v4 = vld [vmem:[%s11390_s1] sm:$0x7]  ;;  %p9493_p12 = pnand %p9492_p11, %p9649_p5  ;;  %p9500_p2 = por %p9499_p1, %p9498_p0 }
  0x32   : > { %421 = vst.msk [vmem:[#allocation2 + $0x31] sm:$0xff] %vm362_vm1, %v332_v6  ;;  %422 = vst.msk [vmem:[#allocation2 + $0x39] sm:$0xff] %vm362_vm1, %v333_v10  ;;  %8454 = vmatprep.subr.msk.mxu0 %vm614_vm0, %v9798_v7  ;;  %8304 = vmatprep.subr.msk.mxu1 %vm614_vm0, %v483_v4 }
  0x33   : > { %423 = vst.msk [vmem:[#allocation2 + $0x49] sm:$0xff] %vm362_vm1, %v334_v11  ;;  %424 = vst.msk [vmem:[#allocation2 + $0x51] sm:$0xff] %vm362_vm1, %v335_v12  ;;  %8305 = vmatpush3.msk.msra.mxu1 %vm614_vm0, %v483_v4  ;;  %p9494_p13 = pneg %p9493_p12 }
  0x34   : > { %425 = vst.msk [vmem:[#allocation2 + $0x61] sm:$0xff] %vm362_vm1, %v336_v13  ;;  %426 = vst.msk [vmem:[#allocation2 + $0x69] sm:$0xff] %vm362_vm1, %v337_v14  ;;  %9073 = vmatprep.subr.msk.mxu1 %vm614_vm0, %v9662_v0 }
  0x35   : > { %427 = vst.msk [vmem:[#allocation2 + $0x79] sm:$0xff] %vm362_vm1, %v338_v15  ;;  %428 = vst.msk [vmem:[#allocation2 + $0x81] sm:$0xff] %vm362_vm1, %v339_v16  ;;  %p9501_p3 = pnand %p9500_p2, %p9494_p13 }
  0x36   : > { %429 = vst.msk [vmem:[#allocation2 + $0x91] sm:$0xff] %vm362_vm1, %v340_v17  ;;  %430 = vst.msk [vmem:[#allocation2 + $0x99] sm:$0xff] %vm362_vm1, %v341_v18 }
  0x37   : > { %431 = vst.msk [vmem:[#allocation2 + $0xa9] sm:$0xff] %vm362_vm1, %v342_v19  ;;  %432 = vst.msk [vmem:[#allocation2 + $0xb1] sm:$0xff] %vm362_vm1, %v343_v20 }
  0x38   : > { %433 = vst.msk [vmem:[#allocation2 + $0xc1] sm:$0xff] %vm362_vm1, %v344_v21  ;;  %434 = vst.msk [vmem:[#allocation2 + $0xc9] sm:$0xff] %vm362_vm1, %v345_v22  ;;  %v9843_v29 = vld [vmem:[#allocation2 + $0x1a] sm:$0xff]  ;;  %v9845_v30 = vld [vmem:[#allocation2 + $0x22] sm:$0xff] }
  0x39   : > { %435 = vst.msk [vmem:[#allocation2 + $0xd9] sm:$0xff] %vm362_vm1, %v346_v23  ;;  %436 = vst.msk [vmem:[#allocation2 + $0xe1] sm:$0xff] %vm362_vm1, %v347_v24  ;;  %8359 = vmatprep.mubr.msk.f32.mxu0 %vm362_vm1, %v9843_v29  ;;  %v9852_v31 = vld [vmem:[#allocation2 + $0x32] sm:$0xff]  ;;  %v9858_v32 = vld [vmem:[#allocation2 + $0x3a] sm:$0xff] }
  0x3a   : > { %437 = vst.msk [vmem:[#allocation2 + $0xf1] sm:$0xff] %vm362_vm1, %v348_v25  ;;  %438 = vst.msk [vmem:[#allocation2 + $0xf9] sm:$0xff] %vm362_vm1, %v349_v26  ;;  %8360 = vmatmul.mubr.msk.f32.gmra.mrb[2].mxu0 %vm362_vm1, %v9845_v30  ;;  %v9860_v33 = vld [vmem:[#allocation2 + $0x18] sm:$0xff]  ;;  %v9866_v34 = vld [vmem:[#allocation2 + $0x20] sm:$0xff] }
  0x3b   : > { %439 = vst.msk [vmem:[#allocation2 + $0x109] sm:$0xff] %vm362_vm1, %v350_v27  ;;  %440 = vst.msk [vmem:[#allocation2 + $0x111] sm:$0xff] %vm362_vm1, %v351_v28  ;;  %8362 = vmatprep.mubr.msk.f32.mxu0 %vm362_vm1, %v9852_v31  ;;  %v9868_v35 = vld [vmem:[#allocation2 + $0x30] sm:$0xff]  ;;  %v9876_v38 = vld [vmem:[#allocation2 + $0x38] sm:$0xff] }
  0x3c   : > { %11434 = vst [vmem:[#allocation13_spill] sm:$0xff] %v9858_v32  ;;  %441 = vst.msk [vmem:[#allocation2 + $0x121] sm:$0xff] %vm362_vm1, %v352_v36  ;;  %v9900_v48 = vld [vmem:[#allocation2 + $0x48] sm:$0xff]  ;;  %v9911_v49 = vld [vmem:[#allocation2 + $0x50] sm:$0xff] }
  0x3d   : > { %442 = vst.msk [vmem:[#allocation2 + $0x129] sm:$0xff] %vm362_vm1, %v353_v39  ;;  %443 = vst.msk [vmem:[#allocation2 + $0x139] sm:$0xff] %vm362_vm1, %v354_v40  ;;  %v9913_v50 = vld [vmem:[#allocation2 + $0x60] sm:$0xff]  ;;  %v9923_v54 = vld [vmem:[#allocation2 + $0x68] sm:$0xff] }
  0x3e   : > { %8363 = vmatmul.mubr.msk.f32.gmra.mrb[4].mxu0 %vm362_vm1, %v9858_v32  ;;  %444 = vst.msk [vmem:[#allocation2 + $0x141] sm:$0xff] %vm362_vm1, %v355_v41  ;;  %445 = vst.msk [vmem:[#allocation2 + $0x151] sm:$0xff] %vm362_vm1, %v356_v42  ;;  %v9918_v53 = vld [vmem:[#allocation2 + $0x19] sm:$0xff]  ;;  %v9929_v56 = vld [vmem:[#allocation2 + $0x21] sm:$0xff] }
  0x3f   : > { %8406 = vmatprep.mubr.msk.f32.mxu0 %vm362_vm1, %v9860_v33  ;;  %446 = vst.msk [vmem:[#allocation2 + $0x159] sm:$0xff] %vm362_vm1, %v357_v43  ;;  %447 = vst.msk [vmem:[#allocation2 + $0x169] sm:$0xff] %vm362_vm1, %v358_v44  ;;  %8259 = vmatprep.mubr.msk.f32.mxu1 %vm362_vm1, %v9918_v53  ;;  %v9927_v55 = vld [vmem:[#allocation2 + $0x78] sm:$0xff]  ;;  %v9939_v58 = vld [vmem:[#allocation2 + $0x80] sm:$0xff] }
  0x40   : > { %448 = vst.msk [vmem:[#allocation2 + $0x171] sm:$0xff] %vm362_vm1, %v359_v45  ;;  %449 = vst.msk [vmem:[#allocation2 + $0x181] sm:$0xff] %vm362_vm1, %v360_v46  ;;  %v9933_v57 = vld [vmem:[#allocation2 + $0x31] sm:$0xff]  ;;  %8260 = vmatmul.mubr.msk.f32.gmra.mrb[2].mxu1 %vm362_vm1, %v9929_v56  ;;  %v9945_v60 = vld [vmem:[#allocation2 + $0x39] sm:$0xff] }
  0x41   : > { %450 = vst.msk [vmem:[#allocation2 + $0x189] sm:$0xff] %vm362_vm1, %v361_v47  ;;  %8262 = vmatprep.mubr.msk.f32.mxu1 %vm362_vm1, %v9933_v57  ;;  %v9943_v59 = vld [vmem:[#allocation2 + $0x90] sm:$0xff]  ;;  %v9955_v62 = vld [vmem:[#allocation2 + $0x98] sm:$0xff]  ;;  %v9959_v63 = vld [vmem:[#allocation2 + $0xa8] sm:$0xff] }
  0x42   : > { %8407 = vmatmul.mubr.msk.f32.vlgmr.msra.gmra.mrb[0].mxu0 %vm362_vm1, %v9866_v34  ;;  %v9949_v61 = vld [vmem:[#allocation2 + $0x49] sm:$0xff]  ;;  %v9961_v2 = vld [vmem:[#allocation2 + $0x51] sm:$0xff]  ;;  %v9965_v3 = vld [vmem:[#allocation2 + $0x61] sm:$0xff] }
  0x43   : > { %8455 = vmatpush3.msk.msra.mxu0 %vm614_vm0, %v9798_v7  ;;  %8409 = vmatprep.mubr.msk.f32.mxu0 %vm362_vm1, %v9868_v35  ;;  %v9974_v5 = vld [vmem:[#allocation2 + $0xb0] sm:$0xff]  ;;  %v9978_v6 = vld [vmem:[#allocation2 + $0xc0] sm:$0xff]  ;;  %v9992_v9 = vld [vmem:[#allocation2 + $0xc8] sm:$0xff] }
  0x44   : > { %8504 = vmatprep.subr.msk.mxu0 %vm614_vm0, %v9874_v37  ;;  %8263 = vmatmul.mubr.msk.f32.gmra.mrb[4].mxu1 %vm362_vm1, %v9945_v60  ;;  %v9981_v7 = vld [vmem:[#allocation2 + $0x69] sm:$0xff]  ;;  %v9986_v8 = vld [vmem:[#allocation2 + $0x79] sm:$0xff]  ;;  %v10000_v11 = vld [vmem:[#allocation2 + $0x81] sm:$0xff] }
  0x45   : > { %8265 = vmatprep.mubr.msk.f32.mxu1 %vm362_vm1, %v9949_v61  ;;  %v9996_v10 = vld [vmem:[#allocation2 + $0xd8] sm:$0xff]  ;;  %v10010_v13 = vld [vmem:[#allocation2 + $0xe0] sm:$0xff]  ;;  %v10014_v14 = vld [vmem:[#allocation2 + $0xf0] sm:$0xff] }
  0x46   : > { %8410 = vmatmul.mubr.msk.f32.gmra.mrb[2].mxu0 %vm362_vm1, %v9876_v38  ;;  %v10004_v12 = vld [vmem:[#allocation2 + $0x91] sm:$0xff]  ;;  %v10016_v15 = vld [vmem:[#allocation2 + $0x99] sm:$0xff]  ;;  %v10020_v16 = vld [vmem:[#allocation2 + $0xa9] sm:$0xff] }
  0x47   : > { %8412 = vmatprep.mubr.msk.f32.mxu0 %vm362_vm1, %v9900_v48  ;;  %v10026_v17 = vld [vmem:[#allocation2 + $0xf8] sm:$0xff]  ;;  %v10030_v18 = vld [vmem:[#allocation2 + $0x108] sm:$0xff]  ;;  %v10042_v21 = vld [vmem:[#allocation2 + $0x110] sm:$0xff] }
  0x48   : > { %8266 = vmatmul.mubr.msk.f32.gmra.mrb[6].mxu1 %vm362_vm1, %v9961_v2  ;;  %v10032_v19 = vld [vmem:[#allocation2 + $0xb1] sm:$0xff]  ;;  %v10036_v20 = vld [vmem:[#allocation2 + $0xc1] sm:$0xff]  ;;  %v10048_v23 = vld [vmem:[#allocation2 + $0xc9] sm:$0xff] }
  0x49   : > { %8268 = vmatprep.mubr.msk.f32.mxu1 %vm362_vm1, %v9965_v3  ;;  %v10046_v22 = vld [vmem:[#allocation2 + $0x120] sm:$0xff]  ;;  %v10058_v25 = vld [vmem:[#allocation2 + $0x128] sm:$0xff]  ;;  %v10062_v26 = vld [vmem:[#allocation2 + $0x138] sm:$0xff] }
  0x4a   : > { %8413 = vmatmul.mubr.msk.f32.gmra.mrb[4].mxu0 %vm362_vm1, %v9911_v49  ;;  %v10052_v24 = vld [vmem:[#allocation2 + $0xd9] sm:$0xff]  ;;  %v10064_v27 = vld [vmem:[#allocation2 + $0xe1] sm:$0xff]  ;;  %v10068_v28 = vld [vmem:[#allocation2 + $0xf1] sm:$0xff] }
  0x4b   : > { %8415 = vmatprep.mubr.msk.f32.mxu0 %vm362_vm1, %v9913_v50  ;;  %v10074_v36 = vld [vmem:[#allocation2 + $0x140] sm:$0xff]  ;;  %v10078_v39 = vld [vmem:[#allocation2 + $0x150] sm:$0xff]  ;;  %v10090_v42 = vld [vmem:[#allocation2 + $0x158] sm:$0xff] }
  0x4c   : > { %8269 = vmatmul.mubr.msk.f32.gmra.mrb[8].mxu1 %vm362_vm1, %v9981_v7  ;;  %v10080_v40 = vld [vmem:[#allocation2 + $0xf9] sm:$0xff]  ;;  %v10084_v41 = vld [vmem:[#allocation2 + $0x109] sm:$0xff]  ;;  %v10096_v44 = vld [vmem:[#allocation2 + $0x111] sm:$0xff] }
  0x4d   : > { %8271 = vmatprep.mubr.msk.f32.mxu1 %vm362_vm1, %v9986_v8  ;;  %v10094_v43 = vld [vmem:[#allocation2 + $0x168] sm:$0xff]  ;;  %v10106_v46 = vld [vmem:[#allocation2 + $0x170] sm:$0xff]  ;;  %v10110_v47 = vld [vmem:[#allocation2 + $0x180] sm:$0xff] }
  0x4e   : > { %8416 = vmatmul.mubr.msk.f32.gmra.mrb[6].mxu0 %vm362_vm1, %v9923_v54  ;;  %11435 = vst [vmem:[#allocation14_spill] sm:$0xff] %v10094_v43  ;;  %v10100_v45 = vld [vmem:[#allocation2 + $0x121] sm:$0xff]  ;;  %11436 = vst [vmem:[#allocation15_spill] sm:$0xff] %v10106_v46  ;;  %v10112_v51 = vld [vmem:[#allocation2 + $0x129] sm:$0xff] }
  0x4f   : > { %8418 = vmatprep.mubr.msk.f32.mxu0 %vm362_vm1, %v9927_v55  ;;  %11437 = vst [vmem:[#allocation16_spill] sm:$0xff] %v10110_v47  ;;  %v10116_v52 = vld [vmem:[#allocation2 + $0x139] sm:$0xff]  ;;  %v10122_v4 = vld [vmem:[#allocation2 + $0x188] sm:$0xff]  ;;  %v10130_v32 = vld [vmem:[#allocation2 + $0x151] sm:$0xff] }
  0x50   : > { %8272 = vmatmul.mubr.msk.f32.gmra.mrb[10].mxu1 %vm362_vm1, %v10000_v11  ;;  %11438 = vst [vmem:[#allocation17_spill] sm:$0xff] %v10122_v4  ;;  %v10126_v1 = vld [vmem:[#allocation2 + $0x141] sm:$0xff] }
  0x51   : > { %8274 = vmatprep.mubr.msk.f32.mxu1 %vm362_vm1, %v10004_v12 }
  0x52   : > { %8419 = vmatmul.mubr.msk.f32.gmra.mrb[8].mxu0 %vm362_vm1, %v9939_v58 }
  0x53   : > { %8421 = vmatprep.mubr.msk.f32.mxu0 %vm362_vm1, %v9943_v59 }
  0x54   : > { %8275 = vmatmul.mubr.msk.f32.gmra.mrb[12].mxu1 %vm362_vm1, %v10016_v15 }
  0x55   : > { %8277 = vmatprep.mubr.msk.f32.mxu1 %vm362_vm1, %v10020_v16 }
  0x56   : > { %8422 = vmatmul.mubr.msk.f32.gmra.mrb[10].mxu0 %vm362_vm1, %v9955_v62 }
  0x57   : > { %8424 = vmatprep.mubr.msk.f32.mxu0 %vm362_vm1, %v9959_v63 }
  0x58   : > { %8278 = vmatmul.mubr.msk.f32.gmra.mrb[14].mxu1 %vm362_vm1, %v10032_v19 }
  0x59   : > { %8280 = vmatprep.mubr.msk.f32.mxu1 %vm362_vm1, %v10036_v20 }
  0x5a   : > { %8425 = vmatmul.mubr.msk.f32.gmra.mrb[12].mxu0 %vm362_vm1, %v9974_v5 }
  0x5b   : > { %8427 = vmatprep.mubr.msk.f32.mxu0 %vm362_vm1, %v9978_v6 }
  0x5c   : > { %8281 = vmatmul.mubr.msk.f32.gmra.mrb[16].mxu1 %vm362_vm1, %v10048_v23 }
  0x5d   : > { %8283 = vmatprep.mubr.msk.f32.mxu1 %vm362_vm1, %v10052_v24 }
  0x5e   : > { %8428 = vmatmul.mubr.msk.f32.gmra.mrb[14].mxu0 %vm362_vm1, %v9992_v9 }
  0x5f   : > { %8430 = vmatprep.mubr.msk.f32.mxu0 %vm362_vm1, %v9996_v10 }
  0x60   : > { %8284 = vmatmul.mubr.msk.f32.gmra.mrb[18].mxu1 %vm362_vm1, %v10064_v27 }
  0x61   : > { %8286 = vmatprep.mubr.msk.f32.mxu1 %vm362_vm1, %v10068_v28 }
  0x62   : > { %8431 = vmatmul.mubr.msk.f32.gmra.mrb[16].mxu0 %vm362_vm1, %v10010_v13 }
  0x63   : > { %8433 = vmatprep.mubr.msk.f32.mxu0 %vm362_vm1, %v10014_v14 }
  0x64   : > { %8287 = vmatmul.mubr.msk.f32.gmra.mrb[20].mxu1 %vm362_vm1, %v10080_v40 }
  0x65   : > { %8289 = vmatprep.mubr.msk.f32.mxu1 %vm362_vm1, %v10084_v41 }
  0x66   : > { %8434 = vmatmul.mubr.msk.f32.gmra.mrb[18].mxu0 %vm362_vm1, %v10026_v17 }
  0x67   : > { %8436 = vmatprep.mubr.msk.f32.mxu0 %vm362_vm1, %v10030_v18 }
  0x68   : > { %8290 = vmatmul.mubr.msk.f32.gmra.mrb[22].mxu1 %vm362_vm1, %v10096_v44 }
  0x69   : > { %8292 = vmatprep.mubr.msk.f32.mxu1 %vm362_vm1, %v10100_v45 }
  0x6a   : > { %8437 = vmatmul.mubr.msk.f32.gmra.mrb[20].mxu0 %vm362_vm1, %v10042_v21 }
  0x6b   : > { %8439 = vmatprep.mubr.msk.f32.mxu0 %vm362_vm1, %v10046_v22 }
  0x6c   : > { %8293 = vmatmul.mubr.msk.f32.gmra.mrb[24].mxu1 %vm362_vm1, %v10112_v51 }
  0x6d   : > { %8295 = vmatprep.mubr.msk.f32.mxu1 %vm362_vm1, %v10116_v52 }
  0x6e   : > { %8440 = vmatmul.mubr.msk.f32.gmra.mrb[22].mxu0 %vm362_vm1, %v10058_v25 }
  0x6f   : > { %8442 = vmatprep.mubr.msk.f32.mxu0 %vm362_vm1, %v10062_v26 }
  0x70   : > { %8296 = vmatmul.mubr.msk.f32.gmra.mrb[26].mxu1 %vm362_vm1, %v10126_v1 }
  0x71   : > { %8298 = vmatprep.mubr.msk.f32.mxu1 %vm362_vm1, %v10130_v32 }
  0x72   : > { %8443 = vmatmul.mubr.msk.f32.gmra.mrb[24].mxu0 %vm362_vm1, %v10074_v36 }
  0x73   : > { %8445 = vmatprep.mubr.msk.f32.mxu0 %vm362_vm1, %v10078_v39 }
  0x76   : > { %8446 = vmatmul.mubr.msk.f32.gmra.mrb[26].mxu0 %vm362_vm1, %v10090_v42 }
  0x77   : > { %8448 = vmatprep.mubr.msk.f32.mxu0 %vm362_vm1, %v10094_v43  ;;  %v10159_v43 = vld [vmem:[#allocation2 + $0x171] sm:$0xff] }
  0x7a   : > { %8449 = vmatmul.mubr.msk.f32.gmra.mrb[28].mxu0 %vm362_vm1, %v10106_v46  ;;  %v10143_v46 = vld [vmem:[%s11390_s1 + $0x18] sm:$0x7] }
  0x7b   : > { %8451 = vmatprep.mubr.msk.f32.mxu0 %vm362_vm1, %v10110_v47  ;;  %v10138_v47 = vld [vmem:[#allocation2 + $0x159] sm:$0xff] }
  0x7c   : > { %8299 = vmatmul.mubr.msk.f32.gmra.mrb[28].mxu1 %vm362_vm1, %v10138_v47 }
  0x7e   : > { %8452 = vmatmul.mubr.msk.f32.gmra.mrb[30].mxu0 %vm362_vm1, %v10122_v4  ;;  %v451_v4 = vld [vmem:[#allocation2] sm:$0xff] }
  0x7f   : > { %8456 = vmatprep.mubr.msk.f32.mxu0 %vm362_vm1, %v9918_v53  ;;  %v10153_v53 = vld [vmem:[#allocation2 + $0x169] sm:$0xff] }
  0x80   : > { %8301 = vmatprep.mubr.msk.f32.mxu1 %vm362_vm1, %v10153_v53 }
  0x81   : > { %8302 = vmatmul.mubr.msk.f32.gmra.mrb[30].mxu1 %vm362_vm1, %v10159_v43 }
  0x82   : > { %8457 = vmatmul.mubr.msk.f32.vlgmr.msra.gmra.mrb[0].mxu0 %vm362_vm1, %v9929_v56  ;;  %8306 = vmatprep.mubr.msk.f32.mxu1 %vm362_vm1, %v451_v4  ;;  %v11440_v56 = vld [vmem:[#allocation14_spill] sm:$0xff]  ;;  %v11441_v4 = vld [vmem:[#allocation13_spill] sm:$0xff] }
  0x83   : > { %8505 = vmatpush3.msk.msra.mxu0 %vm614_vm0, %v9874_v37  ;;  %8459 = vmatprep.mubr.msk.f32.mxu0 %vm362_vm1, %v9933_v57  ;;  %v452_v37 = vld [vmem:[#allocation2 + $0x8] sm:$0xff] }
  0x84   : > { %8554 = vmatprep.subr.msk.mxu0 %vm614_vm0, %v10143_v46 }
  0x85   : > { %8307 = vmatmul.mubr.msk.f32.vlgmr.msra.gmra.mrb[0].mxu1 %vm362_vm1, %v452_v37  ;;  %v10322_v37 = vld [vmem:[#allocation2 + $0x6a] sm:$0xff] }
  0x86   : > { %8460 = vmatmul.mubr.msk.f32.gmra.mrb[2].mxu0 %vm362_vm1, %v9945_v60  ;;  %8309 = vmatprep.mubr.msk.f32.mxu1 %vm362_vm1, %v9860_v33  ;;  %v10273_v33 = vld [vmem:[#allocation2 + $0x189] sm:$0xff] }
  0x87   : > { %8462 = vmatprep.mubr.msk.f32.mxu0 %vm362_vm1, %v9949_v61  ;;  %9074 = vmatpush3.msk.msra.mxu1 %vm614_vm0, %v9662_v0  ;;  %v10265_v0 = vld [vmem:[#allocation2 + $0x181] sm:$0xff] }
  0x89   : > { %8310 = vmatmul.mubr.msk.f32.gmra.mrb[2].mxu1 %vm362_vm1, %v9866_v34  ;;  %v10288_v34 = vld [vmem:[%s11390_s1 + $0x1c] sm:$0x7] }
  0x8a   : > { %8463 = vmatmul.mubr.msk.f32.gmra.mrb[4].mxu0 %vm362_vm1, %v9961_v2  ;;  %8312 = vmatprep.mubr.msk.f32.mxu1 %vm362_vm1, %v9868_v35 }
  0x8b   : > { %8465 = vmatprep.mubr.msk.f32.mxu0 %vm362_vm1, %v9965_v3 }
  0x8d   : > { %8313 = vmatmul.mubr.msk.f32.gmra.mrb[4].mxu1 %vm362_vm1, %v9876_v38 }
  0x8e   : > { %8466 = vmatmul.mubr.msk.f32.gmra.mrb[6].mxu0 %vm362_vm1, %v9981_v7  ;;  %8315 = vmatprep.mubr.msk.f32.mxu1 %vm362_vm1, %v9900_v48 }
  0x8f   : > { %8468 = vmatprep.mubr.msk.f32.mxu0 %vm362_vm1, %v9986_v8 }
  0x91   : > { %8316 = vmatmul.mubr.msk.f32.gmra.mrb[6].mxu1 %vm362_vm1, %v9911_v49 }
  0x92   : > { %8469 = vmatmul.mubr.msk.f32.gmra.mrb[8].mxu0 %vm362_vm1, %v10000_v11  ;;  %8318 = vmatprep.mubr.msk.f32.mxu1 %vm362_vm1, %v9913_v50 }
  0x93   : > { %8471 = vmatprep.mubr.msk.f32.mxu0 %vm362_vm1, %v10004_v12 }
  0x95   : > { %8319 = vmatmul.mubr.msk.f32.gmra.mrb[8].mxu1 %vm362_vm1, %v9923_v54 }
  0x96   : > { %8472 = vmatmul.mubr.msk.f32.gmra.mrb[10].mxu0 %vm362_vm1, %v10016_v15  ;;  %8321 = vmatprep.mubr.msk.f32.mxu1 %vm362_vm1, %v9927_v55 }
  0x97   : > { %8474 = vmatprep.mubr.msk.f32.mxu0 %vm362_vm1, %v10020_v16 }
  0x99   : > { %8322 = vmatmul.mubr.msk.f32.gmra.mrb[10].mxu1 %vm362_vm1, %v9939_v58 }
  0x9a   : > { %8475 = vmatmul.mubr.msk.f32.gmra.mrb[12].mxu0 %vm362_vm1, %v10032_v19  ;;  %8324 = vmatprep.mubr.msk.f32.mxu1 %vm362_vm1, %v9943_v59 }
  0x9b   : > { %8477 = vmatprep.mubr.msk.f32.mxu0 %vm362_vm1, %v10036_v20 }
  0x9d   : > { %8325 = vmatmul.mubr.msk.f32.gmra.mrb[12].mxu1 %vm362_vm1, %v9955_v62 }
  0x9e   : > { %8478 = vmatmul.mubr.msk.f32.gmra.mrb[14].mxu0 %vm362_vm1, %v10048_v23  ;;  %8327 = vmatprep.mubr.msk.f32.mxu1 %vm362_vm1, %v9959_v63 }
  0x9f   : > { %8480 = vmatprep.mubr.msk.f32.mxu0 %vm362_vm1, %v10052_v24 }
  0xa1   : > { %8328 = vmatmul.mubr.msk.f32.gmra.mrb[14].mxu1 %vm362_vm1, %v9974_v5 }
  0xa2   : > { %8481 = vmatmul.mubr.msk.f32.gmra.mrb[16].mxu0 %vm362_vm1, %v10064_v27  ;;  %8330 = vmatprep.mubr.msk.f32.mxu1 %vm362_vm1, %v9978_v6 }
  0xa3   : > { %8483 = vmatprep.mubr.msk.f32.mxu0 %vm362_vm1, %v10068_v28 }
  0xa5   : > { %8331 = vmatmul.mubr.msk.f32.gmra.mrb[16].mxu1 %vm362_vm1, %v9992_v9 }
  0xa6   : > { %8484 = vmatmul.mubr.msk.f32.gmra.mrb[18].mxu0 %vm362_vm1, %v10080_v40  ;;  %8333 = vmatprep.mubr.msk.f32.mxu1 %vm362_vm1, %v9996_v10 }
  0xa7   : > { %8486 = vmatprep.mubr.msk.f32.mxu0 %vm362_vm1, %v10084_v41 }
  0xa9   : > { %8334 = vmatmul.mubr.msk.f32.gmra.mrb[18].mxu1 %vm362_vm1, %v10010_v13 }
  0xaa   : > { %8487 = vmatmul.mubr.msk.f32.gmra.mrb[20].mxu0 %vm362_vm1, %v10096_v44  ;;  %8336 = vmatprep.mubr.msk.f32.mxu1 %vm362_vm1, %v10014_v14 }
  0xab   : > { %8489 = vmatprep.mubr.msk.f32.mxu0 %vm362_vm1, %v10100_v45 }
  0xad   : > { %8337 = vmatmul.mubr.msk.f32.gmra.mrb[20].mxu1 %vm362_vm1, %v10026_v17 }
  0xae   : > { %8490 = vmatmul.mubr.msk.f32.gmra.mrb[22].mxu0 %vm362_vm1, %v10112_v51  ;;  %8339 = vmatprep.mubr.msk.f32.mxu1 %vm362_vm1, %v10030_v18 }
  0xaf   : > { %8492 = vmatprep.mubr.msk.f32.mxu0 %vm362_vm1, %v10116_v52 }
  0xb1   : > { %8340 = vmatmul.mubr.msk.f32.gmra.mrb[22].mxu1 %vm362_vm1, %v10042_v21 }
  0xb2   : > { %8493 = vmatmul.mubr.msk.f32.gmra.mrb[24].mxu0 %vm362_vm1, %v10126_v1  ;;  %8342 = vmatprep.mubr.msk.f32.mxu1 %vm362_vm1, %v10046_v22 }
  0xb3   : > { %8495 = vmatprep.mubr.msk.f32.mxu0 %vm362_vm1, %v10130_v32 }
  0xb5   : > { %8343 = vmatmul.mubr.msk.f32.gmra.mrb[24].mxu1 %vm362_vm1, %v10058_v25 }
  0xb6   : > { %8496 = vmatmul.mubr.msk.f32.gmra.mrb[26].mxu0 %vm362_vm1, %v10138_v47  ;;  %8345 = vmatprep.mubr.msk.f32.mxu1 %vm362_vm1, %v10062_v26 }
  0xb7   : > { %8498 = vmatprep.mubr.msk.f32.mxu0 %vm362_vm1, %v10153_v53 }
  0xb9   : > { %8346 = vmatmul.mubr.msk.f32.gmra.mrb[26].mxu1 %vm362_vm1, %v10074_v36 }
  0xba   : > { %8499 = vmatmul.mubr.msk.f32.gmra.mrb[28].mxu0 %vm362_vm1, %v10159_v43  ;;  %8348 = vmatprep.mubr.msk.f32.mxu1 %vm362_vm1, %v10078_v39 }
  0xbb   : > { %8501 = vmatprep.mubr.msk.f32.mxu0 %vm362_vm1, %v10265_v0 }
  0xbd   : > { %8349 = vmatmul.mubr.msk.f32.gmra.mrb[28].mxu1 %vm362_vm1, %v10090_v42 }
  0xbe   : > { %8502 = vmatmul.mubr.msk.f32.gmra.mrb[30].mxu0 %vm362_vm1, %v10273_v33  ;;  %8351 = vmatprep.mubr.msk.f32.mxu1 %vm362_vm1, %v11440_v56 }
  0xbf   : > { %8506 = vmatprep.mubr.msk.f32.mxu0 %vm362_vm1, %v9843_v29  ;;  %v10298_v29 = vld [vmem:[#allocation2 + $0x4a] sm:$0xff] }
  0xc0   : > { %11439 = vst [vmem:[#allocation18_spill] sm:$0xff] %v10298_v29 }
  0xc2   : > { %8507 = vmatmul.mubr.msk.f32.vlgmr.msra.gmra.mrb[0].mxu0 %vm362_vm1, %v9845_v30  ;;  %v11442_v30 = vld [vmem:[#allocation15_spill] sm:$0xff] }
  0xc3   : > { %8555 = vmatpush3.msk.msra.mxu0 %vm614_vm0, %v10143_v46  ;;  %8509 = vmatprep.mubr.msk.f32.mxu0 %vm362_vm1, %v9852_v31  ;;  %v10310_v46 = vld [vmem:[#allocation2 + $0x52] sm:$0xff]  ;;  %v10314_v31 = vld [vmem:[#allocation2 + $0x62] sm:$0xff]  ;;  %11445 = vst [vmem:[#allocation15_spill] sm:$0xff] %v10322_v37 }
  0xc4   : > { %8604 = vmatprep.subr.msk.mxu0 %vm614_vm0, %v10288_v34  ;;  %8352 = vmatmul.mubr.msk.f32.gmra.mrb[30].mxu1 %vm362_vm1, %v11442_v30  ;;  %11443 = vst [vmem:[#allocation14_spill] sm:$0xff] %v10310_v46  ;;  %11444 = vst [vmem:[#allocation13_spill] sm:$0xff] %v10314_v31 }
  0xc5   : > { %8365 = vmatprep.mubr.msk.f32.mxu1 %vm362_vm1, %v10298_v29 }
  0xc6   : > { %8510 = vmatmul.mubr.msk.f32.gmra.mrb[2].mxu0 %vm362_vm1, %v11441_v4  ;;  %v10326_v4 = vld [vmem:[#allocation2 + $0x7a] sm:$0xff] }
  0xc7   : > { %8512 = vmatprep.mubr.msk.f32.mxu0 %vm362_vm1, %v10298_v29  ;;  %11446 = vst [vmem:[#allocation19_spill] sm:$0xff] %v10326_v4  ;;  %v10338_v29 = vld [vmem:[#allocation2 + $0x92] sm:$0xff] }
  0xc8   : > { %8366 = vmatmul.mubr.msk.f32.vlgmr.msra.gmra.mrb[6].mxu1 %vm362_vm1, %v10310_v46  ;;  %11448 = vst [vmem:[#allocation21_spill] sm:$0xff] %v10338_v29 }
  0xc9   : > { %8368 = vmatprep.mubr.msk.f32.mxu1 %vm362_vm1, %v10314_v31 }
  0xca   : > { %8513 = vmatmul.mubr.msk.f32.gmra.mrb[4].mxu0 %vm362_vm1, %v10310_v46  ;;  %v10334_v46 = vld [vmem:[#allocation2 + $0x82] sm:$0xff] }
  0xcb   : > { %8515 = vmatprep.mubr.msk.f32.mxu0 %vm362_vm1, %v10314_v31  ;;  %11447 = vst [vmem:[#allocation20_spill] sm:$0xff] %v10334_v46  ;;  %v10350_v31 = vld [vmem:[#allocation2 + $0xaa] sm:$0xff] }
  0xcc   : > { %8369 = vmatmul.mubr.msk.f32.gmra.mrb[8].mxu1 %vm362_vm1, %v10322_v37  ;;  %11450 = vst [vmem:[#allocation23_spill] sm:$0xff] %v10350_v31 }
  0xcd   : > { %8371 = vmatprep.mubr.msk.f32.mxu1 %vm362_vm1, %v10326_v4 }
  0xce   : > { %8516 = vmatmul.mubr.msk.f32.gmra.mrb[6].mxu0 %vm362_vm1, %v10322_v37  ;;  %v10346_v37 = vld [vmem:[#allocation2 + $0x9a] sm:$0xff] }
  0xcf   : > { %8518 = vmatprep.mubr.msk.f32.mxu0 %vm362_vm1, %v10326_v4  ;;  %11449 = vst [vmem:[#allocation22_spill] sm:$0xff] %v10346_v37  ;;  %v10362_v4 = vld [vmem:[#allocation2 + $0xc2] sm:$0xff] }
  0xd0   : > { %8372 = vmatmul.mubr.msk.f32.gmra.mrb[10].mxu1 %vm362_vm1, %v10334_v46  ;;  %11452 = vst [vmem:[#allocation25_spill] sm:$0xff] %v10362_v4 }
  0xd1   : > { %8374 = vmatprep.mubr.msk.f32.mxu1 %vm362_vm1, %v10338_v29 }
  0xd2   : > { %8519 = vmatmul.mubr.msk.f32.gmra.mrb[8].mxu0 %vm362_vm1, %v10334_v46  ;;  %v10358_v46 = vld [vmem:[#allocation2 + $0xb2] sm:$0xff] }
  0xd3   : > { %8521 = vmatprep.mubr.msk.f32.mxu0 %vm362_vm1, %v10338_v29  ;;  %11451 = vst [vmem:[#allocation24_spill] sm:$0xff] %v10358_v46  ;;  %v10374_v29 = vld [vmem:[#allocation2 + $0xda] sm:$0xff] }
  0xd4   : > { %8375 = vmatmul.mubr.msk.f32.gmra.mrb[12].mxu1 %vm362_vm1, %v10346_v37  ;;  %11454 = vst [vmem:[#allocation27_spill] sm:$0xff] %v10374_v29 }
  0xd5   : > { %8377 = vmatprep.mubr.msk.f32.mxu1 %vm362_vm1, %v10350_v31 }
  0xd6   : > { %8522 = vmatmul.mubr.msk.f32.gmra.mrb[10].mxu0 %vm362_vm1, %v10346_v37  ;;  %v10370_v37 = vld [vmem:[#allocation2 + $0xca] sm:$0xff] }
  0xd7   : > { %8524 = vmatprep.mubr.msk.f32.mxu0 %vm362_vm1, %v10350_v31  ;;  %11453 = vst [vmem:[#allocation26_spill] sm:$0xff] %v10370_v37  ;;  %v10386_v31 = vld [vmem:[#allocation2 + $0xf2] sm:$0xff] }
  0xd8   : > { %8378 = vmatmul.mubr.msk.f32.gmra.mrb[14].mxu1 %vm362_vm1, %v10358_v46  ;;  %11456 = vst [vmem:[#allocation29_spill] sm:$0xff] %v10386_v31 }
  0xd9   : > { %8380 = vmatprep.mubr.msk.f32.mxu1 %vm362_vm1, %v10362_v4 }
  0xda   : > { %8525 = vmatmul.mubr.msk.f32.gmra.mrb[12].mxu0 %vm362_vm1, %v10358_v46  ;;  %v10382_v46 = vld [vmem:[#allocation2 + $0xe2] sm:$0xff] }
  0xdb   : > { %8527 = vmatprep.mubr.msk.f32.mxu0 %vm362_vm1, %v10362_v4  ;;  %11455 = vst [vmem:[#allocation28_spill] sm:$0xff] %v10382_v46  ;;  %v10398_v4 = vld [vmem:[#allocation2 + $0x10a] sm:$0xff] }
  0xdc   : > { %8381 = vmatmul.mubr.msk.f32.gmra.mrb[16].mxu1 %vm362_vm1, %v10370_v37  ;;  %11458 = vst [vmem:[#allocation31_spill] sm:$0xff] %v10398_v4 }
  0xdd   : > { %8383 = vmatprep.mubr.msk.f32.mxu1 %vm362_vm1, %v10374_v29 }
  0xde   : > { %8528 = vmatmul.mubr.msk.f32.gmra.mrb[14].mxu0 %vm362_vm1, %v10370_v37  ;;  %v10394_v37 = vld [vmem:[#allocation2 + $0xfa] sm:$0xff] }
  0xdf   : > { %8530 = vmatprep.mubr.msk.f32.mxu0 %vm362_vm1, %v10374_v29  ;;  %11457 = vst [vmem:[#allocation30_spill] sm:$0xff] %v10394_v37  ;;  %v10410_v29 = vld [vmem:[#allocation2 + $0x122] sm:$0xff] }
  0xe0   : > { %8384 = vmatmul.mubr.msk.f32.gmra.mrb[18].mxu1 %vm362_vm1, %v10382_v46  ;;  %11460 = vst [vmem:[#allocation33_spill] sm:$0xff] %v10410_v29 }
  0xe1   : > { %8386 = vmatprep.mubr.msk.f32.mxu1 %vm362_vm1, %v10386_v31 }
  0xe2   : > { %8531 = vmatmul.mubr.msk.f32.gmra.mrb[16].mxu0 %vm362_vm1, %v10382_v46  ;;  %v10406_v46 = vld [vmem:[#allocation2 + $0x112] sm:$0xff] }
  0xe3   : > { %8533 = vmatprep.mubr.msk.f32.mxu0 %vm362_vm1, %v10386_v31  ;;  %11459 = vst [vmem:[#allocation32_spill] sm:$0xff] %v10406_v46  ;;  %v10422_v31 = vld [vmem:[#allocation2 + $0x13a] sm:$0xff] }
  0xe4   : > { %8387 = vmatmul.mubr.msk.f32.gmra.mrb[20].mxu1 %vm362_vm1, %v10394_v37  ;;  %11462 = vst [vmem:[#allocation35_spill] sm:$0xff] %v10422_v31 }
  0xe5   : > { %8389 = vmatprep.mubr.msk.f32.mxu1 %vm362_vm1, %v10398_v4 }
  0xe6   : > { %8534 = vmatmul.mubr.msk.f32.gmra.mrb[18].mxu0 %vm362_vm1, %v10394_v37  ;;  %v10418_v37 = vld [vmem:[#allocation2 + $0x12a] sm:$0xff] }
  0xe7   : > { %8536 = vmatprep.mubr.msk.f32.mxu0 %vm362_vm1, %v10398_v4  ;;  %11461 = vst [vmem:[#allocation34_spill] sm:$0xff] %v10418_v37  ;;  %v10434_v4 = vld [vmem:[#allocation2 + $0x152] sm:$0xff] }
  0xe8   : > { %8390 = vmatmul.mubr.msk.f32.gmra.mrb[22].mxu1 %vm362_vm1, %v10406_v46 }
  0xe9   : > { %8392 = vmatprep.mubr.msk.f32.mxu1 %vm362_vm1, %v10410_v29 }
  0xea   : > { %8537 = vmatmul.mubr.msk.f32.gmra.mrb[20].mxu0 %vm362_vm1, %v10406_v46  ;;  %v10430_v46 = vld [vmem:[#allocation2 + $0x142] sm:$0xff] }
  0xeb   : > { %8539 = vmatprep.mubr.msk.f32.mxu0 %vm362_vm1, %v10410_v29  ;;  %11463 = vst [vmem:[#allocation36_spill] sm:$0xff] %v10430_v46  ;;  %v10446_v29 = vld [vmem:[#allocation2 + $0x16a] sm:$0xff] }
  0xec   : > { %8393 = vmatmul.mubr.msk.f32.gmra.mrb[24].mxu1 %vm362_vm1, %v10418_v37  ;;  %11465 = vst [vmem:[#allocation38_spill] sm:$0xff] %v10446_v29 }
  0xed   : > { %8395 = vmatprep.mubr.msk.f32.mxu1 %vm362_vm1, %v10422_v31 }
  0xee   : > { %8540 = vmatmul.mubr.msk.f32.gmra.mrb[22].mxu0 %vm362_vm1, %v10418_v37  ;;  %v10442_v37 = vld [vmem:[#allocation2 + $0x15a] sm:$0xff] }
  0xef   : > { %8542 = vmatprep.mubr.msk.f32.mxu0 %vm362_vm1, %v10422_v31  ;;  %11464 = vst [vmem:[#allocation37_spill] sm:$0xff] %v10442_v37  ;;  %v10458_v31 = vld [vmem:[#allocation2 + $0x182] sm:$0xff] }
  0xf0   : > { %8396 = vmatmul.mubr.msk.f32.gmra.mrb[26].mxu1 %vm362_vm1, %v10430_v46 }
  0xf1   : > { %8398 = vmatprep.mubr.msk.f32.mxu1 %vm362_vm1, %v10434_v4 }
  0xf2   : > { %8543 = vmatmul.mubr.msk.f32.gmra.mrb[24].mxu0 %vm362_vm1, %v10430_v46  ;;  %v10454_v46 = vld [vmem:[#allocation2 + $0x172] sm:$0xff] }
  0xf3   : > { %8545 = vmatprep.mubr.msk.f32.mxu0 %vm362_vm1, %v10434_v4 }
  0xf4   : > { %8399 = vmatmul.mubr.msk.f32.gmra.mrb[28].mxu1 %vm362_vm1, %v10442_v37 }
  0xf5   : > { %8401 = vmatprep.mubr.msk.f32.mxu1 %vm362_vm1, %v10446_v29 }
  0xf6   : > { %8546 = vmatmul.mubr.msk.f32.gmra.mrb[26].mxu0 %vm362_vm1, %v10442_v37  ;;  %v10466_v37 = vld [vmem:[#allocation2 + $0x18a] sm:$0xff] }
  0xf7   : > { %8548 = vmatprep.mubr.msk.f32.mxu0 %vm362_vm1, %v10446_v29  ;;  %v7615_v29 = vld [vmem:[%s11390_s1 + $0x20] sm:$0x7] }
  0xf8   : > { %8402 = vmatmul.mubr.msk.f32.gmra.mrb[30].mxu1 %vm362_vm1, %v10454_v46 }
  0xfa   : > { %8549 = vmatmul.mubr.msk.f32.gmra.mrb[28].mxu0 %vm362_vm1, %v10454_v46 }
  0xfb   : > { %8551 = vmatprep.mubr.msk.f32.mxu0 %vm362_vm1, %v10458_v31 }
  0xfe   : > { %8552 = vmatmul.mubr.msk.f32.gmra.mrb[30].mxu0 %vm362_vm1, %v10466_v37 }
  0xff   : > { %8556 = vmatprep.mubr.msk.f32.mxu0 %vm362_vm1, %v9868_v35  ;;  %v11466_v35 = vld [vmem:[#allocation16_spill] sm:$0xff] }
 0x102   : > { %8557 = vmatmul.mubr.msk.f32.vlgmr.msra.gmra.mrb[0].mxu0 %vm362_vm1, %v9876_v38  ;;  %v2758_v38 = vld [vmem:[#allocation2 + $0x198] sm:$0xff] }
 0x103   : > { %8605 = vmatpush3.msk.msra.mxu0 %vm614_vm0, %v10288_v34  ;;  %8559 = vmatprep.mubr.msk.f32.mxu0 %vm362_vm1, %v9900_v48  ;;  %v11467_v48 = vld [vmem:[#allocation17_spill] sm:$0xff] }
 0x104   : > { %8654 = vmatprep.subr.msk.mxu0 %vm614_vm0, %v7615_v29 }
 0x106   : > { %8560 = vmatmul.mubr.msk.f32.gmra.mrb[2].mxu0 %vm362_vm1, %v9911_v49  ;;  %v2759_v49 = vld [vmem:[#allocation2 + $0x1a0] sm:$0xff] }
 0x107   : > { %8562 = vmatprep.mubr.msk.f32.mxu0 %vm362_vm1, %v9913_v50 }
 0x10a   : > { %8563 = vmatmul.mubr.msk.f32.gmra.mrb[4].mxu0 %vm362_vm1, %v9923_v54 }
 0x10b   : > { %8565 = vmatprep.mubr.msk.f32.mxu0 %vm362_vm1, %v9927_v55 }
 0x10e   : > { %8566 = vmatmul.mubr.msk.f32.gmra.mrb[6].mxu0 %vm362_vm1, %v9939_v58 }
 0x10f   : > { %8568 = vmatprep.mubr.msk.f32.mxu0 %vm362_vm1, %v9943_v59 }
 0x112   : > { %8569 = vmatmul.mubr.msk.f32.gmra.mrb[8].mxu0 %vm362_vm1, %v9955_v62  ;;  %v11468_v62 = vld [vmem:[#allocation18_spill] sm:$0xff] }
 0x113   : > { %8571 = vmatprep.mubr.msk.f32.mxu0 %vm362_vm1, %v9959_v63  ;;  %v11469_v63 = vld [vmem:[#allocation14_spill] sm:$0xff] }
 0x116   : > { %8572 = vmatmul.mubr.msk.f32.gmra.mrb[10].mxu0 %vm362_vm1, %v9974_v5  ;;  %v11472_v5 = vld [vmem:[#allocation19_spill] sm:$0xff] }
 0x117   : > { %8574 = vmatprep.mubr.msk.f32.mxu0 %vm362_vm1, %v9978_v6  ;;  %v11473_v6 = vld [vmem:[#allocation20_spill] sm:$0xff] }
 0x11a   : > { %8575 = vmatmul.mubr.msk.f32.gmra.mrb[12].mxu0 %vm362_vm1, %v9992_v9  ;;  %v11476_v9 = vld [vmem:[#allocation23_spill] sm:$0xff] }
 0x11b   : > { %8577 = vmatprep.mubr.msk.f32.mxu0 %vm362_vm1, %v9996_v10  ;;  %v11477_v10 = vld [vmem:[#allocation24_spill] sm:$0xff] }
 0x11e   : > { %8578 = vmatmul.mubr.msk.f32.gmra.mrb[14].mxu0 %vm362_vm1, %v10010_v13  ;;  %v11480_v13 = vld [vmem:[#allocation27_spill] sm:$0xff] }
 0x11f   : > { %8580 = vmatprep.mubr.msk.f32.mxu0 %vm362_vm1, %v10014_v14 }
 0x122   : > { %8581 = vmatmul.mubr.msk.f32.gmra.mrb[16].mxu0 %vm362_vm1, %v10026_v17  ;;  %v11482_v17 = vld [vmem:[#allocation29_spill] sm:$0xff] }
 0x123   : > { %8583 = vmatprep.mubr.msk.f32.mxu0 %vm362_vm1, %v10030_v18 }
 0x126   : > { %8584 = vmatmul.mubr.msk.f32.gmra.mrb[18].mxu0 %vm362_vm1, %v10042_v21  ;;  %v11484_v21 = vld [vmem:[#allocation31_spill] sm:$0xff] }
 0x127   : > { %8586 = vmatprep.mubr.msk.f32.mxu0 %vm362_vm1, %v10046_v22 }
 0x12a   : > { %8587 = vmatmul.mubr.msk.f32.gmra.mrb[20].mxu0 %vm362_vm1, %v10058_v25  ;;  %v11486_v25 = vld [vmem:[#allocation33_spill] sm:$0xff] }
 0x12b   : > { %8589 = vmatprep.mubr.msk.f32.mxu0 %vm362_vm1, %v10062_v26 }
 0x12e   : > { %8590 = vmatmul.mubr.msk.f32.gmra.mrb[22].mxu0 %vm362_vm1, %v10074_v36  ;;  %v11488_v36 = vld [vmem:[#allocation35_spill] sm:$0xff] }
 0x12f   : > { %8592 = vmatprep.mubr.msk.f32.mxu0 %vm362_vm1, %v10078_v39 }
 0x132   : > { %8593 = vmatmul.mubr.msk.f32.gmra.mrb[24].mxu0 %vm362_vm1, %v10090_v42 }
 0x133   : > { %8595 = vmatprep.mubr.msk.f32.mxu0 %vm362_vm1, %v11440_v56 }
 0x136   : > { %8596 = vmatmul.mubr.msk.f32.gmra.mrb[26].mxu0 %vm362_vm1, %v11442_v30 }
 0x137   : > { %8598 = vmatprep.mubr.msk.f32.mxu0 %vm362_vm1, %v11466_v35 }
 0x13a   : > { %8599 = vmatmul.mubr.msk.f32.gmra.mrb[28].mxu0 %vm362_vm1, %v11467_v48  ;;  %v11492_v48 = vmov 0.0  }
 0x13b   : > { %8601 = vmatprep.mubr.msk.f32.mxu0 %vm362_vm1, %v2758_v38  ;;  %4105 = vst.msk [vmem:[#allocation4] sm:$0xff] %vm3969_vm3, %v11492_v48  ;;  %4108 = vst.msk [vmem:[#allocation4 + $0x10] sm:$0xff] %vm3969_vm3, %v11492_v48 }
 0x13c   : > { %4110 = vst.msk [vmem:[#allocation4 + $0x20] sm:$0xff] %vm3969_vm3, %v11492_v48  ;;  %4112 = vst.msk [vmem:[#allocation4 + $0x30] sm:$0xff] %vm3969_vm3, %v11492_v48 }
 0x13d   : > { %4114 = vst.msk [vmem:[#allocation4 + $0x40] sm:$0xff] %vm3969_vm3, %v11492_v48  ;;  %4116 = vst.msk [vmem:[#allocation4 + $0x50] sm:$0xff] %vm3969_vm3, %v11492_v48 }
 0x13e   : > { %8602 = vmatmul.mubr.msk.f32.gmra.mrb[30].mxu0 %vm362_vm1, %v2759_v49  ;;  %4118 = vst.msk [vmem:[#allocation4 + $0x60] sm:$0xff] %vm3969_vm3, %v11492_v48  ;;  %4120 = vst.msk [vmem:[#allocation4 + $0x70] sm:$0xff] %vm3969_vm3, %v11492_v48  ;;  %v7650_v49 = vld [vmem:[%s11392_s3 + $0x10] sm:$0xff] }
 0x13f   : > { %8606 = vmatprep.mubr.msk.f32.mxu0 %vm362_vm1, %v9933_v57  ;;  %4122 = vst.msk [vmem:[#allocation4 + $0x80] sm:$0xff] %vm3969_vm3, %v11492_v48  ;;  %4124 = vst.msk [vmem:[#allocation4 + $0x90] sm:$0xff] %vm3969_vm3, %v11492_v48 }
 0x140   : > { %4107 = vst.msk [vmem:[#allocation4 + $0x8] sm:$0x3] %vm4106_vm4, %v11492_v48  ;;  %4109 = vst.msk [vmem:[#allocation4 + $0x18] sm:$0x3] %vm4106_vm4, %v11492_v48 }
 0x141   : > { %4111 = vst.msk [vmem:[#allocation4 + $0x28] sm:$0x3] %vm4106_vm4, %v11492_v48  ;;  %4113 = vst.msk [vmem:[#allocation4 + $0x38] sm:$0x3] %vm4106_vm4, %v11492_v48 }
 0x142   : > { %8607 = vmatmul.mubr.msk.f32.vlgmr.msra.gmra.mrb[0].mxu0 %vm362_vm1, %v9945_v60  ;;  %v3148_v60 = vld [vmem:[#allocation2 + $0x199] sm:$0xff]  ;;  %4115 = vst.msk [vmem:[#allocation4 + $0x48] sm:$0x3] %vm4106_vm4, %v11492_v48  ;;  %4117 = vst.msk [vmem:[#allocation4 + $0x58] sm:$0x3] %vm4106_vm4, %v11492_v48 }
 0x143   : > { %8655 = vmatpush3.msk.msra.mxu0 %vm614_vm0, %v7615_v29  ;;  %8609 = vmatprep.mubr.msk.f32.mxu0 %vm362_vm1, %v9949_v61  ;;  %v3509_v61 = vld [vmem:[#allocation2 + $0x3a] sm:$0xff]  ;;  %4119 = vst.msk [vmem:[#allocation4 + $0x68] sm:$0x3] %vm4106_vm4, %v11492_v48  ;;  %4121 = vst.msk [vmem:[#allocation4 + $0x78] sm:$0x3] %vm4106_vm4, %v11492_v48 }
 0x144   : > { %4123 = vst.msk [vmem:[#allocation4 + $0x88] sm:$0x3] %vm4106_vm4, %v11492_v48  ;;  %4125 = vst.msk [vmem:[#allocation4 + $0x98] sm:$0x3] %vm4106_vm4, %v11492_v48 }
 0x145   : > { %6425 = vst.msk [vmem:[#allocation8] sm:$0xf] %vm5513_vm5, %v11492_v48  ;;  %6426 = vst.msk [vmem:[#allocation8 + $0x4] sm:$0xf] %vm5513_vm5, %v11492_v48 }
 0x146   : > { %8610 = vmatmul.mubr.msk.f32.gmra.mrb[2].mxu0 %vm362_vm1, %v9961_v2  ;;  %v11470_v2 = vld [vmem:[#allocation13_spill] sm:$0xff]  ;;  %6427 = vst.msk [vmem:[#allocation8 + $0x8] sm:$0xf] %vm5513_vm5, %v11492_v48  ;;  %6428 = vst.msk [vmem:[#allocation8 + $0xc] sm:$0xf] %vm5513_vm5, %v11492_v48 }
 0x147   : > { %8612 = vmatprep.mubr.msk.f32.mxu0 %vm362_vm1, %v9965_v3  ;;  %v11471_v3 = vld [vmem:[#allocation15_spill] sm:$0xff]  ;;  %5529 = vst.msk [vmem:[#allocation6 + $0x10] sm:$0x3f] %vm5526_vm6, %v11492_v48  ;;  %5527 = vst.msk [vmem:[#allocation6] sm:$0x3f] %vm5526_vm6, %v11492_v48 }
 0x148   : > { %5528 = vst.msk [vmem:[#allocation6 + $0x8] sm:$0x3f] %vm5526_vm6, %v11492_v48  ;;  %5530 = vst.msk [vmem:[#allocation6 + $0x18] sm:$0x3f] %vm5526_vm6, %v11492_v48 }
 0x149   : > { %5531 = vst.msk [vmem:[#allocation6 + $0x20] sm:$0x3f] %vm5526_vm6, %v11492_v48  ;;  %5532 = vst.msk [vmem:[#allocation6 + $0x28] sm:$0x3f] %vm5526_vm6, %v11492_v48 }
 0x14a   : > { %8613 = vmatmul.mubr.msk.f32.gmra.mrb[4].mxu0 %vm362_vm1, %v9981_v7  ;;  %v11474_v7 = vld [vmem:[#allocation21_spill] sm:$0xff] }
 0x14b   : > { %8615 = vmatprep.mubr.msk.f32.mxu0 %vm362_vm1, %v9986_v8  ;;  %v11475_v8 = vld [vmem:[#allocation22_spill] sm:$0xff] }
 0x14e   : > { %8616 = vmatmul.mubr.msk.f32.gmra.mrb[6].mxu0 %vm362_vm1, %v10000_v11  ;;  %v11478_v11 = vld [vmem:[#allocation25_spill] sm:$0xff] }
 0x14f   : > { %8618 = vmatprep.mubr.msk.f32.mxu0 %vm362_vm1, %v10004_v12  ;;  %v11479_v12 = vld [vmem:[#allocation26_spill] sm:$0xff] }
 0x152   : > { %8619 = vmatmul.mubr.msk.f32.gmra.mrb[8].mxu0 %vm362_vm1, %v10016_v15  ;;  %v11481_v15 = vld [vmem:[#allocation28_spill] sm:$0xff] }
 0x153   : > { %8621 = vmatprep.mubr.msk.f32.mxu0 %vm362_vm1, %v10020_v16 }
 0x156   : > { %8622 = vmatmul.mubr.msk.f32.gmra.mrb[10].mxu0 %vm362_vm1, %v10032_v19  ;;  %v11483_v19 = vld [vmem:[#allocation30_spill] sm:$0xff] }
 0x157   : > { %8624 = vmatprep.mubr.msk.f32.mxu0 %vm362_vm1, %v10036_v20 }
 0x158   : > { %v10569_v50 = vpop.f32.mrb[0].mxu1 }
 0x159   : > { %v10573_v54 = vpop.f32.mrb[1].mxu1 }
 0x15a   : > { %8625 = vmatmul.mubr.msk.f32.gmra.mrb[12].mxu0 %vm362_vm1, %v10048_v23  ;;  %v11485_v23 = vld [vmem:[#allocation32_spill] sm:$0xff] }
 0x15b   : > { %8627 = vmatprep.mubr.msk.f32.mxu0 %vm362_vm1, %v10052_v24 }
 0x15c   : > { %v10577_v55 = vpop.f32.mrb[2].mxu1 }
 0x15d   : > { %v10581_v57 = vpop.f32.mrb[3].mxu1 }
 0x15e   : > { %8628 = vmatmul.mubr.msk.f32.gmra.mrb[14].mxu0 %vm362_vm1, %v10064_v27  ;;  %v11487_v27 = vld [vmem:[#allocation34_spill] sm:$0xff] }
 0x15f   : > { %8630 = vmatprep.mubr.msk.f32.mxu0 %vm362_vm1, %v10068_v28 }
 0x160   : > { %v10585_v58 = vpop.f32.mrb[4].mxu1 }
 0x161   : > { %v10589_v59 = vpop.f32.mrb[5].mxu1 }
 0x162   : > { %8631 = vmatmul.mubr.msk.f32.gmra.mrb[16].mxu0 %vm362_vm1, %v10080_v40  ;;  %v11489_v40 = vld [vmem:[#allocation36_spill] sm:$0xff] }
 0x163   : > { %8633 = vmatprep.mubr.msk.f32.mxu0 %vm362_vm1, %v10084_v41 }
 0x166   : > { %8634 = vmatmul.mubr.msk.f32.gmra.mrb[18].mxu0 %vm362_vm1, %v10096_v44 }
 0x167   : > { %8636 = vmatprep.mubr.msk.f32.mxu0 %vm362_vm1, %v10100_v45  ;;  %v11491_v45 = vld [vmem:[#allocation38_spill] sm:$0xff] }
 0x16a   : > { %8637 = vmatmul.mubr.msk.f32.gmra.mrb[20].mxu0 %vm362_vm1, %v10112_v51 }
 0x16b   : > { %8639 = vmatprep.mubr.msk.f32.mxu0 %vm362_vm1, %v10116_v52  ;;  %v3538_v52 = vld [vmem:[#allocation2 + $0x19a] sm:$0xff] }
 0x16e   : > { %8640 = vmatmul.mubr.msk.f32.gmra.mrb[22].mxu0 %vm362_vm1, %v10126_v1  ;;  %v3149_v1 = vld [vmem:[#allocation2 + $0x1a1] sm:$0xff] }
 0x16f   : > { %8642 = vmatprep.mubr.msk.f32.mxu0 %vm362_vm1, %v10130_v32  ;;  %v3508_v32 = vld [vmem:[#allocation2 + $0x32] sm:$0xff] }
 0x172   : > { %8643 = vmatmul.mubr.msk.f32.gmra.mrb[24].mxu0 %vm362_vm1, %v10138_v47 }
 0x173   : > { %8645 = vmatprep.mubr.msk.f32.mxu0 %vm362_vm1, %v10153_v53 }
 0x176   : > { %8646 = vmatmul.mubr.msk.f32.gmra.mrb[26].mxu0 %vm362_vm1, %v10159_v43  ;;  %v11490_v43 = vld [vmem:[#allocation37_spill] sm:$0xff] }
 0x177   : > { %8648 = vmatprep.mubr.msk.f32.mxu0 %vm362_vm1, %v10265_v0 }
 0x17a   : > { %8649 = vmatmul.mubr.msk.f32.gmra.mrb[28].mxu0 %vm362_vm1, %v10273_v33  ;;  %v3539_v33 = vld [vmem:[#allocation2 + $0x1a2] sm:$0xff] }
 0x17b   : > { %8651 = vmatprep.mubr.msk.f32.mxu0 %vm362_vm1, %v3148_v60  ;;  %v7651_v60 = vld [vmem:[%s11392_s3 + $0x18] sm:$0xff] }
 0x17e   : > { %8652 = vmatmul.mubr.msk.f32.gmra.mrb[30].mxu0 %vm362_vm1, %v3149_v1  ;;  %v8974_v1 = vpack.c.bf16 %v7651_v60, %v7650_v49 }
 0x17f   : > { %8656 = vmatprep.mubr.msk.f32.mxu0 %vm362_vm1, %v3508_v32  ;;  %v4145_v32 = vld [vmem:[#allocation4 + $0x1] sm:$0xff] }
 0x180   : > { %8975 = vmatprep.subr.bf16.mxu1 %v8974_v1  ;;  %8708 = vmatprep.mubr.msk.f32.mxu1 %vm3969_vm3, %v4145_v32 }
 0x181   : > { %8977 = vmatpush3.bf16.msra.mxu1 %v8974_v1 }
 0x182   : > { %8657 = vmatmul.mubr.msk.f32.vlgmr.msra.gmra.mrb[0].mxu0 %vm362_vm1, %v3509_v61  ;;  %v4143_v61 = vld [vmem:[%s11392_s3] sm:$0xff] }
 0x183   : > { %8659 = vmatprep.mubr.msk.f32.mxu0 %vm362_vm1, %v11468_v62  ;;  %v4144_v62 = vld [vmem:[%s11392_s3 + $0x8] sm:$0xff] }
 0x186   : > { %8660 = vmatmul.mubr.msk.f32.gmra.mrb[2].mxu0 %vm362_vm1, %v11469_v63  ;;  %v10778_v63 = vpack.c.bf16 %v4144_v62, %v4143_v61 }
 0x187   : > { %8662 = vmatprep.mubr.msk.f32.mxu0 %vm362_vm1, %v11470_v2 }
 0x188   : > { %8979 = vmatprep.subr.bf16.mxu1 %v10778_v63 }
 0x18a   : > { %8663 = vmatmul.mubr.msk.f32.gmra.mrb[4].mxu0 %vm362_vm1, %v11471_v3  ;;  %v10784_v3 = vld [vmem:[%s11391_s2] ss:$0 sm:$0xff] }
 0x18b   : > { %8665 = vmatprep.mubr.msk.f32.mxu0 %vm362_vm1, %v11472_v5 }
 0x18e   : > { %8666 = vmatmul.mubr.msk.f32.gmra.mrb[6].mxu0 %vm362_vm1, %v11473_v6 }
 0x18f   : > { %8668 = vmatprep.mubr.msk.f32.mxu0 %vm362_vm1, %v11474_v7 }
 0x192   : > { %8669 = vmatmul.mubr.msk.f32.gmra.mrb[8].mxu0 %vm362_vm1, %v11475_v8 }
 0x193   : > { %8671 = vmatprep.mubr.msk.f32.mxu0 %vm362_vm1, %v11476_v9 }
 0x196   : > { %8672 = vmatmul.mubr.msk.f32.gmra.mrb[10].mxu0 %vm362_vm1, %v11477_v10 }
 0x197   : > { %8674 = vmatprep.mubr.msk.f32.mxu0 %vm362_vm1, %v11478_v11 }
 0x19a   : > { %8675 = vmatmul.mubr.msk.f32.gmra.mrb[12].mxu0 %vm362_vm1, %v11479_v12 }
 0x19b   : > { %8677 = vmatprep.mubr.msk.f32.mxu0 %vm362_vm1, %v11480_v13  ;;  %v10641_v14 = vpop.f32.mrb[6].mxu1 }
 0x19c   : > { %v10645_v16 = vpop.f32.mrb[7].mxu1 }
 0x19e   : > { %8678 = vmatmul.mubr.msk.f32.gmra.mrb[14].mxu0 %vm362_vm1, %v11481_v15 }
 0x19f   : > { %8680 = vmatprep.mubr.msk.f32.mxu0 %vm362_vm1, %v11482_v17  ;;  %v10649_v18 = vpop.f32.mrb[8].mxu1 }
 0x1a0   : > { %v10653_v20 = vpop.f32.mrb[9].mxu1 }
 0x1a2   : > { %8681 = vmatmul.mubr.msk.f32.gmra.mrb[16].mxu0 %vm362_vm1, %v11483_v19 }
 0x1a3   : > { %8683 = vmatprep.mubr.msk.f32.mxu0 %vm362_vm1, %v11484_v21  ;;  %v10657_v22 = vpop.f32.mrb[10].mxu1 }
 0x1a4   : > { %v10661_v24 = vpop.f32.mrb[11].mxu1 }
 0x1a6   : > { %8684 = vmatmul.mubr.msk.f32.gmra.mrb[18].mxu0 %vm362_vm1, %v11485_v23 }
 0x1a7   : > { %8686 = vmatprep.mubr.msk.f32.mxu0 %vm362_vm1, %v11486_v25  ;;  %v10665_v26 = vpop.f32.mrb[12].mxu1 }
 0x1a8   : > { %v10669_v28 = vpop.f32.mrb[13].mxu1 }
 0x1aa   : > { %8687 = vmatmul.mubr.msk.f32.gmra.mrb[20].mxu0 %vm362_vm1, %v11487_v27 }
 0x1ab   : > { %8689 = vmatprep.mubr.msk.f32.mxu0 %vm362_vm1, %v11488_v36  ;;  %v10673_v39 = vpop.f32.mrb[14].mxu1 }
 0x1ac   : > { %v10677_v41 = vpop.f32.mrb[15].mxu1 }
 0x1ae   : > { %8690 = vmatmul.mubr.msk.f32.gmra.mrb[22].mxu0 %vm362_vm1, %v11489_v40 }
 0x1af   : > { %8692 = vmatprep.mubr.msk.f32.mxu0 %vm362_vm1, %v10434_v4  ;;  %v10681_v42 = vpop.f32.mrb[16].mxu1 }
 0x1b0   : > { %v10685_v44 = vpop.f32.mrb[17].mxu1 }
 0x1b2   : > { %8693 = vmatmul.mubr.msk.f32.gmra.mrb[24].mxu0 %vm362_vm1, %v11490_v43 }
 0x1b3   : > { %8695 = vmatprep.mubr.msk.f32.mxu0 %vm362_vm1, %v11491_v45  ;;  %v10689_v47 = vpop.f32.mrb[18].mxu1 }
 0x1b4   : > { %v10693_v51 = vpop.f32.mrb[19].mxu1 }
 0x1b6   : > { %8696 = vmatmul.mubr.msk.f32.gmra.mrb[26].mxu0 %vm362_vm1, %v10454_v46 }
 0x1b7   : > { %8698 = vmatprep.mubr.msk.f32.mxu0 %vm362_vm1, %v10458_v31  ;;  %v10697_v53 = vpop.f32.mrb[20].mxu1 }
 0x1b8   : > { %v10701_v0 = vpop.f32.mrb[21].mxu1 }
 0x1ba   : > { %8699 = vmatmul.mubr.msk.f32.gmra.mrb[28].mxu0 %vm362_vm1, %v10466_v37 }
 0x1bb   : > { %8701 = vmatprep.mubr.msk.f32.mxu0 %vm362_vm1, %v3538_v52  ;;  %v10704_v34 = vpop.f32.mrb[22].mxu1 }
 0x1bc   : > { %v10707_v29 = vpop.f32.mrb[23].mxu1 }
 0x1be   : > { %8702 = vmatmul.mubr.msk.f32.gmra.mrb[30].mxu0 %vm362_vm1, %v3539_v33 }
 0x1bf   : > { %v10709_v56 = vpop.f32.mrb[24].mxu1 }
 0x1c0   : > { %v10711_v30 = vpop.f32.mrb[25].mxu1 }
 0x1c3   : > { %v10713_v46 = vpop.f32.mrb[26].mxu1 }
 0x1c4   : > { %v10715_v31 = vpop.f32.mrb[27].mxu1 }
 0x1c7   : > { %v10717_v37 = vpop.f32.mrb[28].mxu1 }
 0x1c8   : > { %v10719_v4 = vpop.f32.mrb[29].mxu1 }
 0x1cb   : > { %v10721_v35 = vpop.f32.mrb[30].mxu1 }
 0x1cc   : > { %v10723_v38 = vpop.f32.mrb[31].mxu1 }
 0x255   : > { %v8658_v2 = vpop.f32.mrb[0].mxu0 }
 0x256   : > { %v9075_v5 = vadd.f32 %v8658_v2, %v10569_v50  ;;  %v3707_v6 = vpop.f32.mrb[1].mxu0 }
 0x257   : > { %v9076_v7 = vadd.f32 %v3707_v6, %v10573_v54 }
 0x258   : > { %v3906_v8 = vadd.f32 %v9075_v5, %v10784_v3 }
 0x259   : > { %v3905_v9 = vadd.f32 %v9076_v7, %v10784_v3  ;;  %v8661_v10 = vpop.f32.mrb[2].mxu0 }
 0x25a   : > { %v3938_v11 = vmax.f32 %v3906_v8, 0.0  ;;  %v9077_v12 = vadd.f32 %v8661_v10, %v10577_v55  ;;  %v3717_v13 = vpop.f32.mrb[3].mxu0 }
 0x25b   : > { %v3937_v15 = vmax.f32 %v3905_v9, 0.0  ;;  %v9078_v17 = vadd.f32 %v3717_v13, %v10581_v57 }
 0x25c   : > { %3971 = vst.msk [vmem:[#allocation3 + $0x8] sm:$0xff] %vm3969_vm3, %v3938_v11  ;;  %v3908_v19 = vadd.f32 %v9077_v12, %v10784_v3 }
 0x25d   : > { %3970 = vst.msk [vmem:[#allocation3] sm:$0xff] %vm3969_vm3, %v3937_v15  ;;  %v3907_v50 = vadd.f32 %v9078_v17, %v10784_v3  ;;  %v8664_v54 = vpop.f32.mrb[4].mxu0 }
 0x25e   : > { %v3940_v21 = vmax.f32 %v3908_v19, 0.0  ;;  %v9079_v23 = vadd.f32 %v8664_v54, %v10585_v58  ;;  %v3727_v25 = vpop.f32.mrb[5].mxu0 }
 0x25f   : > { %v3939_v27 = vmax.f32 %v3907_v50, 0.0  ;;  %v9080_v55 = vadd.f32 %v3727_v25, %v10589_v59 }
 0x260   : > { %3973 = vst.msk [vmem:[#allocation3 + $0x18] sm:$0xff] %vm3969_vm3, %v3940_v21  ;;  %v3910_v57 = vadd.f32 %v9079_v23, %v10784_v3 }
 0x261   : > { %3972 = vst.msk [vmem:[#allocation3 + $0x10] sm:$0xff] %vm3969_vm3, %v3939_v27  ;;  %v3909_v36 = vadd.f32 %v9080_v55, %v10784_v3  ;;  %v8667_v40 = vpop.f32.mrb[6].mxu0 }
 0x262   : > { %v3942_v43 = vmax.f32 %v3910_v57, 0.0  ;;  %v9081_v45 = vadd.f32 %v8667_v40, %v10641_v14  ;;  %v3737_v52 = vpop.f32.mrb[7].mxu0 }
 0x263   : > { %v3941_v33 = vmax.f32 %v3909_v36, 0.0  ;;  %v9082_v58 = vadd.f32 %v3737_v52, %v10645_v16 }
 0x264   : > { %v4002_v49 = vld [vmem:[#allocation3] ss:$2 sm:$0xff]  ;;  %v4034_v60 = vld [vmem:[#allocation3 + $0x1] ss:$2 sm:$0xff]  ;;  %3975 = vst.msk [vmem:[#allocation3 + $0x28] sm:$0xff] %vm3969_vm3, %v3942_v43  ;;  %v3912_v59 = vadd.f32 %v9081_v45, %v10784_v3 }
 0x265   : > { %3974 = vst.msk [vmem:[#allocation3 + $0x20] sm:$0xff] %vm3969_vm3, %v3941_v33  ;;  %v3911_v1 = vadd.f32 %v9082_v58, %v10784_v3  ;;  %v8670_v32 = vpop.f32.mrb[8].mxu0  ;;  %v4065_v14 = vmax.f32 %v4002_v49, %v4034_v60 }
 0x266   : > { %v3944_v61 = vmax.f32 %v3912_v59, 0.0  ;;  %v9083_v62 = vadd.f32 %v8670_v32, %v10649_v18  ;;  %v3747_v2 = vpop.f32.mrb[9].mxu0 }
 0x267   : > { %v3943_v5 = vmax.f32 %v3911_v1, 0.0  ;;  %v9084_v6 = vadd.f32 %v3747_v2, %v10653_v20  ;;  %v4081_v15 = vsel %vm3969_vm3, %v4065_v14, -inf }
 0x268   : > { %v4004_v16 = vld [vmem:[#allocation3 + $0x10] ss:$2 sm:$0xff]  ;;  %v4036_v7 = vld [vmem:[#allocation3 + $0x11] ss:$2 sm:$0xff]  ;;  %3977 = vst.msk [vmem:[#allocation3 + $0x38] sm:$0xff] %vm3969_vm3, %v3944_v61  ;;  %v3914_v8 = vadd.f32 %v9083_v62, %v10784_v3 }
 0x269   : > { %v4066_v9 = vmax.f32 %v4004_v16, %v4036_v7  ;;  %3976 = vst.msk [vmem:[#allocation3 + $0x30] sm:$0xff] %vm3969_vm3, %v3943_v5  ;;  %v3913_v10 = vadd.f32 %v9084_v6, %v10784_v3  ;;  %v8673_v11 = vpop.f32.mrb[10].mxu0 }
 0x26a   : > { %v3946_v12 = vmax.f32 %v3914_v8, 0.0  ;;  %v9085_v18 = vadd.f32 %v8673_v11, %v10657_v22  ;;  %v3757_v13 = vpop.f32.mrb[11].mxu0 }
 0x26b   : > { %v4082_v20 = vsel %vm3969_vm3, %v4066_v9, -inf  ;;  %v3945_v17 = vmax.f32 %v3913_v10, 0.0  ;;  %v9086_v19 = vadd.f32 %v3757_v13, %v10661_v24 }
 0x26c   : > { %v4083_v50 = vmax.f32 %v4081_v15, %v4082_v20  ;;  %v4006_v54 = vld [vmem:[#allocation3 + $0x20] ss:$2 sm:$0xff]  ;;  %v4038_v21 = vld [vmem:[#allocation3 + $0x21] ss:$2 sm:$0xff]  ;;  %3979 = vst.msk [vmem:[#allocation3 + $0x48] sm:$0xff] %vm3969_vm3, %v3946_v12  ;;  %v3916_v23 = vadd.f32 %v9085_v18, %v10784_v3 }
 0x26d   : > { %3978 = vst.msk [vmem:[#allocation3 + $0x40] sm:$0xff] %vm3969_vm3, %v3945_v17  ;;  %v3915_v25 = vadd.f32 %v9086_v19, %v10784_v3  ;;  %v8676_v22 = vpop.f32.mrb[12].mxu0  ;;  %v4067_v36 = vmax.f32 %v4006_v54, %v4038_v21 }
 0x26e   : > { %v3948_v27 = vmax.f32 %v3916_v23, 0.0  ;;  %v9087_v55 = vadd.f32 %v8676_v22, %v10665_v26  ;;  %v3767_v57 = vpop.f32.mrb[13].mxu0  ;;  %4127 = vst.msk [vmem:[#allocation4 + $0x11] sm:$0xff] %vm3969_vm3, %v4083_v50  ;;  %v7668_v26 = vld [vmem:[%s11392_s3 + $0x20] sm:$0xff] }
 0x26f   : > { %v3947_v24 = vmax.f32 %v3915_v25, 0.0  ;;  %v9088_v40 = vadd.f32 %v3767_v57, %v10669_v28  ;;  %v7669_v28 = vld [vmem:[%s11392_s3 + $0x28] sm:$0xff]  ;;  %v4084_v32 = vsel %vm3969_vm3, %v4067_v36, -inf }
 0x270   : > { %v4008_v43 = vld [vmem:[#allocation3 + $0x30] ss:$2 sm:$0xff]  ;;  %v4040_v45 = vld [vmem:[#allocation3 + $0x31] ss:$2 sm:$0xff]  ;;  %3981 = vst.msk [vmem:[#allocation3 + $0x58] sm:$0xff] %vm3969_vm3, %v3948_v27  ;;  %v3918_v52 = vadd.f32 %v9087_v55, %v10784_v3  ;;  %v10841_v7 = vpack.c.bf16 %v7669_v28, %v7668_v26 }
 0x271   : > { %v4068_v33 = vmax.f32 %v4008_v43, %v4040_v45  ;;  %3980 = vst.msk [vmem:[#allocation3 + $0x50] sm:$0xff] %vm3969_vm3, %v3947_v24  ;;  %v3917_v58 = vadd.f32 %v9088_v40, %v10784_v3  ;;  %v8679_v49 = vpop.f32.mrb[14].mxu0 }
 0x272   : > { %v3950_v60 = vmax.f32 %v3918_v52, 0.0  ;;  %v9089_v59 = vadd.f32 %v8679_v49, %v10673_v39  ;;  %v3777_v1 = vpop.f32.mrb[15].mxu0 }
 0x273   : > { %v4085_v61 = vsel %vm3969_vm3, %v4068_v33, -inf  ;;  %v3949_v62 = vmax.f32 %v3917_v58, 0.0  ;;  %v9090_v2 = vadd.f32 %v3777_v1, %v10677_v41 }
 0x274   : > { %v4086_v14 = vmax.f32 %v4084_v32, %v4085_v61  ;;  %v4010_v5 = vld [vmem:[#allocation3 + $0x40] ss:$2 sm:$0xff]  ;;  %v4042_v6 = vld [vmem:[#allocation3 + $0x41] ss:$2 sm:$0xff]  ;;  %3983 = vst.msk [vmem:[#allocation3 + $0x68] sm:$0xff] %vm3969_vm3, %v3950_v60  ;;  %v3920_v16 = vadd.f32 %v9089_v59, %v10784_v3 }
 0x275   : > { %3982 = vst.msk [vmem:[#allocation3 + $0x60] sm:$0xff] %vm3969_vm3, %v3949_v62  ;;  %v3919_v39 = vadd.f32 %v9090_v2, %v10784_v3  ;;  %v8682_v8 = vpop.f32.mrb[16].mxu0  ;;  %v10845_v9 = vld [vmem:[#allocation4 + $0x11] sm:$0xff]  ;;  %v4069_v12 = vmax.f32 %v4010_v5, %v4042_v6 }
 0x276   : > { %v3952_v10 = vmax.f32 %v3920_v16, 0.0  ;;  %v9091_v11 = vadd.f32 %v8682_v8, %v10681_v42  ;;  %v3787_v41 = vpop.f32.mrb[17].mxu0  ;;  %4128 = vst.msk [vmem:[#allocation4 + $0x21] sm:$0xff] %vm3969_vm3, %v4086_v14  ;;  %8709 = vmatmul.mubr.msk.f32.vlgmr.msra.gmra.mrb[32].mxu1 %vm3969_vm3, %v10845_v9 }
 0x277   : > { %v3951_v18 = vmax.f32 %v3919_v39, 0.0  ;;  %v9092_v13 = vadd.f32 %v3787_v41, %v10685_v44  ;;  %8981 = vmatpush3.bf16.msra.mxu1 %v10778_v63  ;;  %v4087_v63 = vsel %vm3969_vm3, %v4069_v12, -inf }
 0x278   : > { %v4012_v15 = vld [vmem:[#allocation3 + $0x50] ss:$2 sm:$0xff]  ;;  %v4044_v20 = vld [vmem:[#allocation3 + $0x51] ss:$2 sm:$0xff]  ;;  %3985 = vst.msk [vmem:[#allocation3 + $0x78] sm:$0xff] %vm3969_vm3, %v3952_v10  ;;  %v3922_v17 = vadd.f32 %v9091_v11, %v10784_v3  ;;  %8983 = vmatprep.subr.bf16.mxu1 %v10841_v7 }
 0x279   : > { %v4070_v42 = vmax.f32 %v4012_v15, %v4044_v20  ;;  %3984 = vst.msk [vmem:[#allocation3 + $0x70] sm:$0xff] %vm3969_vm3, %v3951_v18  ;;  %v3921_v19 = vadd.f32 %v9092_v13, %v10784_v3  ;;  %v8685_v50 = vpop.f32.mrb[18].mxu0 }
 0x27a   : > { %v3954_v54 = vmax.f32 %v3922_v17, 0.0  ;;  %v9093_v21 = vadd.f32 %v8685_v50, %v10689_v47  ;;  %v3797_v44 = vpop.f32.mrb[19].mxu0 }
 0x27b   : > { %v4088_v23 = vsel %vm3969_vm3, %v4070_v42, -inf  ;;  %v3953_v25 = vmax.f32 %v3921_v19, 0.0  ;;  %v9094_v22 = vadd.f32 %v3797_v44, %v10693_v51 }
 0x27c   : > { %v4089_v27 = vmax.f32 %v4087_v63, %v4088_v23  ;;  %v4014_v55 = vld [vmem:[#allocation3 + $0x60] ss:$2 sm:$0xff]  ;;  %v4046_v57 = vld [vmem:[#allocation3 + $0x61] ss:$2 sm:$0xff]  ;;  %3987 = vst.msk [vmem:[#allocation3 + $0x88] sm:$0xff] %vm3969_vm3, %v3954_v54  ;;  %v3924_v36 = vadd.f32 %v9093_v21, %v10784_v3 }
 0x27d   : > { %3986 = vst.msk [vmem:[#allocation3 + $0x80] sm:$0xff] %vm3969_vm3, %v3953_v25  ;;  %v3923_v24 = vadd.f32 %v9094_v22, %v10784_v3  ;;  %v8688_v47 = vpop.f32.mrb[20].mxu0  ;;  %v10866_v40 = vld [vmem:[#allocation4 + $0x21] sm:$0xff]  ;;  %v4071_v52 = vmax.f32 %v4014_v55, %v4046_v57 }
 0x27e   : > { %4129 = vst.msk [vmem:[#allocation4 + $0x31] sm:$0xff] %vm3969_vm3, %v4089_v27  ;;  %v3956_v43 = vmax.f32 %v3924_v36, 0.0  ;;  %v9095_v45 = vadd.f32 %v8688_v47, %v10697_v53  ;;  %v3807_v51 = vpop.f32.mrb[21].mxu0  ;;  %8711 = vmatprep.mubr.msk.f32.mxu1 %vm3969_vm3, %v10866_v40 }
 0x27f   : > { %v3955_v33 = vmax.f32 %v3923_v24, 0.0  ;;  %v9096_v58 = vadd.f32 %v3807_v51, %v10701_v0  ;;  %v4090_v62 = vsel %vm3969_vm3, %v4071_v52, -inf }
 0x280   : > { %v4016_v49 = vld [vmem:[#allocation3 + $0x70] ss:$2 sm:$0xff]  ;;  %v4048_v26 = vld [vmem:[#allocation3 + $0x71] ss:$2 sm:$0xff]  ;;  %3989 = vst.msk [vmem:[#allocation3 + $0x98] sm:$0xff] %vm3969_vm3, %v3956_v43  ;;  %v3926_v28 = vadd.f32 %v9095_v45, %v10784_v3 }
 0x281   : > { %v4072_v60 = vmax.f32 %v4016_v49, %v4048_v26  ;;  %3988 = vst.msk [vmem:[#allocation3 + $0x90] sm:$0xff] %vm3969_vm3, %v3955_v33  ;;  %v3925_v59 = vadd.f32 %v9096_v58, %v10784_v3  ;;  %v8691_v53 = vpop.f32.mrb[22].mxu0 }
 0x282   : > { %v3958_v1 = vmax.f32 %v3926_v28, 0.0  ;;  %v9097_v32 = vadd.f32 %v8691_v53, %v10704_v34  ;;  %v3817_v61 = vpop.f32.mrb[23].mxu0 }
 0x283   : > { %v4091_v0 = vsel %vm3969_vm3, %v4072_v60, -inf  ;;  %v3957_v2 = vmax.f32 %v3925_v59, 0.0  ;;  %v9098_v14 = vadd.f32 %v3817_v61, %v10707_v29 }
 0x284   : > { %v4092_v5 = vmax.f32 %v4090_v62, %v4091_v0  ;;  %v4018_v6 = vld [vmem:[#allocation3 + $0x80] ss:$2 sm:$0xff]  ;;  %v4050_v16 = vld [vmem:[#allocation3 + $0x81] ss:$2 sm:$0xff]  ;;  %3991 = vst.msk [vmem:[#allocation3 + $0xa8] sm:$0xff] %vm3969_vm3, %v3958_v1  ;;  %v3928_v39 = vadd.f32 %v9097_v32, %v10784_v3 }
 0x285   : > { %3990 = vst.msk [vmem:[#allocation3 + $0xa0] sm:$0xff] %vm3969_vm3, %v3957_v2  ;;  %v3927_v8 = vadd.f32 %v9098_v14, %v10784_v3  ;;  %v8694_v34 = vpop.f32.mrb[24].mxu0  ;;  %v10885_v10 = vld [vmem:[#allocation4 + $0x31] sm:$0xff]  ;;  %v4073_v12 = vmax.f32 %v4018_v6, %v4050_v16 }
 0x286   : > { %4130 = vst.msk [vmem:[#allocation4 + $0x41] sm:$0xff] %vm3969_vm3, %v4092_v5  ;;  %v3960_v11 = vmax.f32 %v3928_v39, 0.0  ;;  %v9099_v41 = vadd.f32 %v8694_v34, %v10709_v56  ;;  %v3827_v29 = vpop.f32.mrb[25].mxu0  ;;  %8712 = vmatmul.mubr.msk.f32.gmra.mrb[34].mxu1 %vm3969_vm3, %v10885_v10 }
 0x287   : > { %v3959_v18 = vmax.f32 %v3927_v8, 0.0  ;;  %v9100_v13 = vadd.f32 %v3827_v29, %v10711_v30  ;;  %v4093_v44 = vsel %vm3969_vm3, %v4073_v12, -inf }
 0x288   : > { %v4020_v15 = vld [vmem:[#allocation3 + $0x90] ss:$2 sm:$0xff]  ;;  %v4052_v20 = vld [vmem:[#allocation3 + $0x91] ss:$2 sm:$0xff]  ;;  %3993 = vst.msk [vmem:[#allocation3 + $0xb8] sm:$0xff] %vm3969_vm3, %v3960_v11  ;;  %v3930_v17 = vadd.f32 %v9099_v41, %v10784_v3 }
 0x289   : > { %v4074_v42 = vmax.f32 %v4020_v15, %v4052_v20  ;;  %3992 = vst.msk [vmem:[#allocation3 + $0xb0] sm:$0xff] %vm3969_vm3, %v3959_v18  ;;  %v3929_v19 = vadd.f32 %v9100_v13, %v10784_v3  ;;  %v8697_v56 = vpop.f32.mrb[26].mxu0 }
 0x28a   : > { %v3962_v50 = vmax.f32 %v3930_v17, 0.0  ;;  %v9101_v54 = vadd.f32 %v8697_v56, %v10713_v46  ;;  %v3837_v21 = vpop.f32.mrb[27].mxu0  ;;  %v4135_v56 = vld [vmem:[#allocation4] sm:$0xff] }
 0x28b   : > { %v4094_v30 = vsel %vm3969_vm3, %v4074_v42, -inf  ;;  %v3961_v63 = vmax.f32 %v3929_v19, 0.0  ;;  %v9102_v23 = vadd.f32 %v3837_v21, %v10715_v31  ;;  %v7679_v21 = vld [vmem:[%s11392_s3 + $0x38] sm:$0xff] }
 0x28c   : > { %v4095_v25 = vmax.f32 %v4093_v44, %v4094_v30  ;;  %v4022_v22 = vld [vmem:[#allocation3 + $0xa0] ss:$2 sm:$0xff]  ;;  %v4054_v27 = vld [vmem:[#allocation3 + $0xa1] ss:$2 sm:$0xff]  ;;  %3995 = vst.msk [vmem:[#allocation3 + $0xc8] sm:$0xff] %vm3969_vm3, %v3962_v50  ;;  %v3932_v55 = vadd.f32 %v9101_v54, %v10784_v3  ;;  %v4136_v30 = vld [vmem:[#allocation4 + $0x10] sm:$0xff] }
 0x28d   : > { %3994 = vst.msk [vmem:[#allocation3 + $0xc0] sm:$0xff] %vm3969_vm3, %v3961_v63  ;;  %v3931_v57 = vadd.f32 %v9102_v23, %v10784_v3  ;;  %v8700_v46 = vpop.f32.mrb[28].mxu0  ;;  %v10904_v36 = vld [vmem:[#allocation4 + $0x41] sm:$0xff]  ;;  %v4075_v43 = vmax.f32 %v4022_v22, %v4054_v27  ;;  %v10957_v23 = vld [vmem:[#allocation4 + $0x30] sm:$0xff] }
 0x28e   : > { %4131 = vst.msk [vmem:[#allocation4 + $0x51] sm:$0xff] %vm3969_vm3, %v4095_v25  ;;  %v3964_v24 = vmax.f32 %v3932_v55, 0.0  ;;  %v9103_v47 = vadd.f32 %v8700_v46, %v10717_v37  ;;  %v3847_v31 = vpop.f32.mrb[29].mxu0  ;;  %8714 = vmatprep.mubr.msk.f32.mxu1 %vm3969_vm3, %v10904_v36  ;;  %v7678_v54 = vld [vmem:[%s11392_s3 + $0x30] sm:$0xff]  ;;  %v7689_v46 = vld [vmem:[%s11392_s3 + $0x48] sm:$0xff] }
 0x28f   : > { %v3963_v45 = vmax.f32 %v3931_v57, 0.0  ;;  %v9104_v51 = vadd.f32 %v3847_v31, %v10719_v4  ;;  %v4096_v53 = vsel %vm3969_vm3, %v4075_v43, -inf  ;;  %v8986_v44 = vpack.c.bf16 %v7679_v21, %v7678_v54  ;;  %v10952_v63 = vld [vmem:[#allocation4 + $0x20] sm:$0xff]  ;;  %v7688_v57 = vld [vmem:[%s11392_s3 + $0x40] sm:$0xff] }
 0x290   : > { %v4024_v52 = vld [vmem:[#allocation3 + $0xb0] ss:$2 sm:$0xff]  ;;  %v4056_v33 = vld [vmem:[#allocation3 + $0xb1] ss:$2 sm:$0xff]  ;;  %3997 = vst.msk [vmem:[#allocation3 + $0xd8] sm:$0xff] %vm3969_vm3, %v3964_v24  ;;  %v3934_v58 = vadd.f32 %v9103_v47, %v10784_v3  ;;  %v10961_v25 = vld [vmem:[#allocation4 + $0x40] sm:$0xff]  ;;  %v8990_v24 = vpack.c.bf16 %v7689_v46, %v7688_v57 }
 0x291   : > { %v4076_v49 = vmax.f32 %v4024_v52, %v4056_v33  ;;  %3996 = vst.msk [vmem:[#allocation3 + $0xd0] sm:$0xff] %vm3969_vm3, %v3963_v45  ;;  %v3933_v26 = vadd.f32 %v9104_v51, %v10784_v3  ;;  %v8703_v37 = vpop.f32.mrb[30].mxu0  ;;  %v4414_v27 = vld [vmem:[#allocation4 + $0x2] sm:$0xff]  ;;  %v4415_v47 = vld [vmem:[#allocation4 + $0x12] sm:$0xff] }
 0x292   : > { %v3966_v28 = vmax.f32 %v3934_v58, 0.0  ;;  %v9105_v60 = vadd.f32 %v8703_v37, %v10721_v35  ;;  %v3857_v59 = vpop.f32.mrb[31].mxu0  ;;  %v10985_v31 = vld [vmem:[#allocation4 + $0x22] sm:$0xff]  ;;  %v10989_v43 = vld [vmem:[#allocation4 + $0x32] sm:$0xff] }
 0x293   : > { %v4097_v4 = vsel %vm3969_vm3, %v4076_v49, -inf  ;;  %v3965_v1 = vmax.f32 %v3933_v26, 0.0  ;;  %v9106_v32 = vadd.f32 %v3857_v59, %v10723_v38  ;;  %v10993_v45 = vld [vmem:[#allocation4 + $0x42] sm:$0xff] }
 0x294   : > { %v4098_v61 = vmax.f32 %v4096_v53, %v4097_v4  ;;  %v4026_v62 = vld [vmem:[#allocation3 + $0xc0] ss:$2 sm:$0xff]  ;;  %v4058_v0 = vld [vmem:[#allocation3 + $0xc1] ss:$2 sm:$0xff]  ;;  %3999 = vst.msk [vmem:[#allocation3 + $0xe8] sm:$0xff] %vm3969_vm3, %v3966_v28  ;;  %v3936_v2 = vadd.f32 %v9105_v60, %v10784_v3  ;;  %v7708_v28 = vld [vmem:[%s11392_s3 + $0x60] sm:$0xff] }
 0x295   : > { %3998 = vst.msk [vmem:[#allocation3 + $0xe0] sm:$0xff] %vm3969_vm3, %v3965_v1  ;;  %v3935_v14 = vadd.f32 %v9106_v32, %v10784_v3  ;;  %v10923_v35 = vld [vmem:[#allocation4 + $0x51] sm:$0xff]  ;;  %v4077_v38 = vmax.f32 %v4026_v62, %v4058_v0  ;;  %v7698_v58 = vld [vmem:[%s11392_s3 + $0x50] sm:$0xff]  ;;  %v7699_v49 = vld [vmem:[%s11392_s3 + $0x58] sm:$0xff] }
 0x296   : > { %4132 = vst.msk [vmem:[#allocation4 + $0x61] sm:$0xff] %vm3969_vm3, %v4098_v61  ;;  %v3968_v5 = vmax.f32 %v3936_v2, 0.0  ;;  %8715 = vmatmul.mubr.msk.f32.gmra.mrb[36].mxu1 %vm3969_vm3, %v10923_v35  ;;  %v10965_v22 = vld [vmem:[#allocation4 + $0x50] sm:$0xff]  ;;  %v8994_v26 = vpack.c.bf16 %v7699_v49, %v7698_v58  ;;  %v7709_v60 = vld [vmem:[%s11392_s3 + $0x68] sm:$0xff]  ;;  %v7718_v53 = vld [vmem:[%s11392_s3 + $0x70] sm:$0xff] }
 0x297   : > { %v3967_v6 = vmax.f32 %v3935_v14, 0.0  ;;  %v4099_v34 = vsel %vm3969_vm3, %v4077_v38, -inf  ;;  %v10997_v51 = vld [vmem:[#allocation4 + $0x52] sm:$0xff]  ;;  %v8998_v59 = vpack.c.bf16 %v7709_v60, %v7708_v28  ;;  %v7719_v4 = vld [vmem:[%s11392_s3 + $0x78] sm:$0xff] }
 0x298   : > { %v4028_v16 = vld [vmem:[#allocation3 + $0xd0] ss:$2 sm:$0xff]  ;;  %v4060_v39 = vld [vmem:[#allocation3 + $0xd1] ss:$2 sm:$0xff]  ;;  %4001 = vst.msk [vmem:[#allocation3 + $0xf8] sm:$0xff] %vm3969_vm3, %v3968_v5  ;;  %v9002_v1 = vpack.c.bf16 %v7719_v4, %v7718_v53 }
 0x299   : > { %v4078_v8 = vmax.f32 %v4028_v16, %v4060_v39  ;;  %4000 = vst.msk [vmem:[#allocation3 + $0xf0] sm:$0xff] %vm3969_vm3, %v3967_v6  ;;  %v7728_v61 = vld [vmem:[%s11392_s3 + $0x80] sm:$0xff]  ;;  %v7729_v62 = vld [vmem:[%s11392_s3 + $0x88] sm:$0xff] }
 0x29a   : > { %v9006_v0 = vpack.c.bf16 %v7729_v62, %v7728_v61  ;;  %v5014_v2 = vld [vmem:[#allocation4 + $0x90] sm:$0xff]  ;;  %v5543_v38 = vld [vmem:[%s11394_s5 + $0x8] sm:$0xff] }
 0x29b   : > { %v4100_v3 = vsel %vm3969_vm3, %v4078_v8, -inf  ;;  %v5162_v14 = vld [vmem:[#allocation4 + $0x91] sm:$0xff]  ;;  %v7738_v16 = vld [vmem:[%s11393_s4] ss:$0 sm:$0xff] }
 0x29c   : > { %v4101_v11 = vmax.f32 %v4099_v34, %v4100_v3  ;;  %v4030_v41 = vld [vmem:[#allocation3 + $0xe0] ss:$2 sm:$0xff]  ;;  %v4062_v29 = vld [vmem:[#allocation3 + $0xe1] ss:$2 sm:$0xff]  ;;  %v5542_v5 = vld [vmem:[%s11394_s5] sm:$0xff] }
 0x29d   : > { %v10932_v12 = vld [vmem:[#allocation4 + $0x61] sm:$0xff]  ;;  %v4079_v18 = vmax.f32 %v4030_v41, %v4062_v29  ;;  %v11144_v6 = vpack.c.bf16 %v5543_v38, %v5542_v5 }
 0x29e   : > { %4133 = vst.msk [vmem:[#allocation4 + $0x71] sm:$0xff] %vm3969_vm3, %v4101_v11  ;;  %8717 = vmatprep.mubr.msk.f32.mxu1 %vm3969_vm3, %v10932_v12  ;;  %v11001_v52 = vld [vmem:[#allocation4 + $0x62] sm:$0xff] }
 0x29f   : > { %v4102_v17 = vsel %vm3969_vm3, %v4079_v18, -inf  ;;  %v7750_v5 = vld [vmem:[%s11394_s5 + $0x38] sm:$0xff] }
 0x2a0   : > { %v4032_v13 = vld [vmem:[#allocation3 + $0xf0] ss:$2 sm:$0xff]  ;;  %v4064_v15 = vld [vmem:[#allocation3 + $0xf1] ss:$2 sm:$0xff] }
 0x2a1   : > { %v4080_v20 = vmax.f32 %v4032_v13, %v4064_v15 }
 0x2a3   : > { %v4103_v42 = vsel %vm3969_vm3, %v4080_v20, -inf }
 0x2a4   : > { %v4104_v19 = vmax.f32 %v4102_v17, %v4103_v42 }
 0x2a5   : > { %v10939_v50 = vld [vmem:[#allocation4 + $0x71] sm:$0xff] }
 0x2a6   : > { %4134 = vst.msk [vmem:[#allocation4 + $0x81] sm:$0xff] %vm3969_vm3, %v4104_v19  ;;  %8718 = vmatmul.mubr.msk.f32.gmra.mrb[38].mxu1 %vm3969_vm3, %v10939_v50  ;;  %v10973_v55 = vld [vmem:[#allocation4 + $0x70] sm:$0xff] }
 0x2a7   : > { %8724 = vmatprep.mubr.msk.f32.mxu1 %vm3969_vm3, %v4135_v56  ;;  %v11005_v33 = vld [vmem:[#allocation4 + $0x72] sm:$0xff] }
 0x2aa   : > { %8725 = vmatmul.mubr.msk.f32.vlgmr.msra.gmra.mrb[32].mxu1 %vm3969_vm3, %v4136_v30 }
 0x2ab   : > { %8985 = vmatpush3.bf16.msra.mxu1 %v10841_v7  ;;  %8727 = vmatprep.mubr.msk.f32.mxu1 %vm3969_vm3, %v10952_v63  ;;  %v10969_v7 = vld [vmem:[#allocation4 + $0x60] sm:$0xff] }
 0x2ac   : > { %8987 = vmatprep.subr.bf16.mxu1 %v8986_v44 }
 0x2ad   : > { %v4569_v37 = vld [vmem:[#allocation4 + $0x80] sm:$0xff] }
 0x2ae   : > { %8728 = vmatmul.mubr.msk.f32.gmra.mrb[34].mxu1 %vm3969_vm3, %v10957_v23  ;;  %v4865_v32 = vld [vmem:[#allocation4 + $0x82] sm:$0xff] }
 0x2af   : > { %8730 = vmatprep.mubr.msk.f32.mxu1 %vm3969_vm3, %v10961_v25 }
 0x2b2   : > { %8731 = vmatmul.mubr.msk.f32.gmra.mrb[36].mxu1 %vm3969_vm3, %v10965_v22 }
 0x2b3   : > { %8733 = vmatprep.mubr.msk.f32.mxu1 %vm3969_vm3, %v10969_v7 }
 0x2b6   : > { %8734 = vmatmul.mubr.msk.f32.gmra.mrb[38].mxu1 %vm3969_vm3, %v10973_v55 }
 0x2b7   : > { %8740 = vmatprep.mubr.msk.f32.mxu1 %vm3969_vm3, %v4414_v27 }
 0x2ba   : > { %8741 = vmatmul.mubr.msk.f32.vlgmr.msra.gmra.mrb[32].mxu1 %vm3969_vm3, %v4415_v47 }
 0x2bb   : > { %8989 = vmatpush3.bf16.msra.mxu1 %v8986_v44  ;;  %8743 = vmatprep.mubr.msk.f32.mxu1 %vm3969_vm3, %v10985_v31 }
 0x2bc   : > { %8991 = vmatprep.subr.bf16.mxu1 %v8990_v24 }
 0x2be   : > { %8744 = vmatmul.mubr.msk.f32.gmra.mrb[34].mxu1 %vm3969_vm3, %v10989_v43 }
 0x2bf   : > { %8746 = vmatprep.mubr.msk.f32.mxu1 %vm3969_vm3, %v10993_v45 }
 0x2c2   : > { %8747 = vmatmul.mubr.msk.f32.gmra.mrb[36].mxu1 %vm3969_vm3, %v10997_v51 }
 0x2c3   : > { %8749 = vmatprep.mubr.msk.f32.mxu1 %vm3969_vm3, %v11001_v52 }
 0x2c6   : > { %8750 = vmatmul.mubr.msk.f32.gmra.mrb[38].mxu1 %vm3969_vm3, %v11005_v33 }
 0x2c7   : > { %8756 = vmatprep.mubr.msk.f32.mxu1 %vm3969_vm3, %v4136_v30 }
 0x2ca   : > { %8757 = vmatmul.mubr.msk.f32.vlgmr.msra.gmra.mrb[32].mxu1 %vm3969_vm3, %v10952_v63 }
 0x2cb   : > { %8993 = vmatpush3.bf16.msra.mxu1 %v8990_v24  ;;  %8759 = vmatprep.mubr.msk.f32.mxu1 %vm3969_vm3, %v10957_v23 }
 0x2cc   : > { %8995 = vmatprep.subr.bf16.mxu1 %v8994_v26 }
 0x2ce   : > { %8760 = vmatmul.mubr.msk.f32.gmra.mrb[34].mxu1 %vm3969_vm3, %v10961_v25 }
 0x2cf   : > { %8762 = vmatprep.mubr.msk.f32.mxu1 %vm3969_vm3, %v10965_v22 }
 0x2d2   : > { %8763 = vmatmul.mubr.msk.f32.gmra.mrb[36].mxu1 %vm3969_vm3, %v10969_v7 }
 0x2d3   : > { %8765 = vmatprep.mubr.msk.f32.mxu1 %vm3969_vm3, %v10973_v55 }
 0x2d6   : > { %8766 = vmatmul.mubr.msk.f32.gmra.mrb[38].mxu1 %vm3969_vm3, %v4569_v37 }
 0x2d7   : > { %8772 = vmatprep.mubr.msk.f32.mxu1 %vm3969_vm3, %v10845_v9  ;;  %v4717_v9 = vld [vmem:[#allocation4 + $0x81] sm:$0xff] }
 0x2da   : > { %8773 = vmatmul.mubr.msk.f32.vlgmr.msra.gmra.mrb[32].mxu1 %vm3969_vm3, %v10866_v40 }
 0x2db   : > { %8997 = vmatpush3.bf16.msra.mxu1 %v8994_v26  ;;  %8775 = vmatprep.mubr.msk.f32.mxu1 %vm3969_vm3, %v10885_v10 }
 0x2dc   : > { %8999 = vmatprep.subr.bf16.mxu1 %v8998_v59 }
 0x2de   : > { %8776 = vmatmul.mubr.msk.f32.gmra.mrb[34].mxu1 %vm3969_vm3, %v10904_v36 }
 0x2df   : > { %8778 = vmatprep.mubr.msk.f32.mxu1 %vm3969_vm3, %v10923_v35 }
 0x2e2   : > { %8779 = vmatmul.mubr.msk.f32.gmra.mrb[36].mxu1 %vm3969_vm3, %v10932_v12 }
 0x2e3   : > { %8781 = vmatprep.mubr.msk.f32.mxu1 %vm3969_vm3, %v10939_v50 }
 0x2e6   : > { %8782 = vmatmul.mubr.msk.f32.gmra.mrb[38].mxu1 %vm3969_vm3, %v4717_v9 }
 0x2e7   : > { %8788 = vmatprep.mubr.msk.f32.mxu1 %vm3969_vm3, %v4415_v47 }
 0x2ea   : > { %8789 = vmatmul.mubr.msk.f32.vlgmr.msra.gmra.mrb[32].mxu1 %vm3969_vm3, %v10985_v31 }
 0x2eb   : > { %9001 = vmatpush3.bf16.msra.mxu1 %v8998_v59  ;;  %8791 = vmatprep.mubr.msk.f32.mxu1 %vm3969_vm3, %v10989_v43 }
 0x2ec   : > { %9003 = vmatprep.subr.bf16.mxu1 %v9002_v1 }
 0x2ee   : > { %8792 = vmatmul.mubr.msk.f32.gmra.mrb[34].mxu1 %vm3969_vm3, %v10993_v45 }
 0x2ef   : > { %8794 = vmatprep.mubr.msk.f32.mxu1 %vm3969_vm3, %v10997_v51 }
 0x2f2   : > { %8795 = vmatmul.mubr.msk.f32.gmra.mrb[36].mxu1 %vm3969_vm3, %v11001_v52 }
 0x2f3   : > { %8797 = vmatprep.mubr.msk.f32.mxu1 %vm3969_vm3, %v11005_v33 }
 0x2f6   : > { %8798 = vmatmul.mubr.msk.f32.gmra.mrb[38].mxu1 %vm3969_vm3, %v4865_v32 }
 0x2f7   : > { %8804 = vmatprep.mubr.msk.f32.mxu1 %vm3969_vm3, %v10952_v63 }
 0x2fa   : > { %8805 = vmatmul.mubr.msk.f32.vlgmr.msra.gmra.mrb[32].mxu1 %vm3969_vm3, %v10957_v23 }
 0x2fb   : > { %9005 = vmatpush3.bf16.msra.mxu1 %v9002_v1  ;;  %8807 = vmatprep.mubr.msk.f32.mxu1 %vm3969_vm3, %v10961_v25 }
 0x2fc   : > { %9007 = vmatprep.subr.bf16.mxu1 %v9006_v0 }
 0x2fe   : > { %8808 = vmatmul.mubr.msk.f32.gmra.mrb[34].mxu1 %vm3969_vm3, %v10965_v22 }
 0x2ff   : > { %8810 = vmatprep.mubr.msk.f32.mxu1 %vm3969_vm3, %v10969_v7 }
 0x302   : > { %8811 = vmatmul.mubr.msk.f32.gmra.mrb[36].mxu1 %vm3969_vm3, %v10973_v55 }
 0x303   : > { %8813 = vmatprep.mubr.msk.f32.mxu1 %vm3969_vm3, %v4569_v37 }
 0x306   : > { %8814 = vmatmul.mubr.msk.f32.gmra.mrb[38].mxu1 %vm3969_vm3, %v5014_v2  ;;  %v7745_v2 = vld [vmem:[%s11394_s5 + $0x20] sm:$0xff] }
 0x307   : > { %8820 = vmatprep.mubr.msk.f32.mxu1 %vm3969_vm3, %v10866_v40  ;;  %v5310_v40 = vld [vmem:[#allocation4 + $0x92] sm:$0xff] }
 0x30a   : > { %8821 = vmatmul.mubr.msk.f32.vlgmr.msra.gmra.mrb[32].mxu1 %vm3969_vm3, %v10885_v10  ;;  %v7739_v10 = vld [vmem:[%s11394_s5 + $0x10] sm:$0xff] }
 0x30b   : > { %9009 = vmatpush3.bf16.msra.mxu1 %v9006_v0  ;;  %8823 = vmatprep.mubr.msk.f32.mxu1 %vm3969_vm3, %v10904_v36  ;;  %v7740_v36 = vld [vmem:[%s11394_s5 + $0x18] sm:$0xff] }
 0x30e   : > { %8824 = vmatmul.mubr.msk.f32.gmra.mrb[34].mxu1 %vm3969_vm3, %v10923_v35  ;;  %v9010_v35 = vpack.c.bf16 %v7740_v36, %v7739_v10 }
 0x30f   : > { %8826 = vmatprep.mubr.msk.f32.mxu1 %vm3969_vm3, %v10932_v12 }
 0x310   : > { %9011 = vmatprep.subr.bf16.mxu1 %v9010_v35 }
 0x312   : > { %8827 = vmatmul.mubr.msk.f32.gmra.mrb[36].mxu1 %vm3969_vm3, %v10939_v50 }
 0x313   : > { %8829 = vmatprep.mubr.msk.f32.mxu1 %vm3969_vm3, %v4717_v9 }
 0x316   : > { %8830 = vmatmul.mubr.msk.f32.gmra.mrb[38].mxu1 %vm3969_vm3, %v5162_v14  ;;  %v7746_v14 = vld [vmem:[%s11394_s5 + $0x28] sm:$0xff] }
 0x317   : > { %8836 = vmatprep.mubr.msk.f32.mxu1 %vm3969_vm3, %v10985_v31  ;;  %v9018_v10 = vpack.c.bf16 %v7746_v14, %v7745_v2 }
 0x31a   : > { %8837 = vmatmul.mubr.msk.f32.vlgmr.msra.gmra.mrb[32].mxu1 %vm3969_vm3, %v10989_v43 }
 0x31b   : > { %8839 = vmatprep.mubr.msk.f32.mxu1 %vm3969_vm3, %v10993_v45  ;;  %9013 = vmatpush3.bf16.msra.mxu1 %v9010_v35  ;;  %v7749_v35 = vld [vmem:[%s11394_s5 + $0x30] sm:$0xff] }
 0x31c   : > { %9015 = vmatprep.subr.bf16.mxu1 %v11144_v6 }
 0x31e   : > { %8840 = vmatmul.mubr.msk.f32.gmra.mrb[34].mxu1 %vm3969_vm3, %v10997_v51 }
 0x31f   : > { %8842 = vmatprep.mubr.msk.f32.mxu1 %vm3969_vm3, %v11001_v52 }
 0x322   : > { %8843 = vmatmul.mubr.msk.f32.gmra.mrb[36].mxu1 %vm3969_vm3, %v11005_v33 }
 0x323   : > { %8845 = vmatprep.mubr.msk.f32.mxu1 %vm3969_vm3, %v4865_v32 }
 0x326   : > { %8846 = vmatmul.mubr.msk.f32.gmra.mrb[38].mxu1 %vm3969_vm3, %v5310_v40 }
 0x3ed   : > { %v8838_v39 = vpop.f32.mrb[32].mxu1 }
 0x3ee   : > { %v5459_v8 = vadd.f32 %v8838_v39, %v7738_v16  ;;  %v5404_v34 = vpop.f32.mrb[33].mxu1 }
 0x3ef   : > { %v5458_v3 = vadd.f32 %v7738_v16, %v5404_v34 }
 0x3f0   : > { %v5467_v11 = vmax.f32 %v5459_v8, 0.0  ;;  %v7754_v8 = vld [vmem:[%s11394_s5 + $0x48] sm:$0xff] }
 0x3f1   : > { %v5466_v41 = vmax.f32 %v5458_v3, 0.0  ;;  %v8841_v29 = vpop.f32.mrb[34].mxu1 }
 0x3f2   : > { %5475 = vst.msk [vmem:[#allocation5 + $0x8] sm:$0xff] %vm3969_vm3, %v5467_v11  ;;  %v5461_v12 = vadd.f32 %v8841_v29, %v7738_v16  ;;  %v5414_v18 = vpop.f32.mrb[35].mxu1  ;;  %v7758_v29 = vld [vmem:[%s11394_s5 + $0x58] sm:$0xff] }
 0x3f3   : > { %5474 = vst.msk [vmem:[#allocation5] sm:$0xff] %vm3969_vm3, %v5466_v41  ;;  %v5460_v13 = vadd.f32 %v7738_v16, %v5414_v18  ;;  %v7757_v41 = vld [vmem:[%s11394_s5 + $0x50] sm:$0xff] }
 0x3f4   : > { %v5469_v15 = vmax.f32 %v5461_v12, 0.0  ;;  %v9030_v18 = vpack.c.bf16 %v7758_v29, %v7757_v41  ;;  %v7782_v29 = vld [vmem:[%s11396_s7 + $0x38] sm:$0xff] }
 0x3f5   : > { %v5468_v20 = vmax.f32 %v5460_v13, 0.0  ;;  %v8844_v17 = vpop.f32.mrb[36].mxu1 }
 0x3f6   : > { %5477 = vst.msk [vmem:[#allocation5 + $0x18] sm:$0xff] %vm3969_vm3, %v5469_v15  ;;  %v5463_v42 = vadd.f32 %v8844_v17, %v7738_v16  ;;  %v5424_v19 = vpop.f32.mrb[37].mxu1  ;;  %v7761_v15 = vld [vmem:[%s11394_s5 + $0x60] sm:$0xff] }
 0x3f7   : > { %5476 = vst.msk [vmem:[#allocation5 + $0x10] sm:$0xff] %vm3969_vm3, %v5468_v20  ;;  %v5462_v56 = vadd.f32 %v7738_v16, %v5424_v19  ;;  %v7762_v20 = vld [vmem:[%s11394_s5 + $0x68] sm:$0xff] }
 0x3f8   : > { %v5471_v50 = vmax.f32 %v5463_v42, 0.0  ;;  %v9034_v42 = vpack.c.bf16 %v7762_v20, %v7761_v15  ;;  %v7785_v15 = vld [vmem:[%s11396_s7 + $0x48] sm:$0xff] }
 0x3f9   : > { %v5470_v54 = vmax.f32 %v5462_v56, 0.0  ;;  %v8847_v21 = vpop.f32.mrb[38].mxu1  ;;  %v7765_v56 = vld [vmem:[%s11394_s5 + $0x70] sm:$0xff] }
 0x3fa   : > { %v5482_v44 = vld [vmem:[#allocation5] ss:$2 sm:$0xff]  ;;  %v5490_v30 = vld [vmem:[#allocation5 + $0x1] ss:$2 sm:$0xff]  ;;  %5479 = vst.msk [vmem:[#allocation5 + $0x28] sm:$0xff] %vm3969_vm3, %v5471_v50  ;;  %v5465_v63 = vadd.f32 %v8847_v21, %v7738_v16  ;;  %v5434_v23 = vpop.f32.mrb[39].mxu1 }
 0x3fb   : > { %v5497_v25 = vmax.f32 %v5482_v44, %v5490_v30  ;;  %5478 = vst.msk [vmem:[#allocation5 + $0x20] sm:$0xff] %vm3969_vm3, %v5470_v54  ;;  %v5464_v22 = vadd.f32 %v7738_v16, %v5434_v23  ;;  %v9022_v16 = vpack.c.bf16 %v7750_v5, %v7749_v35  ;;  %v7766_v50 = vld [vmem:[%s11394_s5 + $0x78] sm:$0xff]  ;;  %v7769_v30 = vld [vmem:[%s11394_s5 + $0x80] sm:$0xff] }
 0x3fc   : > { %v5473_v7 = vmax.f32 %v5465_v63, 0.0  ;;  %v9038_v21 = vpack.c.bf16 %v7766_v50, %v7765_v56  ;;  %v7770_v63 = vld [vmem:[%s11394_s5 + $0x88] sm:$0xff]  ;;  %v6434_v5 = vld [vmem:[%s11396_s7] sm:$0xff] }
 0x3fd   : > { %v5505_v27 = vcombine.high %v5497_v25, %v5497_v25  ;;  %v5472_v55 = vmax.f32 %v5464_v22, 0.0  ;;  %v5514_v24 = vsel %vm5513_vm5, %v5497_v25, -inf  ;;  %v9042_v25 = vpack.c.bf16 %v7770_v63, %v7769_v30  ;;  %v7793_v63 = vld [vmem:[%s11396_s7 + $0x70] sm:$0xff] }
 0x3fe   : > { %v5484_v57 = vld [vmem:[#allocation5 + $0x10] ss:$2 sm:$0xff]  ;;  %v5492_v46 = vld [vmem:[#allocation5 + $0x11] ss:$2 sm:$0xff]  ;;  %5481 = vst.msk [vmem:[#allocation5 + $0x38] sm:$0xff] %vm3969_vm3, %v5473_v7 }
 0x3ff   : > { %v5515_v47 = vsel %vm5513_vm5, %v5505_v27, -inf  ;;  %v5498_v31 = vmax.f32 %v5484_v57, %v5492_v46  ;;  %5480 = vst.msk [vmem:[#allocation5 + $0x30] sm:$0xff] %vm3969_vm3, %v5472_v55  ;;  %v7774_v57 = vld [vmem:[%s11396_s7 + $0x10] sm:$0xff]  ;;  %v7775_v46 = vld [vmem:[%s11396_s7 + $0x18] sm:$0xff] }
 0x400   : > { %v5516_v43 = vmax.f32 %v5514_v24, %v5515_v47  ;;  %v9556_v24 = vmov 0.0|0.0   ;;  %v9047_v47 = vpack.c.bf16 %v7775_v46, %v7774_v57 }
 0x401   : > { %v5506_v45 = vcombine.high %v5498_v31, %v5498_v31  ;;  %v5517_v33 = vsel %vm5513_vm5, %v5498_v31, -inf  ;;  %v7773_v31 = vld [vmem:[%s11395_s6] ss:$0 sm:$0xff] }
 0x402   : > { %5534 = vst.msk [vmem:[#allocation6 + $0x9] sm:$0xf] %vm5513_vm5, %v5516_v43  ;;  %v5486_v51 = vld [vmem:[#allocation5 + $0x20] ss:$2 sm:$0xff]  ;;  %v5494_v52 = vld [vmem:[#allocation5 + $0x21] ss:$2 sm:$0xff] }
 0x403   : > { %v5518_v58 = vsel %vm5513_vm5, %v5506_v45, -inf  ;;  %v5499_v49 = vmax.f32 %v5486_v51, %v5494_v52 }
 0x404   : > { %v5519_v26 = vmax.f32 %v5517_v33, %v5518_v58 }
 0x405   : > { %v5507_v37 = vcombine.high %v5499_v49, %v5499_v49  ;;  %v5520_v59 = vsel %vm5513_vm5, %v5499_v49, -inf  ;;  %v9558_v49 = vmov 1983009808  }
 0x406   : > { %5535 = vst.msk [vmem:[#allocation6 + $0x11] sm:$0xf] %vm5513_vm5, %v5519_v26  ;;  %v5488_v28 = vld [vmem:[#allocation5 + $0x30] ss:$2 sm:$0xff]  ;;  %v5496_v60 = vld [vmem:[#allocation5 + $0x31] ss:$2 sm:$0xff]  ;;  %v6400_v26 = vunpack.c.l.s4 %v9558_v49 }
 0x407   : > { %v5521_v9 = vsel %vm5513_vm5, %v5507_v37, -inf  ;;  %v5500_v53 = vmax.f32 %v5488_v28, %v5496_v60  ;;  %v6402_v37 = vlaneseq }
 0x408   : > { %v5522_v4 = vmax.f32 %v5520_v59, %v5521_v9  ;;  %v6401_v28 = vunpack.c.0.s8 %v6400_v26 }
 0x409   : > { %v5508_v1 = vcombine.high %v5500_v53, %v5500_v53  ;;  %v9455_v32 = vld [vmem:[#allocation6 + $0x1] ss:$8 sps:$4 sm:$0xff]   ;;  %v5523_v61 = vsel %vm5513_vm5, %v5500_v53, -inf  ;;  %v11247_v60 = vshrl.u32 %v6402_v37, 7  ;;  %vm7263_vm8 = vcmp.lt.s32.totalorder %v6402_v37, 16 }
 0x40a   : > { %5536 = vst.msk [vmem:[#allocation6 + $0x19] sm:$0xf] %vm5513_vm5, %v5522_v4  ;;  %8852 = vmatprep.mubr.msk.f32.mxu1 %vm3969_vm3, %v9455_v32  ;;  %v9457_v36 = vld [vmem:[#allocation6] ss:$8 sps:$4 sm:$0xff]  }
 0x40b   : > { %v5524_v62 = vsel %vm5513_vm5, %v5508_v1, -inf  ;;  %v9459_v39 = vld [vmem:[#allocation6 + $0x2] ss:$8 sps:$4 sm:$0xff]   ;;  %v6404_v59 = vsub.s32 %v6401_v28, %v11247_v60 }
 0x40c   : > { %v5525_v0 = vmax.f32 %v5523_v61, %v5524_v62 }
 0x40d   : > { %v9461_v11 = vld [vmem:[#allocation6 + $0x8] ss:$8 sps:$4 sm:$0xff]  }
 0x40e   : > { %5537 = vst.msk [vmem:[#allocation6 + $0x21] sm:$0xf] %vm5513_vm5, %v5525_v0  ;;  %v9463_v13 = vld [vmem:[#allocation6 + $0x9] ss:$8 sps:$4 sm:$0xff]  }
 0x40f   : > { %v9465_v19 = vld [vmem:[#allocation6 + $0xa] ss:$8 sps:$4 sm:$0xff]  }
 0x411   : > { %v9456_v40 = vld [vmem:[#allocation6 + $0x11] ss:$8 sps:$4 sm:$0xff]  }
 0x412   : > { %8853 = vmatmul.mubr.msk.f32.vlgmr.msra.gmra.mrb[40].mxu1 %vm3969_vm3, %v9456_v40  ;;  %v9458_v38 = vld [vmem:[#allocation6 + $0x10] ss:$8 sps:$4 sm:$0xff]  }
 0x413   : > { %9017 = vmatpush3.bf16.msra.mxu1 %v11144_v6  ;;  %8859 = vmatprep.mubr.msk.f32.mxu1 %vm3969_vm3, %v9457_v36  ;;  %v7753_v6 = vld [vmem:[%s11394_s5 + $0x40] sm:$0xff] }
 0x414   : > { %9019 = vmatprep.subr.bf16.mxu1 %v9018_v10  ;;  %v9460_v34 = vld [vmem:[#allocation6 + $0x12] ss:$8 sps:$4 sm:$0xff]   ;;  %v9026_v3 = vpack.c.bf16 %v7754_v8, %v7753_v6 }
 0x415   : > { %v9462_v12 = vld [vmem:[#allocation6 + $0x18] ss:$8 sps:$4 sm:$0xff]   ;;  %v7778_v6 = vld [vmem:[%s11396_s7 + $0x20] sm:$0xff] }
 0x416   : > { %v9464_v17 = vld [vmem:[#allocation6 + $0x19] ss:$8 sps:$4 sm:$0xff]  }
 0x417   : > { %v9466_v54 = vld [vmem:[#allocation6 + $0x1a] ss:$8 sps:$4 sm:$0xff]  }
 0x418   : > { %v9467_v44 = vld [vmem:[#allocation6 + $0x10] ss:$8 sps:$4 sm:$0xff]   ;;  %v9468_v23 = vld [vmem:[#allocation6 + $0x20] ss:$8 sps:$4 sm:$0xff]  }
 0x419   : > { %v9469_v22 = vld [vmem:[#allocation6 + $0x11] ss:$8 sps:$4 sm:$0xff]   ;;  %v9470_v7 = vld [vmem:[#allocation6 + $0x21] ss:$8 sps:$4 sm:$0xff]  }
 0x41a   : > { %8860 = vmatmul.mubr.msk.f32.vlgmr.msra.gmra.mrb[40].mxu1 %vm3969_vm3, %v9458_v38  ;;  %v9471_v27 = vld [vmem:[#allocation6 + $0x12] ss:$8 sps:$4 sm:$0xff]   ;;  %v9472_v55 = vld [vmem:[#allocation6 + $0x22] ss:$8 sps:$4 sm:$0xff]  }
 0x41b   : > { %9021 = vmatpush3.bf16.msra.mxu1 %v9018_v10  ;;  %8866 = vmatprep.mubr.msk.f32.mxu1 %vm3969_vm3, %v9459_v39  ;;  %v6435_v38 = vld [vmem:[%s11396_s7 + $0x8] sm:$0xff] }
 0x41c   : > { %9023 = vmatprep.subr.bf16.mxu1 %v9022_v16  ;;  %v9050_v39 = vpack.c.bf16 %v6435_v38, %v6434_v5  ;;  %v7779_v8 = vld [vmem:[%s11396_s7 + $0x28] sm:$0xff]  ;;  %v9559_v5 = vmov 1966171168  }
 0x41d   : > { %v7238_v38 = vunpack.c.l.s4 %v9559_v5 }
 0x422   : > { %8867 = vmatmul.mubr.msk.f32.vlgmr.msra.gmra.mrb[40].mxu1 %vm3969_vm3, %v9460_v34 }
 0x423   : > { %9025 = vmatpush3.bf16.msra.mxu1 %v9022_v16  ;;  %8873 = vmatprep.mubr.msk.f32.mxu1 %vm3969_vm3, %v9461_v11  ;;  %v7781_v11 = vld [vmem:[%s11396_s7 + $0x30] sm:$0xff] }
 0x424   : > { %9027 = vmatprep.subr.bf16.mxu1 %v9026_v3 }
 0x42a   : > { %8874 = vmatmul.mubr.msk.f32.vlgmr.msra.gmra.mrb[40].mxu1 %vm3969_vm3, %v9462_v12  ;;  %v9056_v12 = vpack.c.bf16 %v7782_v29, %v7781_v11 }
 0x42b   : > { %9029 = vmatpush3.bf16.msra.mxu1 %v9026_v3  ;;  %8880 = vmatprep.mubr.msk.f32.mxu1 %vm3969_vm3, %v9463_v13  ;;  %v9053_v3 = vpack.c.bf16 %v7779_v8, %v7778_v6  ;;  %v7784_v13 = vld [vmem:[%s11396_s7 + $0x40] sm:$0xff] }
 0x42c   : > { %9031 = vmatprep.subr.bf16.mxu1 %v9030_v18  ;;  %v9059_v20 = vpack.c.bf16 %v7785_v15, %v7784_v13 }
 0x432   : > { %8881 = vmatmul.mubr.msk.f32.vlgmr.msra.gmra.mrb[40].mxu1 %vm3969_vm3, %v9464_v17 }
 0x433   : > { %9033 = vmatpush3.bf16.msra.mxu1 %v9030_v18  ;;  %8887 = vmatprep.mubr.msk.f32.mxu1 %vm3969_vm3, %v9465_v19  ;;  %v7788_v19 = vld [vmem:[%s11396_s7 + $0x58] sm:$0xff] }
 0x434   : > { %9035 = vmatprep.subr.bf16.mxu1 %v9034_v42 }
 0x43a   : > { %8888 = vmatmul.mubr.msk.f32.vlgmr.msra.gmra.mrb[40].mxu1 %vm3969_vm3, %v9466_v54  ;;  %v7790_v54 = vld [vmem:[%s11396_s7 + $0x60] sm:$0xff] }
 0x43b   : > { %9037 = vmatpush3.bf16.msra.mxu1 %v9034_v42  ;;  %8894 = vmatprep.mubr.msk.f32.mxu1 %vm3969_vm3, %v9467_v44  ;;  %v7787_v42 = vld [vmem:[%s11396_s7 + $0x50] sm:$0xff] }
 0x43c   : > { %9039 = vmatprep.subr.bf16.mxu1 %v9038_v21  ;;  %v9062_v56 = vpack.c.bf16 %v7788_v19, %v7787_v42 }
 0x442   : > { %8895 = vmatmul.mubr.msk.f32.vlgmr.msra.gmra.mrb[40].mxu1 %vm3969_vm3, %v9468_v23  ;;  %v7794_v23 = vld [vmem:[%s11396_s7 + $0x78] sm:$0xff] }
 0x443   : > { %9041 = vmatpush3.bf16.msra.mxu1 %v9038_v21  ;;  %8901 = vmatprep.mubr.msk.f32.mxu1 %vm3969_vm3, %v9469_v22  ;;  %v7791_v21 = vld [vmem:[%s11396_s7 + $0x68] sm:$0xff] }
 0x444   : > { %9043 = vmatprep.subr.bf16.mxu1 %v9042_v25  ;;  %v9065_v44 = vpack.c.bf16 %v7791_v21, %v7790_v54 }
 0x44a   : > { %8902 = vmatmul.mubr.msk.f32.vlgmr.msra.gmra.mrb[40].mxu1 %vm3969_vm3, %v9470_v7  ;;  %v7796_v7 = vld [vmem:[%s11396_s7 + $0x80] sm:$0xff] }
 0x44b   : > { %9045 = vmatpush3.bf16.msra.mxu1 %v9042_v25  ;;  %8908 = vmatprep.mubr.msk.f32.mxu1 %vm3969_vm3, %v9471_v27  ;;  %v9068_v25 = vpack.c.bf16 %v7794_v23, %v7793_v63  ;;  %v7797_v27 = vld [vmem:[%s11396_s7 + $0x88] sm:$0xff] }
 0x44c   : > { %9046 = vmatprep.subr.bf16.mxu1 %v9556_v24 }
 0x452   : > { %8909 = vmatmul.mubr.msk.f32.vlgmr.msra.gmra.mrb[40].mxu1 %vm3969_vm3, %v9472_v55  ;;  %v9071_v55 = vpack.c.bf16 %v7797_v27, %v7796_v7 }
 0x453   : > { %8915 = vmatprep.mubr.msk.f32.mxu1 %vm9557_vm7, %v11492_v48  ;;  %9048 = vmatpush3.bf16.msra.mxu1 %v9047_v47 }
 0x454   : > { %9049 = vmatprep.subr.bf16.mxu1 %v9556_v24 }
 0x525   : > { %v8910_v43 = vpop.f32.mrb[40].mxu1 }
 0x526   : > { %v6388_v45 = vadd.f32 %v8910_v43, %v7773_v31  ;;  %v6369_v51 = vpop.f32.mrb[41].mxu1 }
 0x527   : > { %v6387_v52 = vadd.f32 %v7773_v31, %v6369_v51 }
 0x528   : > { %v6390_v33 = vmax.f32 %v6388_v45, 0.0 }
 0x529   : > { %v6389_v58 = vmax.f32 %v6387_v52, 0.0 }
 0x52a   : > { %6392 = vst.msk [vmem:[#allocation7 + $0x8] sm:$0xff] %vm3969_vm3, %v6390_v33 }
 0x52b   : > { %6391 = vst.msk [vmem:[#allocation7] sm:$0xff] %vm3969_vm3, %v6389_v58 }
 0x532   : > { %v6393_v9 = vld [vmem:[#allocation7] ss:$2 sm:$0xff]  ;;  %v6395_v53 = vld [vmem:[#allocation7 + $0x1] ss:$2 sm:$0xff] }
 0x533   : > { %v6396_v4 = vmax.f32 %v6393_v9, %v6395_v53 }
 0x535   : > { %v6398_v1 = vcombine.high %v6396_v4, %v6396_v4  ;;  %v6405_v32 = vrot.slane %v6396_v4, %v6404_v59 }
 0x537   : > { %v6412_v61 = vrot.slane %v6398_v1, %v6404_v59  ;;  %v6413_v62 = vcombine.high %v6405_v32, %v6405_v32  ;;  %v6419_v2 = vsel %vm4106_vm4, %v6405_v32, -inf }
 0x539   : > { %v6414_v0 = vcombine.high %v6412_v61, %v6412_v61  ;;  %v6420_v14 = vsel %vm4106_vm4, %v6413_v62, -inf  ;;  %v6422_v10 = vsel %vm4106_vm4, %v6412_v61, -inf }
 0x53a   : > { %v6421_v40 = vmax.f32 %v6419_v2, %v6420_v14  ;;  %v7799_v14 = vld [vmem:[%s11397_s8] ss:$0 sm:$0xff] }
 0x53b   : > { %v6423_v36 = vsel %vm4106_vm4, %v6414_v0, -inf }
 0x53c   : > { %v6424_v35 = vmax.f32 %v6422_v10, %v6423_v36  ;;  %6430 = vst.msk [vmem:[#allocation8 + $0x5] sm:$0x3] %vm4106_vm4, %v6421_v40 }
 0x53e   : > { %6431 = vst.msk [vmem:[#allocation8 + $0x9] sm:$0x3] %vm4106_vm4, %v6424_v35 }
 0x543   : > { %v9482_v16 = vld.sshfl [vmem:[#allocation8 + $0x1] sm:$0xf pattern:$0x76325410] }
 0x544   : > { %v9483_v34 = vld.sshfl [vmem:[#allocation8] sm:$0xf pattern:$0x76325410]  ;;  %8916 = vmatmul.mubr.msk.f32.vlgmr.msra.gmra.mrb[42].mxu1 %vm3969_vm3, %v9482_v16  ;;  %v7239_v16 = vunpack.c.0.s8 %v7238_v38 }
 0x545   : > { %9051 = vmatpush3.bf16.msra.mxu1 %v9050_v39  ;;  %8922 = vmatprep.mubr.msk.f32.mxu1 %vm9557_vm7, %v11492_v48  ;;  %v9484_v41 = vld.sshfl [vmem:[#allocation8 + $0x2] sm:$0xf pattern:$0x76325410] }
 0x546   : > { %9052 = vmatprep.subr.bf16.mxu1 %v9556_v24  ;;  %v9485_v18 = vld.sshfl [vmem:[#allocation8 + $0x4] sm:$0xf pattern:$0x76325410]  ;;  %v7242_v39 = vsub.s32 %v7239_v16, %v11247_v60 }
 0x547   : > { %v9486_v17 = vld.sshfl [vmem:[#allocation8 + $0x5] sm:$0xf pattern:$0x76325410] }
 0x548   : > { %8923 = vmatmul.mubr.msk.f32.vlgmr.msra.gmra.mrb[44].mxu1 %vm3969_vm3, %v9483_v34  ;;  %v9487_v50 = vld.sshfl [vmem:[#allocation8 + $0x6] sm:$0xf pattern:$0x76325410] }
 0x549   : > { %9054 = vmatpush3.bf16.msra.mxu1 %v9053_v3  ;;  %8929 = vmatprep.mubr.msk.f32.mxu1 %vm9557_vm7, %v11492_v48  ;;  %v9488_v30 = vld.sshfl [vmem:[#allocation8 + $0x8] sm:$0xf pattern:$0x76325410] }
 0x54a   : > { %9055 = vmatprep.subr.bf16.mxu1 %v9556_v24  ;;  %v9489_v22 = vld.sshfl [vmem:[#allocation8 + $0x9] sm:$0xf pattern:$0x76325410] }
 0x54b   : > { %v9490_v57 = vld.sshfl [vmem:[#allocation8 + $0xa] sm:$0xf pattern:$0x76325410] }
 0x54c   : > { %8930 = vmatmul.mubr.msk.f32.vlgmr.msra.gmra.mrb[46].mxu1 %vm3969_vm3, %v9484_v41 }
 0x54d   : > { %9057 = vmatpush3.bf16.msra.mxu1 %v9056_v12  ;;  %8936 = vmatprep.mubr.msk.f32.mxu1 %vm9557_vm7, %v11492_v48 }
 0x54e   : > { %9058 = vmatprep.subr.bf16.mxu1 %v9556_v24 }
 0x550   : > { %8937 = vmatmul.mubr.msk.f32.vlgmr.msra.gmra.mrb[48].mxu1 %vm3969_vm3, %v9485_v18 }
 0x551   : > { %9060 = vmatpush3.bf16.msra.mxu1 %v9059_v20  ;;  %8943 = vmatprep.mubr.msk.f32.mxu1 %vm9557_vm7, %v11492_v48 }
 0x552   : > { %9061 = vmatprep.subr.bf16.mxu1 %v9556_v24 }
 0x554   : > { %8944 = vmatmul.mubr.msk.f32.vlgmr.msra.gmra.mrb[50].mxu1 %vm3969_vm3, %v9486_v17 }
 0x555   : > { %9063 = vmatpush3.bf16.msra.mxu1 %v9062_v56  ;;  %8950 = vmatprep.mubr.msk.f32.mxu1 %vm9557_vm7, %v11492_v48 }
 0x556   : > { %9064 = vmatprep.subr.bf16.mxu1 %v9556_v24 }
 0x558   : > { %8951 = vmatmul.mubr.msk.f32.vlgmr.msra.gmra.mrb[52].mxu1 %vm3969_vm3, %v9487_v50 }
 0x559   : > { %9066 = vmatpush3.bf16.msra.mxu1 %v9065_v44  ;;  %8957 = vmatprep.mubr.msk.f32.mxu1 %vm9557_vm7, %v11492_v48 }
 0x55a   : > { %9067 = vmatprep.subr.bf16.mxu1 %v9556_v24 }
 0x55c   : > { %8958 = vmatmul.mubr.msk.f32.vlgmr.msra.gmra.mrb[54].mxu1 %vm3969_vm3, %v9488_v30 }
 0x55d   : > { %9069 = vmatpush3.bf16.msra.mxu1 %v9068_v25  ;;  %8964 = vmatprep.mubr.msk.f32.mxu1 %vm9557_vm7, %v11492_v48 }
 0x55e   : > { %9070 = vmatprep.subr.bf16.mxu1 %v9556_v24 }
 0x560   : > { %8965 = vmatmul.mubr.msk.f32.vlgmr.msra.gmra.mrb[56].mxu1 %vm3969_vm3, %v9489_v22 }
 0x561   : > { %9072 = vmatpush3.bf16.msra.mxu1 %v9071_v55  ;;  %8971 = vmatprep.mubr.msk.f32.mxu1 %vm9557_vm7, %v11492_v48 }
 0x564   : > { %8972 = vmatmul.mubr.msk.f32.vlgmr.msra.gmra.mrb[58].mxu1 %vm3969_vm3, %v9490_v57 }
 0x617   : > { %v6519_v46 = vpop.f32.mrb[42].mxu1 }
 0x618   : > { %v8917_v47 = vpop.f32.mrb[43].mxu1 }
 0x61b   : > { %v6601_v31 = vpop.f32.mrb[44].mxu1 }
 0x61c   : > { %v6602_v43 = vadd.f32 %v6601_v31, %v6519_v46  ;;  %v8924_v45 = vpop.f32.mrb[45].mxu1 }
 0x61f   : > { %v6688_v51 = vpop.f32.mrb[46].mxu1 }
 0x620   : > { %v6692_v52 = vadd.f32 %v6688_v51, %v6602_v43  ;;  %v8931_v33 = vpop.f32.mrb[47].mxu1 }
 0x623   : > { %v6776_v58 = vpop.f32.mrb[48].mxu1 }
 0x624   : > { %v6780_v49 = vadd.f32 %v6776_v58, %v6692_v52  ;;  %v8938_v24 = vpop.f32.mrb[49].mxu1 }
 0x627   : > { %v6864_v26 = vpop.f32.mrb[50].mxu1 }
 0x628   : > { %v6868_v28 = vadd.f32 %v6864_v26, %v6780_v49  ;;  %v8945_v59 = vpop.f32.mrb[51].mxu1 }
 0x62b   : > { %v6952_v9 = vpop.f32.mrb[52].mxu1 }
 0x62c   : > { %v6956_v53 = vadd.f32 %v6952_v9, %v6868_v28  ;;  %v8952_v4 = vpop.f32.mrb[53].mxu1 }
 0x62f   : > { %v7041_v48 = vpop.f32.mrb[54].mxu1 }
 0x630   : > { %v7045_v1 = vadd.f32 %v7041_v48, %v6956_v53  ;;  %v8959_v32 = vpop.f32.mrb[55].mxu1 }
 0x633   : > { %v7129_v61 = vpop.f32.mrb[56].mxu1 }
 0x634   : > { %v7133_v62 = vadd.f32 %v7129_v61, %v7045_v1  ;;  %v8966_v0 = vpop.f32.mrb[57].mxu1 }
 0x637   : > { %v7217_v2 = vpop.f32.mrb[58].mxu1 }
 0x638   : > { %v7221_v40 = vadd.f32 %v7217_v2, %v7133_v62  ;;  %v8973_v10 = vpop.f32.mrb[59].mxu1 }
 0x63a   : > { %v7229_v36 = vadd.f32 %v7799_v14, %v7221_v40 }
 0x63c   : > { %v7230_v35 = vmax.f32 %v7229_v36, 0.0 }
 0x63e   : > { %7231 = vst.msk [vmem:[#allocation9] sm:$0xf] %vm5513_vm5, %v7230_v35 }
 0x645   : > { %v7232_v6 = vld [vmem:[#allocation9] ss:$2 sm:$0x3]  ;;  %v7234_v8 = vld [vmem:[#allocation9 + $0x1] ss:$2 sm:$0x3] }
 0x646   : > { %v7235_v34 = vmax.f32 %v7232_v6, %v7234_v8 }
 0x648   : > { %v7243_v3 = vrot.slane %v7235_v34, %v7242_v39 }
 0x64a   : > { %v7244_v11 = vcombine.high %v7243_v3, %v7243_v3  ;;  %v7251_v41 = vrot.slane %v7243_v3, %v7242_v39 }
 0x64c   : > { %v7258_v29 = vrot.slane %v7244_v11, %v7242_v39  ;;  %v7265_v12 = vsel %vm7263_vm8, %v7251_v41, -inf }
 0x64e   : > { %v7266_v18 = vsel %vm7263_vm8, %v7258_v29, -inf }
 0x64f   : > { %v7267_v13 = vmax.f32 %v7265_v12, %v7266_v18 }
 0x651   : > { %7269 = vst.msk [vmem:[%s324_s14] sm:$0x1] %vm7268_vm9, %v7267_v13 }
 0x652   : > { %9504 = shalt.err (!%p9501_p3)
}
 0x653   : > { %s9505_s27 = scalar_lea.hbm %s11347_s22, 16  ;;  %s9509_s14 = scalar_lea.hbm %s11398_s9, 32 }
 0x654   : > { %p9506_p4 = scmp.ne.s32.totalorder %s11347_s22, %s9505_s27  ;;  %p9510_p9 = scmp.lt.u32.totalorder %s11347_s22, %s11398_s9 }
 0x655   : > { %p9511_p10 = scmp.lt.u32.totalorder %s9509_s14, %s9505_s27  ;;  %p9513_p12 = scmp.lt.u32.totalorder %s9505_s27, %s11347_s22 }
 0x656   : > { %p9507_p7 = pnand %p9506_p4, %p9649_p5 }
 0x657   : > { %p9512_p11 = por %p9511_p10, %p9510_p9 }
 0x658   : > { %p9508_p8 = pneg %p9507_p7 }
 0x659   : > { %p9514_p13 = por %p9513_p12, %p9512_p11 }
 0x65b   : > { %p9515_p0 = pnand %p9514_p13, %p9508_p8 }
 0x65d   : > { %9518 = shalt.err (!%p9515_p0)
}
 0x65e   : > { %9411 = dma.vmem_to_hbm [thread:$0]  (%p9649_p5), %s11349_s16, 16, %s11347_s22, %s7271_s23  }
 0x65f PF: > { %p9417_p1 = scmp.ge.s32.totalorder %s9553_s12, 2  ;;  %s7295_s24 = sand.u32 1, %s9541_s30  }
 0x660   : > { %s7296_s13 = scalar_lea.sflag [#allocation11], %s7295_s24 }
 0x661   : > { %p9414_p2 = pnand %p9417_p1, %p9653_p6 }
 0x663   : > { %9536 = dma.done.wait (!%p9414_p2), %s7296_s13, 16  }
 0x664   : > { %9538 = vsyncadd (!%p9414_p2), %s7296_s13, 4294967280  ;;  %p19_p3 = scmp.ge.s32.totalorder %s9636_s15, 4   ;;  %s11493_s30 = smov %s9545_s10 }
 0x665   : > { %s11494_s10 = smov %s9549_s11  ;;  %s11495_s11 = smov %s9647_s18 }
 0x666   : > { %s11496_s12 = smov %s9636_s15  ;;  %21 = sbr.rel (!%p19_p3) target bundleno = 3 (0x3), region = 171 }
 0x66d   :  { %7300 = vsyncpa [#allocation11], 1 }
 0x66e   :  { %7302 = vsyncpa [#allocation11 + $0x1], 1 }

</bundles_post_ra>
